<compile_context>
chip_gen: v6e
topology: v6e:2x2x1
jax: 0.10.0
libtpu: 0.0.40
codegen_flags: <defaults>
</compile_context>

<pallas_src>
import math

import jax
import jax.numpy as jnp
from jax.experimental import pallas as pl
from jax.experimental.pallas import tpu as pltpu

HIDDEN_DIM = 32
NUM_LAYERS = 3
MAX_B_BLK = 256          # v6e/v7x sweet spot; VMEM stays ~2 MiB even at 256


def _pick_batch_block(batch, max_blk=MAX_B_BLK):
    """Sublane-aligned batch block; prefer >=2 grid steps (v7x megacore) when possible."""
    b8 = ((batch + 7) // 8) * 8
    if b8 <= 8:
        return 8
    half = ((b8 + 15) // 16) * 8          # ceil(b8/2) rounded up to a sublane multiple
    return min(max_blk, half)


def fudge_lstm_kernel(x_ref, len_ref, wih_ref, whh_ref, b_ref, wout_ref, bout_ref,
                      o_ref, xp_ref):
    """Per batch block:
       x_ref   : (T, B, H) f32   time-major embedded inputs
       len_ref : (B, 1)    i32   sequence lengths
       wih_ref : (L, H, 4H) f32, whh_ref: (L, H, 4H) f32, b_ref: (L, 1, 4H) f32
       wout_ref: (1, H) f32, bout_ref: (1, 1) f32
       o_ref   : (B, T) f32      logits, batch-major
       xp_ref  : (T*B, 4H) f32   hoisted layer-0 input projection
    """
    T, B, H = x_ref.shape

    lens = len_ref[...]                                        # (B, 1) int32
    w_out_b = jnp.broadcast_to(wout_ref[...], (B, H))          # hoisted, reused every step
    b_out = bout_ref[...]                                      # (1, 1)

    # Layer-0 input projection hoisted off the recurrence: one (T*B,H)@(H,4H) matmul,
    # bias folded in.  x block is read once and collapsed along sublanes only.
    x_flat = x_ref[...].reshape(T * B, H)
    xp_ref[...] = jnp.dot(x_flat, wih_ref[0],
                          preferred_element_type=jnp.float32) + b_ref[0]

    w_hh = [whh_ref[l] for l in range(NUM_LAYERS)]             # (H, 4H) each
    w_ih1, w_ih2 = wih_ref[1], wih_ref[2]
    bias1, bias2 = b_ref[1], b_ref[2]                          # (1, 4H)

    h = [jnp.zeros((B, H), jnp.float32) for _ in range(NUM_LAYERS)]
    c = [jnp.zeros((B, H), jnp.float32) for _ in range(NUM_LAYERS)]

    def cell(gates, c_prev):
        sg = jax.nn.sigmoid(gates)                             # full-width EUP pass
        th = jnp.tanh(gates)                                   # full-width EUP pass
        i_g = sg[:, 0 * H:1 * H]
        f_g = sg[:, 1 * H:2 * H]
        g_g = th[:, 2 * H:3 * H]
        o_g = sg[:, 3 * H:4 * H]
        c_new = f_g * c_prev + i_g * g_g
        h_new = o_g * jnp.tanh(c_new)
        return h_new, c_new

    # Fully unrolled time loop.  Within one t the three layers are written sequentially,
    # but layer l at step t only depends on (l, t-1) and (l-1, t), so across the unrolled
    # steps the scheduler overlaps the layers as a wavefront.
    for t in range(T):
        v1 = lens > t                                          # (B, 1) packed-seq validity
        v = jnp.broadcast_to(v1, (B, H))                       # one broadcast, 6 reuses

        # ---- layer 0 (input projection precomputed) ----
        g0 = xp_ref[pl.ds(t * B, B), :] + jnp.dot(
            h[0], w_hh[0], preferred_element_type=jnp.float32)
        h0n, c0n = cell(g0, c[0])
        h[0] = jnp.where(v, h0n, h[0])
        c[0] = jnp.where(v, c0n, c[0])

        # ---- layer 1 ----
        g1 = (jnp.dot(h[0], w_ih1, preferred_element_type=jnp.float32)
              + jnp.dot(h[1], w_hh[1], preferred_element_type=jnp.float32) + bias1)
        h1n, c1n = cell(g1, c[1])
        h[1] = jnp.where(v, h1n, h[1])
        c[1] = jnp.where(v, c1n, c[1])

        # ---- layer 2 ----
        g2 = (jnp.dot(h[1], w_ih2, preferred_element_type=jnp.float32)
              + jnp.dot(h[2], w_hh[2], preferred_element_type=jnp.float32) + bias2)
        h2n, c2n = cell(g2, c[2])
        h[2] = jnp.where(v, h2n, h[2])
        c[2] = jnp.where(v, c2n, c[2])

        # ---- fused out_linear: logit_t = <h2, w_out> + b_out; padded steps -> b_out ----
        col = jnp.sum(h[2] * w_out_b, axis=-1, keepdims=True)  # (B, 1) lane reduction
        o_ref[:, t:t + 1] = jnp.where(v1, col, 0.0) + b_out


def fudge_forward(params, inputs, lengths, *, max_b_blk=MAX_B_BLK):
    # Embedding gather in the XLA wrapper (row 0 is zero -> padding_idx=0 semantics).
    emb = params["embedding"][inputs]                          # (B, T, H)
    x = jnp.transpose(emb, (1, 0, 2)).astype(jnp.float32)      # (T, B, H) time-major
    T, B, H = x.shape

    b_blk = _pick_batch_block(B, max_b_blk)
    b_pad = ((B + b_blk - 1) // b_blk) * b_blk
    lens = lengths.astype(jnp.int32)
    if b_pad != B:
        x = jnp.pad(x, ((0, 0), (0, b_pad - B), (0, 0)))
        lens = jnp.pad(lens, (0, b_pad - B))
    lens2d = lens.reshape(b_pad, 1)

    out = pl.pallas_call(
        fudge_lstm_kernel,
        grid=(b_pad // b_blk,),
        out_shape=jax.ShapeDtypeStruct((b_pad, T), jnp.float32),
        in_specs=[
            pl.BlockSpec((T, b_blk, H), lambda i: (0, i, 0)),
            pl.BlockSpec((b_blk, 1), lambda i: (i, 0)),
            pl.BlockSpec((NUM_LAYERS, H, 4 * H), lambda i: (0, 0, 0)),
            pl.BlockSpec((NUM_LAYERS, H, 4 * H), lambda i: (0, 0, 0)),
            pl.BlockSpec((NUM_LAYERS, 1, 4 * H), lambda i: (0, 0, 0)),
            pl.BlockSpec((1, H), lambda i: (0, 0)),
            pl.BlockSpec((1, 1), lambda i: (0, 0)),
        ],
        out_specs=pl.BlockSpec((b_blk, T), lambda i: (i, 0)),
        scratch_shapes=[
            pltpu.VMEM((T * b_blk, 4 * H), jnp.float32),       # hoisted layer-0 projection
        ],
        compiler_params=pltpu.CompilerParams(
            dimension_semantics=("parallel",)),                # megacore batch sharding
    )(x, lens2d, params["w_ih"], params["w_hh"], params["b"],
      params["w_out"], params["b_out"])

    return out[:B]                                             # (B, T)


def fudge_reference(params, inputs, lengths):
    """Pure-JAX reference with identical semantics."""
    emb = params["embedding"][inputs].astype(jnp.float32)      # (B, T, H)
    B, T, H = emb.shape
    x = jnp.transpose(emb, (1, 0, 2))                          # (T, B, H)
    lens = lengths.astype(jnp.int32)
    out = x
    for l in range(NUM_LAYERS):
        w_ih, w_hh, bias = params["w_ih"][l], params["w_hh"][l], params["b"][l]
        h = jnp.zeros((B, H), jnp.float32)
        c = jnp.zeros((B, H), jnp.float32)
        outs = []
        for t in range(T):
            gates = out[t] @ w_ih + h @ w_hh + bias
            i_g = jax.nn.sigmoid(gates[:, :H])
            f_g = jax.nn.sigmoid(gates[:, H:2 * H])
            g_g = jnp.tanh(gates[:, 2 * H:3 * H])
            o_g = jax.nn.sigmoid(gates[:, 3 * H:])
            c_new = f_g * c + i_g * g_g
            h_new = o_g * jnp.tanh(c_new)
            valid = (lens > t)[:, None]
            h = jnp.where(valid, h_new, h)
            c = jnp.where(valid, c_new, c)
            outs.append(jnp.where(valid, h_new, 0.0))
        out = jnp.stack(outs, axis=0)
    logits = jnp.einsum("tbh,h->tb", out, params["w_out"][0]) + params["b_out"][0, 0]
    return logits.T                                            # (B, T)


def init_params(key, num_embeddings, hidden=HIDDEN_DIM):
    k = 1.0 / math.sqrt(hidden)
    keys = jax.random.split(key, 2 + 4 * NUM_LAYERS)
    emb = 0.02 * jax.random.normal(keys[0], (num_embeddings, hidden), jnp.float32)
    emb = emb.at[0].set(0.0)                                   # padding_idx=0
    w_ih, w_hh, b = [], [], []
    for l in range(NUM_LAYERS):
        kk = keys[1 + 4 * l:1 + 4 * (l + 1)]
        # stored pre-transposed: (H_in, 4H) so the kernel does x @ W
        w_ih.append(jax.random.uniform(kk[0], (hidden, 4 * hidden), jnp.float32, -k, k))
        w_hh.append(jax.random.uniform(kk[1], (hidden, 4 * hidden), jnp.float32, -k, k))
        b_ih = jax.random.uniform(kk[2], (4 * hidden,), jnp.float32, -k, k)
        b_hh = jax.random.uniform(kk[3], (4 * hidden,), jnp.float32, -k, k)
        b.append((b_ih + b_hh).reshape(1, 4 * hidden))
    w_out = jax.random.uniform(keys[-1], (1, hidden), jnp.float32, -k, k)
    b_out = jnp.zeros((1, 1), jnp.float32)
    return {
        "embedding": emb,
        "w_ih": jnp.stack(w_ih),
        "w_hh": jnp.stack(w_hh),
        "b": jnp.stack(b),
        "w_out": w_out,
        "b_out": b_out,
    }


if __name__ == "__main__":
    key = jax.random.PRNGKey(0)
    k_params, k_tok = jax.random.split(key)

    gpt_pad_id = 50                  # embedding table has gpt_pad_id + 1 rows
    B, T = 2, 8
    params = init_params(k_params, gpt_pad_id + 1)

    lengths_list = [8, 5]
    lengths = jnp.array(lengths_list, dtype=jnp.int32)
    tok = jax.random.randint(k_tok, (B, T), 1, gpt_pad_id + 1)
    pos = jnp.arange(T)[None, :]
    tokens = jnp.where(pos < lengths[:, None], tok, 0)         # right-padded with 0s

    t_max = max(lengths_list)                                  # pad_packed_sequence max len
    out = fudge_forward(params, tokens, lengths)[:, :t_max]
    out = jax.block_until_ready(out)

    ref = fudge_reference(params, tokens, lengths)[:, :t_max]
    assert out.shape == (B, t_max)
    if not bool(jnp.allclose(out, ref, atol=2e-3, rtol=2e-3)):
        raise AssertionError(f"mismatch: max abs diff = {float(jnp.max(jnp.abs(out - ref)))}")

    print("KERNEL_OK")
</pallas_src>

<mosaic_0001>
module attributes {stable_mosaic.version = 11 : i64} {
  func.func @fudge_lstm_kernel(%arg0: i32, %arg1: memref<8x8x32xf32, #tpu.memory_space<vmem>>, %arg2: memref<8x1xi32, #tpu.memory_space<vmem>>, %arg3: memref<3x32x128xf32, #tpu.memory_space<vmem>>, %arg4: memref<3x32x128xf32, #tpu.memory_space<vmem>>, %arg5: memref<3x1x128xf32, #tpu.memory_space<vmem>>, %arg6: memref<1x32xf32, #tpu.memory_space<vmem>>, %arg7: memref<1x1xf32, #tpu.memory_space<vmem>>, %arg8: memref<8x8xf32, #tpu.memory_space<vmem>>, %arg9: memref<64x128xf32, #tpu.memory_space<vmem>>) attributes {dimension_semantics = [#tpu.dimension_semantics<parallel>], iteration_bounds = array<i64: 1>, scalar_prefetch = 0 : i64, scratch_operands = 1 : i64, tpu.core_type = #tpu.core_type<tc>, window_params = [{transform_indices = @transform_0, window_bounds = array<i64: 8, 8, 32>}, {transform_indices = @transform_1, window_bounds = array<i64: 8, 1>}, {pipeline_mode = #tpu.pipeline_mode<synchronous>, transform_indices = @transform_2, window_bounds = array<i64: 3, 32, 128>}, {pipeline_mode = #tpu.pipeline_mode<synchronous>, transform_indices = @transform_3, window_bounds = array<i64: 3, 32, 128>}, {pipeline_mode = #tpu.pipeline_mode<synchronous>, transform_indices = @transform_4, window_bounds = array<i64: 3, 1, 128>}, {pipeline_mode = #tpu.pipeline_mode<synchronous>, transform_indices = @transform_5, window_bounds = array<i64: 1, 32>}, {pipeline_mode = #tpu.pipeline_mode<synchronous>, transform_indices = @transform_6, window_bounds = array<i64: 1, 1>}, {transform_indices = @transform_7, window_bounds = array<i64: 8, 8>}]} {
    %c0 = arith.constant 0 : index
    %c0_0 = arith.constant 0 : index
    %0 = vector.load %arg2[%c0, %c0_0] : memref<8x1xi32, #tpu.memory_space<vmem>>, vector<8x1xi32>
    %c0_1 = arith.constant 0 : index
    %c0_2 = arith.constant 0 : index
    %1 = vector.load %arg6[%c0_1, %c0_2] : memref<1x32xf32, #tpu.memory_space<vmem>>, vector<1x32xf32>
    %2 = vector.shape_cast %1 : vector<1x32xf32> to vector<1x32xf32>
    %3 = vector.broadcast %2 : vector<1x32xf32> to vector<8x32xf32>
    %c0_3 = arith.constant 0 : index
    %c0_4 = arith.constant 0 : index
    %4 = vector.load %arg7[%c0_3, %c0_4] : memref<1x1xf32, #tpu.memory_space<vmem>>, vector<1x1xf32>
    %c0_5 = arith.constant 0 : index
    %c0_6 = arith.constant 0 : index
    %c0_7 = arith.constant 0 : index
    %5 = vector.load %arg1[%c0_5, %c0_6, %c0_7] : memref<8x8x32xf32, #tpu.memory_space<vmem>>, vector<8x8x32xf32>
    %6 = vector.shape_cast %5 : vector<8x8x32xf32> to vector<64x32xf32>
    %c0_8 = arith.constant 0 : index
    %c0_9 = arith.constant 0 : index
    %c0_10 = arith.constant 0 : index
    %7 = vector.load %arg3[%c0_8, %c0_9, %c0_10] : memref<3x32x128xf32, #tpu.memory_space<vmem>>, vector<1x32x128xf32>
    %8 = vector.shape_cast %7 : vector<1x32x128xf32> to vector<32x128xf32>
    %cst = arith.constant dense<0.000000e+00> : vector<64x128xf32>
    %9 = tpu.matmul %6, %8, %cst {dimension_numbers = #tpu.dot_dimension_numbers<[1], [0], [0], [1], [0, 0, 1, 1], [], []>} : vector<64x32xf32>, vector<32x128xf32>, vector<64x128xf32> -> vector<64x128xf32>
    %c0_11 = arith.constant 0 : index
    %c0_12 = arith.constant 0 : index
    %c0_13 = arith.constant 0 : index
    %10 = vector.load %arg5[%c0_11, %c0_12, %c0_13] : memref<3x1x128xf32, #tpu.memory_space<vmem>>, vector<1x1x128xf32>
    %11 = vector.shape_cast %10 : vector<1x1x128xf32> to vector<1x128xf32>
    %12 = vector.broadcast %11 : vector<1x128xf32> to vector<64x128xf32>
    %13 = arith.addf %9, %12 : vector<64x128xf32>
    %c0_14 = arith.constant 0 : index
    %c0_15 = arith.constant 0 : index
    %14 = vector.load %arg9[%c0_14, %c0_15] : memref<64x128xf32, #tpu.memory_space<vmem>>, vector<64x128xf32>
    tpu.vector_store %arg9[%c0_14, %c0_15], %13 {strides = array<i32>} : memref<64x128xf32, #tpu.memory_space<vmem>>, vector<64x128xf32>,
    %c0_16 = arith.constant 0 : index
    %c0_17 = arith.constant 0 : index
    %c0_18 = arith.constant 0 : index
    %15 = vector.load %arg4[%c0_16, %c0_17, %c0_18] : memref<3x32x128xf32, #tpu.memory_space<vmem>>, vector<1x32x128xf32>
    %16 = vector.shape_cast %15 : vector<1x32x128xf32> to vector<32x128xf32>
    %c1 = arith.constant 1 : index
    %c0_19 = arith.constant 0 : index
    %c0_20 = arith.constant 0 : index
    %17 = vector.load %arg4[%c1, %c0_19, %c0_20] : memref<3x32x128xf32, #tpu.memory_space<vmem>>, vector<1x32x128xf32>
    %18 = vector.shape_cast %17 : vector<1x32x128xf32> to vector<32x128xf32>
    %c2 = arith.constant 2 : index
    %c0_21 = arith.constant 0 : index
    %c0_22 = arith.constant 0 : index
    %19 = vector.load %arg4[%c2, %c0_21, %c0_22] : memref<3x32x128xf32, #tpu.memory_space<vmem>>, vector<1x32x128xf32>
    %20 = vector.shape_cast %19 : vector<1x32x128xf32> to vector<32x128xf32>
    %c1_23 = arith.constant 1 : index
    %c0_24 = arith.constant 0 : index
    %c0_25 = arith.constant 0 : index
    %21 = vector.load %arg3[%c1_23, %c0_24, %c0_25] : memref<3x32x128xf32, #tpu.memory_space<vmem>>, vector<1x32x128xf32>
    %22 = vector.shape_cast %21 : vector<1x32x128xf32> to vector<32x128xf32>
    %c2_26 = arith.constant 2 : index
    %c0_27 = arith.constant 0 : index
    %c0_28 = arith.constant 0 : index
    %23 = vector.load %arg3[%c2_26, %c0_27, %c0_28] : memref<3x32x128xf32, #tpu.memory_space<vmem>>, vector<1x32x128xf32>
    %24 = vector.shape_cast %23 : vector<1x32x128xf32> to vector<32x128xf32>
    %c1_29 = arith.constant 1 : index
    %c0_30 = arith.constant 0 : index
    %c0_31 = arith.constant 0 : index
    %25 = vector.load %arg5[%c1_29, %c0_30, %c0_31] : memref<3x1x128xf32, #tpu.memory_space<vmem>>, vector<1x1x128xf32>
    %26 = vector.shape_cast %25 : vector<1x1x128xf32> to vector<1x128xf32>
    %c2_32 = arith.constant 2 : index
    %c0_33 = arith.constant 0 : index
    %c0_34 = arith.constant 0 : index
    %27 = vector.load %arg5[%c2_32, %c0_33, %c0_34] : memref<3x1x128xf32, #tpu.memory_space<vmem>>, vector<1x1x128xf32>
    %28 = vector.shape_cast %27 : vector<1x1x128xf32> to vector<1x128xf32>
    %cst_35 = arith.constant 0.000000e+00 : f32
    %29 = vector.broadcast %cst_35 : f32 to vector<8x32xf32>
    %cst_36 = arith.constant 0.000000e+00 : f32
    %30 = vector.broadcast %cst_36 : f32 to vector<8x32xf32>
    %cst_37 = arith.constant 0.000000e+00 : f32
    %31 = vector.broadcast %cst_37 : f32 to vector<8x32xf32>
    %cst_38 = arith.constant 0.000000e+00 : f32
    %32 = vector.broadcast %cst_38 : f32 to vector<8x32xf32>
    %cst_39 = arith.constant 0.000000e+00 : f32
    %33 = vector.broadcast %cst_39 : f32 to vector<8x32xf32>
    %cst_40 = arith.constant 0.000000e+00 : f32
    %34 = vector.broadcast %cst_40 : f32 to vector<8x32xf32>
    %c0_i32 = arith.constant 0 : i32
    %35 = vector.broadcast %c0_i32 : i32 to vector<8x1xi32>
    %36 = arith.cmpi sgt, %0, %35 : vector<8x1xi32>
    %37 = vector.shape_cast %36 : vector<8x1xi1> to vector<8x1xi1>
    %38 = vector.broadcast %37 : vector<8x1xi1> to vector<8x32xi1>
    %c0_41 = arith.constant 0 : index
    %c0_42 = arith.constant 0 : index
    %39 = vector.load %arg9[%c0_41, %c0_42] : memref<64x128xf32, #tpu.memory_space<vmem>>, vector<8x128xf32>
    %cst_43 = arith.constant dense<0.000000e+00> : vector<8x128xf32>
    %40 = tpu.matmul %29, %16, %cst_43 {dimension_numbers = #tpu.dot_dimension_numbers<[1], [0], [0], [1], [0, 0, 1, 1], [], []>} : vector<8x32xf32>, vector<32x128xf32>, vector<8x128xf32> -> vector<8x128xf32>
    %41 = arith.addf %39, %40 : vector<8x128xf32>
    %42 = arith.negf %41 : vector<8x128xf32>
    %43 = math.exp %42 : vector<8x128xf32>
    %cst_44 = arith.constant 1.000000e+00 : f32
    %44 = vector.broadcast %cst_44 : f32 to vector<8x128xf32>
    %45 = arith.addf %44, %43 : vector<8x128xf32>
    %46 = arith.divf %44, %45 : vector<8x128xf32>
    %47 = math.tanh %41 : vector<8x128xf32>
    %48 = vector.extract_strided_slice %46 {offsets = [0, 0], sizes = [8, 32], strides = [1, 1]} : vector<8x128xf32> to vector<8x32xf32>
    %49 = vector.extract_strided_slice %46 {offsets = [0, 32], sizes = [8, 32], strides = [1, 1]} : vector<8x128xf32> to vector<8x32xf32>
    %50 = vector.extract_strided_slice %47 {offsets = [0, 64], sizes = [8, 32], strides = [1, 1]} : vector<8x128xf32> to vector<8x32xf32>
    %51 = vector.extract_strided_slice %46 {offsets = [0, 96], sizes = [8, 32], strides = [1, 1]} : vector<8x128xf32> to vector<8x32xf32>
    %52 = arith.mulf %49, %32 : vector<8x32xf32>
    %53 = arith.mulf %48, %50 : vector<8x32xf32>
    %54 = arith.addf %52, %53 : vector<8x32xf32>
    %55 = math.tanh %54 : vector<8x32xf32>
    %56 = arith.mulf %51, %55 : vector<8x32xf32>
    %57 = arith.select %38, %56, %29 : vector<8x32xi1>, vector<8x32xf32>
    %58 = arith.select %38, %54, %32 : vector<8x32xi1>, vector<8x32xf32>
    %cst_45 = arith.constant dense<0.000000e+00> : vector<8x128xf32>
    %59 = tpu.matmul %57, %22, %cst_45 {dimension_numbers = #tpu.dot_dimension_numbers<[1], [0], [0], [1], [0, 0, 1, 1], [], []>} : vector<8x32xf32>, vector<32x128xf32>, vector<8x128xf32> -> vector<8x128xf32>
    %cst_46 = arith.constant dense<0.000000e+00> : vector<8x128xf32>
    %60 = tpu.matmul %30, %18, %cst_46 {dimension_numbers = #tpu.dot_dimension_numbers<[1], [0], [0], [1], [0, 0, 1, 1], [], []>} : vector<8x32xf32>, vector<32x128xf32>, vector<8x128xf32> -> vector<8x128xf32>
    %61 = arith.addf %59, %60 : vector<8x128xf32>
    %62 = vector.broadcast %26 : vector<1x128xf32> to vector<8x128xf32>
    %63 = arith.addf %61, %62 : vector<8x128xf32>
    %64 = arith.negf %63 : vector<8x128xf32>
    %65 = math.exp %64 : vector<8x128xf32>
    %cst_47 = arith.constant 1.000000e+00 : f32
    %66 = vector.broadcast %cst_47 : f32 to vector<8x128xf32>
    %67 = arith.addf %66, %65 : vector<8x128xf32>
    %68 = arith.divf %66, %67 : vector<8x128xf32>
    %69 = math.tanh %63 : vector<8x128xf32>
    %70 = vector.extract_strided_slice %68 {offsets = [0, 0], sizes = [8, 32], strides = [1, 1]} : vector<8x128xf32> to vector<8x32xf32>
    %71 = vector.extract_strided_slice %68 {offsets = [0, 32], sizes = [8, 32], strides = [1, 1]} : vector<8x128xf32> to vector<8x32xf32>
    %72 = vector.extract_strided_slice %69 {offsets = [0, 64], sizes = [8, 32], strides = [1, 1]} : vector<8x128xf32> to vector<8x32xf32>
    %73 = vector.extract_strided_slice %68 {offsets = [0, 96], sizes = [8, 32], strides = [1, 1]} : vector<8x128xf32> to vector<8x32xf32>
    %74 = arith.mulf %71, %33 : vector<8x32xf32>
    %75 = arith.mulf %70, %72 : vector<8x32xf32>
    %76 = arith.addf %74, %75 : vector<8x32xf32>
    %77 = math.tanh %76 : vector<8x32xf32>
    %78 = arith.mulf %73, %77 : vector<8x32xf32>
    %79 = arith.select %38, %78, %30 : vector<8x32xi1>, vector<8x32xf32>
    %80 = arith.select %38, %76, %33 : vector<8x32xi1>, vector<8x32xf32>
    %cst_48 = arith.constant dense<0.000000e+00> : vector<8x128xf32>
    %81 = tpu.matmul %79, %24, %cst_48 {dimension_numbers = #tpu.dot_dimension_numbers<[1], [0], [0], [1], [0, 0, 1, 1], [], []>} : vector<8x32xf32>, vector<32x128xf32>, vector<8x128xf32> -> vector<8x128xf32>
    %cst_49 = arith.constant dense<0.000000e+00> : vector<8x128xf32>
    %82 = tpu.matmul %31, %20, %cst_49 {dimension_numbers = #tpu.dot_dimension_numbers<[1], [0], [0], [1], [0, 0, 1, 1], [], []>} : vector<8x32xf32>, vector<32x128xf32>, vector<8x128xf32> -> vector<8x128xf32>
    %83 = arith.addf %81, %82 : vector<8x128xf32>
    %84 = vector.broadcast %28 : vector<1x128xf32> to vector<8x128xf32>
    %85 = arith.addf %83, %84 : vector<8x128xf32>
    %86 = arith.negf %85 : vector<8x128xf32>
    %87 = math.exp %86 : vector<8x128xf32>
    %cst_50 = arith.constant 1.000000e+00 : f32
    %88 = vector.broadcast %cst_50 : f32 to vector<8x128xf32>
    %89 = arith.addf %88, %87 : vector<8x128xf32>
    %90 = arith.divf %88, %89 : vector<8x128xf32>
    %91 = math.tanh %85 : vector<8x128xf32>
    %92 = vector.extract_strided_slice %90 {offsets = [0, 0], sizes = [8, 32], strides = [1, 1]} : vector<8x128xf32> to vector<8x32xf32>
    %93 = vector.extract_strided_slice %90 {offsets = [0, 32], sizes = [8, 32], strides = [1, 1]} : vector<8x128xf32> to vector<8x32xf32>
    %94 = vector.extract_strided_slice %91 {offsets = [0, 64], sizes = [8, 32], strides = [1, 1]} : vector<8x128xf32> to vector<8x32xf32>
    %95 = vector.extract_strided_slice %90 {offsets = [0, 96], sizes = [8, 32], strides = [1, 1]} : vector<8x128xf32> to vector<8x32xf32>
    %96 = arith.mulf %93, %34 : vector<8x32xf32>
    %97 = arith.mulf %92, %94 : vector<8x32xf32>
    %98 = arith.addf %96, %97 : vector<8x32xf32>
    %99 = math.tanh %98 : vector<8x32xf32>
    %100 = arith.mulf %95, %99 : vector<8x32xf32>
    %101 = arith.select %38, %100, %31 : vector<8x32xi1>, vector<8x32xf32>
    %102 = arith.select %38, %98, %34 : vector<8x32xi1>, vector<8x32xf32>
    %103 = arith.mulf %101, %3 : vector<8x32xf32>
    %cst_51 = arith.constant dense<0.000000e+00> : vector<8xf32>
    %104 = vector.multi_reduction <add>, %103, %cst_51 [1] : vector<8x32xf32> to vector<8xf32>
    %105 = vector.shape_cast %104 : vector<8xf32> to vector<8x1xf32>
    %cst_52 = arith.constant 0.000000e+00 : f32
    %106 = vector.broadcast %cst_52 : f32 to vector<8x1xf32>
    %107 = arith.select %36, %105, %106 : vector<8x1xi1>, vector<8x1xf32>
    %108 = vector.broadcast %4 : vector<1x1xf32> to vector<8x1xf32>
    %109 = arith.addf %107, %108 : vector<8x1xf32>
    %c0_53 = arith.constant 0 : index
    %c0_54 = arith.constant 0 : index
    %110 = vector.load %arg8[%c0_53, %c0_54] : memref<8x8xf32, #tpu.memory_space<vmem>>, vector<8x1xf32>
    tpu.vector_store %arg8[%c0_53, %c0_54], %109 {strides = array<i32>} : memref<8x8xf32, #tpu.memory_space<vmem>>, vector<8x1xf32>,
    %c1_i32 = arith.constant 1 : i32
    %111 = vector.broadcast %c1_i32 : i32 to vector<8x1xi32>
    %112 = arith.cmpi sgt, %0, %111 : vector<8x1xi32>
    %113 = vector.shape_cast %112 : vector<8x1xi1> to vector<8x1xi1>
    %114 = vector.broadcast %113 : vector<8x1xi1> to vector<8x32xi1>
    %c8 = arith.constant 8 : index
    %c0_55 = arith.constant 0 : index
    %115 = vector.load %arg9[%c8, %c0_55] : memref<64x128xf32, #tpu.memory_space<vmem>>, vector<8x128xf32>
    %cst_56 = arith.constant dense<0.000000e+00> : vector<8x128xf32>
    %116 = tpu.matmul %57, %16, %cst_56 {dimension_numbers = #tpu.dot_dimension_numbers<[1], [0], [0], [1], [0, 0, 1, 1], [], []>} : vector<8x32xf32>, vector<32x128xf32>, vector<8x128xf32> -> vector<8x128xf32>
    %117 = arith.addf %115, %116 : vector<8x128xf32>
    %118 = arith.negf %117 : vector<8x128xf32>
    %119 = math.exp %118 : vector<8x128xf32>
    %cst_57 = arith.constant 1.000000e+00 : f32
    %120 = vector.broadcast %cst_57 : f32 to vector<8x128xf32>
    %121 = arith.addf %120, %119 : vector<8x128xf32>
    %122 = arith.divf %120, %121 : vector<8x128xf32>
    %123 = math.tanh %117 : vector<8x128xf32>
    %124 = vector.extract_strided_slice %122 {offsets = [0, 0], sizes = [8, 32], strides = [1, 1]} : vector<8x128xf32> to vector<8x32xf32>
    %125 = vector.extract_strided_slice %122 {offsets = [0, 32], sizes = [8, 32], strides = [1, 1]} : vector<8x128xf32> to vector<8x32xf32>
    %126 = vector.extract_strided_slice %123 {offsets = [0, 64], sizes = [8, 32], strides = [1, 1]} : vector<8x128xf32> to vector<8x32xf32>
    %127 = vector.extract_strided_slice %122 {offsets = [0, 96], sizes = [8, 32], strides = [1, 1]} : vector<8x128xf32> to vector<8x32xf32>
    %128 = arith.mulf %125, %58 : vector<8x32xf32>
    %129 = arith.mulf %124, %126 : vector<8x32xf32>
    %130 = arith.addf %128, %129 : vector<8x32xf32>
    %131 = math.tanh %130 : vector<8x32xf32>
    %132 = arith.mulf %127, %131 : vector<8x32xf32>
    %133 = arith.select %114, %132, %57 : vector<8x32xi1>, vector<8x32xf32>
    %134 = arith.select %114, %130, %58 : vector<8x32xi1>, vector<8x32xf32>
    %cst_58 = arith.constant dense<0.000000e+00> : vector<8x128xf32>
    %135 = tpu.matmul %133, %22, %cst_58 {dimension_numbers = #tpu.dot_dimension_numbers<[1], [0], [0], [1], [0, 0, 1, 1], [], []>} : vector<8x32xf32>, vector<32x128xf32>, vector<8x128xf32> -> vector<8x128xf32>
    %cst_59 = arith.constant dense<0.000000e+00> : vector<8x128xf32>
    %136 = tpu.matmul %79, %18, %cst_59 {dimension_numbers = #tpu.dot_dimension_numbers<[1], [0], [0], [1], [0, 0, 1, 1], [], []>} : vector<8x32xf32>, vector<32x128xf32>, vector<8x128xf32> -> vector<8x128xf32>
    %137 = arith.addf %135, %136 : vector<8x128xf32>
    %138 = vector.broadcast %26 : vector<1x128xf32> to vector<8x128xf32>
    %139 = arith.addf %137, %138 : vector<8x128xf32>
    %140 = arith.negf %139 : vector<8x128xf32>
    %141 = math.exp %140 : vector<8x128xf32>
    %cst_60 = arith.constant 1.000000e+00 : f32
    %142 = vector.broadcast %cst_60 : f32 to vector<8x128xf32>
    %143 = arith.addf %142, %141 : vector<8x128xf32>
    %144 = arith.divf %142, %143 : vector<8x128xf32>
    %145 = math.tanh %139 : vector<8x128xf32>
    %146 = vector.extract_strided_slice %144 {offsets = [0, 0], sizes = [8, 32], strides = [1, 1]} : vector<8x128xf32> to vector<8x32xf32>
    %147 = vector.extract_strided_slice %144 {offsets = [0, 32], sizes = [8, 32], strides = [1, 1]} : vector<8x128xf32> to vector<8x32xf32>
    %148 = vector.extract_strided_slice %145 {offsets = [0, 64], sizes = [8, 32], strides = [1, 1]} : vector<8x128xf32> to vector<8x32xf32>
    %149 = vector.extract_strided_slice %144 {offsets = [0, 96], sizes = [8, 32], strides = [1, 1]} : vector<8x128xf32> to vector<8x32xf32>
    %150 = arith.mulf %147, %80 : vector<8x32xf32>
    %151 = arith.mulf %146, %148 : vector<8x32xf32>
    %152 = arith.addf %150, %151 : vector<8x32xf32>
    %153 = math.tanh %152 : vector<8x32xf32>
    %154 = arith.mulf %149, %153 : vector<8x32xf32>
    %155 = arith.select %114, %154, %79 : vector<8x32xi1>, vector<8x32xf32>
    %156 = arith.select %114, %152, %80 : vector<8x32xi1>, vector<8x32xf32>
    %cst_61 = arith.constant dense<0.000000e+00> : vector<8x128xf32>
    %157 = tpu.matmul %155, %24, %cst_61 {dimension_numbers = #tpu.dot_dimension_numbers<[1], [0], [0], [1], [0, 0, 1, 1], [], []>} : vector<8x32xf32>, vector<32x128xf32>, vector<8x128xf32> -> vector<8x128xf32>
    %cst_62 = arith.constant dense<0.000000e+00> : vector<8x128xf32>
    %158 = tpu.matmul %101, %20, %cst_62 {dimension_numbers = #tpu.dot_dimension_numbers<[1], [0], [0], [1], [0, 0, 1, 1], [], []>} : vector<8x32xf32>, vector<32x128xf32>, vector<8x128xf32> -> vector<8x128xf32>
    %159 = arith.addf %157, %158 : vector<8x128xf32>
    %160 = vector.broadcast %28 : vector<1x128xf32> to vector<8x128xf32>
    %161 = arith.addf %159, %160 : vector<8x128xf32>
    %162 = arith.negf %161 : vector<8x128xf32>
    %163 = math.exp %162 : vector<8x128xf32>
    %cst_63 = arith.constant 1.000000e+00 : f32
    %164 = vector.broadcast %cst_63 : f32 to vector<8x128xf32>
    %165 = arith.addf %164, %163 : vector<8x128xf32>
    %166 = arith.divf %164, %165 : vector<8x128xf32>
    %167 = math.tanh %161 : vector<8x128xf32>
    %168 = vector.extract_strided_slice %166 {offsets = [0, 0], sizes = [8, 32], strides = [1, 1]} : vector<8x128xf32> to vector<8x32xf32>
    %169 = vector.extract_strided_slice %166 {offsets = [0, 32], sizes = [8, 32], strides = [1, 1]} : vector<8x128xf32> to vector<8x32xf32>
    %170 = vector.extract_strided_slice %167 {offsets = [0, 64], sizes = [8, 32], strides = [1, 1]} : vector<8x128xf32> to vector<8x32xf32>
    %171 = vector.extract_strided_slice %166 {offsets = [0, 96], sizes = [8, 32], strides = [1, 1]} : vector<8x128xf32> to vector<8x32xf32>
    %172 = arith.mulf %169, %102 : vector<8x32xf32>
    %173 = arith.mulf %168, %170 : vector<8x32xf32>
    %174 = arith.addf %172, %173 : vector<8x32xf32>
    %175 = math.tanh %174 : vector<8x32xf32>
    %176 = arith.mulf %171, %175 : vector<8x32xf32>
    %177 = arith.select %114, %176, %101 : vector<8x32xi1>, vector<8x32xf32>
    %178 = arith.select %114, %174, %102 : vector<8x32xi1>, vector<8x32xf32>
    %179 = arith.mulf %177, %3 : vector<8x32xf32>
    %cst_64 = arith.constant dense<0.000000e+00> : vector<8xf32>
    %180 = vector.multi_reduction <add>, %179, %cst_64 [1] : vector<8x32xf32> to vector<8xf32>
    %181 = vector.shape_cast %180 : vector<8xf32> to vector<8x1xf32>
    %cst_65 = arith.constant 0.000000e+00 : f32
    %182 = vector.broadcast %cst_65 : f32 to vector<8x1xf32>
    %183 = arith.select %112, %181, %182 : vector<8x1xi1>, vector<8x1xf32>
    %184 = vector.broadcast %4 : vector<1x1xf32> to vector<8x1xf32>
    %185 = arith.addf %183, %184 : vector<8x1xf32>
    %c0_66 = arith.constant 0 : index
    %c1_67 = arith.constant 1 : index
    %186 = vector.load %arg8[%c0_66, %c1_67] : memref<8x8xf32, #tpu.memory_space<vmem>>, vector<8x1xf32>
    tpu.vector_store %arg8[%c0_66, %c1_67], %185 {strides = array<i32>} : memref<8x8xf32, #tpu.memory_space<vmem>>, vector<8x1xf32>,
    %c2_i32 = arith.constant 2 : i32
    %187 = vector.broadcast %c2_i32 : i32 to vector<8x1xi32>
    %188 = arith.cmpi sgt, %0, %187 : vector<8x1xi32>
    %189 = vector.shape_cast %188 : vector<8x1xi1> to vector<8x1xi1>
    %190 = vector.broadcast %189 : vector<8x1xi1> to vector<8x32xi1>
    %c16 = arith.constant 16 : index
    %c0_68 = arith.constant 0 : index
    %191 = vector.load %arg9[%c16, %c0_68] : memref<64x128xf32, #tpu.memory_space<vmem>>, vector<8x128xf32>
    %cst_69 = arith.constant dense<0.000000e+00> : vector<8x128xf32>
    %192 = tpu.matmul %133, %16, %cst_69 {dimension_numbers = #tpu.dot_dimension_numbers<[1], [0], [0], [1], [0, 0, 1, 1], [], []>} : vector<8x32xf32>, vector<32x128xf32>, vector<8x128xf32> -> vector<8x128xf32>
    %193 = arith.addf %191, %192 : vector<8x128xf32>
    %194 = arith.negf %193 : vector<8x128xf32>
    %195 = math.exp %194 : vector<8x128xf32>
    %cst_70 = arith.constant 1.000000e+00 : f32
    %196 = vector.broadcast %cst_70 : f32 to vector<8x128xf32>
    %197 = arith.addf %196, %195 : vector<8x128xf32>
    %198 = arith.divf %196, %197 : vector<8x128xf32>
    %199 = math.tanh %193 : vector<8x128xf32>
    %200 = vector.extract_strided_slice %198 {offsets = [0, 0], sizes = [8, 32], strides = [1, 1]} : vector<8x128xf32> to vector<8x32xf32>
    %201 = vector.extract_strided_slice %198 {offsets = [0, 32], sizes = [8, 32], strides = [1, 1]} : vector<8x128xf32> to vector<8x32xf32>
    %202 = vector.extract_strided_slice %199 {offsets = [0, 64], sizes = [8, 32], strides = [1, 1]} : vector<8x128xf32> to vector<8x32xf32>
    %203 = vector.extract_strided_slice %198 {offsets = [0, 96], sizes = [8, 32], strides = [1, 1]} : vector<8x128xf32> to vector<8x32xf32>
    %204 = arith.mulf %201, %134 : vector<8x32xf32>
    %205 = arith.mulf %200, %202 : vector<8x32xf32>
    %206 = arith.addf %204, %205 : vector<8x32xf32>
    %207 = math.tanh %206 : vector<8x32xf32>
    %208 = arith.mulf %203, %207 : vector<8x32xf32>
    %209 = arith.select %190, %208, %133 : vector<8x32xi1>, vector<8x32xf32>
    %210 = arith.select %190, %206, %134 : vector<8x32xi1>, vector<8x32xf32>
    %cst_71 = arith.constant dense<0.000000e+00> : vector<8x128xf32>
    %211 = tpu.matmul %209, %22, %cst_71 {dimension_numbers = #tpu.dot_dimension_numbers<[1], [0], [0], [1], [0, 0, 1, 1], [], []>} : vector<8x32xf32>, vector<32x128xf32>, vector<8x128xf32> -> vector<8x128xf32>
    %cst_72 = arith.constant dense<0.000000e+00> : vector<8x128xf32>
    %212 = tpu.matmul %155, %18, %cst_72 {dimension_numbers = #tpu.dot_dimension_numbers<[1], [0], [0], [1], [0, 0, 1, 1], [], []>} : vector<8x32xf32>, vector<32x128xf32>, vector<8x128xf32> -> vector<8x128xf32>
    %213 = arith.addf %211, %212 : vector<8x128xf32>
    %214 = vector.broadcast %26 : vector<1x128xf32> to vector<8x128xf32>
    %215 = arith.addf %213, %214 : vector<8x128xf32>
    %216 = arith.negf %215 : vector<8x128xf32>
    %217 = math.exp %216 : vector<8x128xf32>
    %cst_73 = arith.constant 1.000000e+00 : f32
    %218 = vector.broadcast %cst_73 : f32 to vector<8x128xf32>
    %219 = arith.addf %218, %217 : vector<8x128xf32>
    %220 = arith.divf %218, %219 : vector<8x128xf32>
    %221 = math.tanh %215 : vector<8x128xf32>
    %222 = vector.extract_strided_slice %220 {offsets = [0, 0], sizes = [8, 32], strides = [1, 1]} : vector<8x128xf32> to vector<8x32xf32>
    %223 = vector.extract_strided_slice %220 {offsets = [0, 32], sizes = [8, 32], strides = [1, 1]} : vector<8x128xf32> to vector<8x32xf32>
    %224 = vector.extract_strided_slice %221 {offsets = [0, 64], sizes = [8, 32], strides = [1, 1]} : vector<8x128xf32> to vector<8x32xf32>
    %225 = vector.extract_strided_slice %220 {offsets = [0, 96], sizes = [8, 32], strides = [1, 1]} : vector<8x128xf32> to vector<8x32xf32>
    %226 = arith.mulf %223, %156 : vector<8x32xf32>
    %227 = arith.mulf %222, %224 : vector<8x32xf32>
    %228 = arith.addf %226, %227 : vector<8x32xf32>
    %229 = math.tanh %228 : vector<8x32xf32>
    %230 = arith.mulf %225, %229 : vector<8x32xf32>
    %231 = arith.select %190, %230, %155 : vector<8x32xi1>, vector<8x32xf32>
    %232 = arith.select %190, %228, %156 : vector<8x32xi1>, vector<8x32xf32>
    %cst_74 = arith.constant dense<0.000000e+00> : vector<8x128xf32>
    %233 = tpu.matmul %231, %24, %cst_74 {dimension_numbers = #tpu.dot_dimension_numbers<[1], [0], [0], [1], [0, 0, 1, 1], [], []>} : vector<8x32xf32>, vector<32x128xf32>, vector<8x128xf32> -> vector<8x128xf32>
    %cst_75 = arith.constant dense<0.000000e+00> : vector<8x128xf32>
    %234 = tpu.matmul %177, %20, %cst_75 {dimension_numbers = #tpu.dot_dimension_numbers<[1], [0], [0], [1], [0, 0, 1, 1], [], []>} : vector<8x32xf32>, vector<32x128xf32>, vector<8x128xf32> -> vector<8x128xf32>
    %235 = arith.addf %233, %234 : vector<8x128xf32>
    %236 = vector.broadcast %28 : vector<1x128xf32> to vector<8x128xf32>
    %237 = arith.addf %235, %236 : vector<8x128xf32>
    %238 = arith.negf %237 : vector<8x128xf32>
    %239 = math.exp %238 : vector<8x128xf32>
    %cst_76 = arith.constant 1.000000e+00 : f32
    %240 = vector.broadcast %cst_76 : f32 to vector<8x128xf32>
    %241 = arith.addf %240, %239 : vector<8x128xf32>
    %242 = arith.divf %240, %241 : vector<8x128xf32>
    %243 = math.tanh %237 : vector<8x128xf32>
    %244 = vector.extract_strided_slice %242 {offsets = [0, 0], sizes = [8, 32], strides = [1, 1]} : vector<8x128xf32> to vector<8x32xf32>
    %245 = vector.extract_strided_slice %242 {offsets = [0, 32], sizes = [8, 32], strides = [1, 1]} : vector<8x128xf32> to vector<8x32xf32>
    %246 = vector.extract_strided_slice %243 {offsets = [0, 64], sizes = [8, 32], strides = [1, 1]} : vector<8x128xf32> to vector<8x32xf32>
    %247 = vector.extract_strided_slice %242 {offsets = [0, 96], sizes = [8, 32], strides = [1, 1]} : vector<8x128xf32> to vector<8x32xf32>
    %248 = arith.mulf %245, %178 : vector<8x32xf32>
    %249 = arith.mulf %244, %246 : vector<8x32xf32>
    %250 = arith.addf %248, %249 : vector<8x32xf32>
    %251 = math.tanh %250 : vector<8x32xf32>
    %252 = arith.mulf %247, %251 : vector<8x32xf32>
    %253 = arith.select %190, %252, %177 : vector<8x32xi1>, vector<8x32xf32>
    %254 = arith.select %190, %250, %178 : vector<8x32xi1>, vector<8x32xf32>
    %255 = arith.mulf %253, %3 : vector<8x32xf32>
    %cst_77 = arith.constant dense<0.000000e+00> : vector<8xf32>
    %256 = vector.multi_reduction <add>, %255, %cst_77 [1] : vector<8x32xf32> to vector<8xf32>
    %257 = vector.shape_cast %256 : vector<8xf32> to vector<8x1xf32>
    %cst_78 = arith.constant 0.000000e+00 : f32
    %258 = vector.broadcast %cst_78 : f32 to vector<8x1xf32>
    %259 = arith.select %188, %257, %258 : vector<8x1xi1>, vector<8x1xf32>
    %260 = vector.broadcast %4 : vector<1x1xf32> to vector<8x1xf32>
    %261 = arith.addf %259, %260 : vector<8x1xf32>
    %c0_79 = arith.constant 0 : index
    %c2_80 = arith.constant 2 : index
    %262 = vector.load %arg8[%c0_79, %c2_80] : memref<8x8xf32, #tpu.memory_space<vmem>>, vector<8x1xf32>
    tpu.vector_store %arg8[%c0_79, %c2_80], %261 {strides = array<i32>} : memref<8x8xf32, #tpu.memory_space<vmem>>, vector<8x1xf32>,
    %c3_i32 = arith.constant 3 : i32
    %263 = vector.broadcast %c3_i32 : i32 to vector<8x1xi32>
    %264 = arith.cmpi sgt, %0, %263 : vector<8x1xi32>
    %265 = vector.shape_cast %264 : vector<8x1xi1> to vector<8x1xi1>
    %266 = vector.broadcast %265 : vector<8x1xi1> to vector<8x32xi1>
    %c24 = arith.constant 24 : index
    %c0_81 = arith.constant 0 : index
    %267 = vector.load %arg9[%c24, %c0_81] : memref<64x128xf32, #tpu.memory_space<vmem>>, vector<8x128xf32>
    %cst_82 = arith.constant dense<0.000000e+00> : vector<8x128xf32>
    %268 = tpu.matmul %209, %16, %cst_82 {dimension_numbers = #tpu.dot_dimension_numbers<[1], [0], [0], [1], [0, 0, 1, 1], [], []>} : vector<8x32xf32>, vector<32x128xf32>, vector<8x128xf32> -> vector<8x128xf32>
    %269 = arith.addf %267, %268 : vector<8x128xf32>
    %270 = arith.negf %269 : vector<8x128xf32>
    %271 = math.exp %270 : vector<8x128xf32>
    %cst_83 = arith.constant 1.000000e+00 : f32
    %272 = vector.broadcast %cst_83 : f32 to vector<8x128xf32>
    %273 = arith.addf %272, %271 : vector<8x128xf32>
    %274 = arith.divf %272, %273 : vector<8x128xf32>
    %275 = math.tanh %269 : vector<8x128xf32>
    %276 = vector.extract_strided_slice %274 {offsets = [0, 0], sizes = [8, 32], strides = [1, 1]} : vector<8x128xf32> to vector<8x32xf32>
    %277 = vector.extract_strided_slice %274 {offsets = [0, 32], sizes = [8, 32], strides = [1, 1]} : vector<8x128xf32> to vector<8x32xf32>
    %278 = vector.extract_strided_slice %275 {offsets = [0, 64], sizes = [8, 32], strides = [1, 1]} : vector<8x128xf32> to vector<8x32xf32>
    %279 = vector.extract_strided_slice %274 {offsets = [0, 96], sizes = [8, 32], strides = [1, 1]} : vector<8x128xf32> to vector<8x32xf32>
    %280 = arith.mulf %277, %210 : vector<8x32xf32>
    %281 = arith.mulf %276, %278 : vector<8x32xf32>
    %282 = arith.addf %280, %281 : vector<8x32xf32>
    %283 = math.tanh %282 : vector<8x32xf32>
    %284 = arith.mulf %279, %283 : vector<8x32xf32>
    %285 = arith.select %266, %284, %209 : vector<8x32xi1>, vector<8x32xf32>
    %286 = arith.select %266, %282, %210 : vector<8x32xi1>, vector<8x32xf32>
    %cst_84 = arith.constant dense<0.000000e+00> : vector<8x128xf32>
    %287 = tpu.matmul %285, %22, %cst_84 {dimension_numbers = #tpu.dot_dimension_numbers<[1], [0], [0], [1], [0, 0, 1, 1], [], []>} : vector<8x32xf32>, vector<32x128xf32>, vector<8x128xf32> -> vector<8x128xf32>
    %cst_85 = arith.constant dense<0.000000e+00> : vector<8x128xf32>
    %288 = tpu.matmul %231, %18, %cst_85 {dimension_numbers = #tpu.dot_dimension_numbers<[1], [0], [0], [1], [0, 0, 1, 1], [], []>} : vector<8x32xf32>, vector<32x128xf32>, vector<8x128xf32> -> vector<8x128xf32>
    %289 = arith.addf %287, %288 : vector<8x128xf32>
    %290 = vector.broadcast %26 : vector<1x128xf32> to vector<8x128xf32>
    %291 = arith.addf %289, %290 : vector<8x128xf32>
    %292 = arith.negf %291 : vector<8x128xf32>
    %293 = math.exp %292 : vector<8x128xf32>
    %cst_86 = arith.constant 1.000000e+00 : f32
    %294 = vector.broadcast %cst_86 : f32 to vector<8x128xf32>
    %295 = arith.addf %294, %293 : vector<8x128xf32>
    %296 = arith.divf %294, %295 : vector<8x128xf32>
    %297 = math.tanh %291 : vector<8x128xf32>
    %298 = vector.extract_strided_slice %296 {offsets = [0, 0], sizes = [8, 32], strides = [1, 1]} : vector<8x128xf32> to vector<8x32xf32>
    %299 = vector.extract_strided_slice %296 {offsets = [0, 32], sizes = [8, 32], strides = [1, 1]} : vector<8x128xf32> to vector<8x32xf32>
    %300 = vector.extract_strided_slice %297 {offsets = [0, 64], sizes = [8, 32], strides = [1, 1]} : vector<8x128xf32> to vector<8x32xf32>
    %301 = vector.extract_strided_slice %296 {offsets = [0, 96], sizes = [8, 32], strides = [1, 1]} : vector<8x128xf32> to vector<8x32xf32>
    %302 = arith.mulf %299, %232 : vector<8x32xf32>
    %303 = arith.mulf %298, %300 : vector<8x32xf32>
    %304 = arith.addf %302, %303 : vector<8x32xf32>
    %305 = math.tanh %304 : vector<8x32xf32>
    %306 = arith.mulf %301, %305 : vector<8x32xf32>
    %307 = arith.select %266, %306, %231 : vector<8x32xi1>, vector<8x32xf32>
    %308 = arith.select %266, %304, %232 : vector<8x32xi1>, vector<8x32xf32>
    %cst_87 = arith.constant dense<0.000000e+00> : vector<8x128xf32>
    %309 = tpu.matmul %307, %24, %cst_87 {dimension_numbers = #tpu.dot_dimension_numbers<[1], [0], [0], [1], [0, 0, 1, 1], [], []>} : vector<8x32xf32>, vector<32x128xf32>, vector<8x128xf32> -> vector<8x128xf32>
    %cst_88 = arith.constant dense<0.000000e+00> : vector<8x128xf32>
    %310 = tpu.matmul %253, %20, %cst_88 {dimension_numbers = #tpu.dot_dimension_numbers<[1], [0], [0], [1], [0, 0, 1, 1], [], []>} : vector<8x32xf32>, vector<32x128xf32>, vector<8x128xf32> -> vector<8x128xf32>
    %311 = arith.addf %309, %310 : vector<8x128xf32>
    %312 = vector.broadcast %28 : vector<1x128xf32> to vector<8x128xf32>
    %313 = arith.addf %311, %312 : vector<8x128xf32>
    %314 = arith.negf %313 : vector<8x128xf32>
    %315 = math.exp %314 : vector<8x128xf32>
    %cst_89 = arith.constant 1.000000e+00 : f32
    %316 = vector.broadcast %cst_89 : f32 to vector<8x128xf32>
    %317 = arith.addf %316, %315 : vector<8x128xf32>
    %318 = arith.divf %316, %317 : vector<8x128xf32>
    %319 = math.tanh %313 : vector<8x128xf32>
    %320 = vector.extract_strided_slice %318 {offsets = [0, 0], sizes = [8, 32], strides = [1, 1]} : vector<8x128xf32> to vector<8x32xf32>
    %321 = vector.extract_strided_slice %318 {offsets = [0, 32], sizes = [8, 32], strides = [1, 1]} : vector<8x128xf32> to vector<8x32xf32>
    %322 = vector.extract_strided_slice %319 {offsets = [0, 64], sizes = [8, 32], strides = [1, 1]} : vector<8x128xf32> to vector<8x32xf32>
    %323 = vector.extract_strided_slice %318 {offsets = [0, 96], sizes = [8, 32], strides = [1, 1]} : vector<8x128xf32> to vector<8x32xf32>
    %324 = arith.mulf %321, %254 : vector<8x32xf32>
    %325 = arith.mulf %320, %322 : vector<8x32xf32>
    %326 = arith.addf %324, %325 : vector<8x32xf32>
    %327 = math.tanh %326 : vector<8x32xf32>
    %328 = arith.mulf %323, %327 : vector<8x32xf32>
    %329 = arith.select %266, %328, %253 : vector<8x32xi1>, vector<8x32xf32>
    %330 = arith.select %266, %326, %254 : vector<8x32xi1>, vector<8x32xf32>
    %331 = arith.mulf %329, %3 : vector<8x32xf32>
    %cst_90 = arith.constant dense<0.000000e+00> : vector<8xf32>
    %332 = vector.multi_reduction <add>, %331, %cst_90 [1] : vector<8x32xf32> to vector<8xf32>
    %333 = vector.shape_cast %332 : vector<8xf32> to vector<8x1xf32>
    %cst_91 = arith.constant 0.000000e+00 : f32
    %334 = vector.broadcast %cst_91 : f32 to vector<8x1xf32>
    %335 = arith.select %264, %333, %334 : vector<8x1xi1>, vector<8x1xf32>
    %336 = vector.broadcast %4 : vector<1x1xf32> to vector<8x1xf32>
    %337 = arith.addf %335, %336 : vector<8x1xf32>
    %c0_92 = arith.constant 0 : index
    %c3 = arith.constant 3 : index
    %338 = vector.load %arg8[%c0_92, %c3] : memref<8x8xf32, #tpu.memory_space<vmem>>, vector<8x1xf32>
    tpu.vector_store %arg8[%c0_92, %c3], %337 {strides = array<i32>} : memref<8x8xf32, #tpu.memory_space<vmem>>, vector<8x1xf32>,
    %c4_i32 = arith.constant 4 : i32
    %339 = vector.broadcast %c4_i32 : i32 to vector<8x1xi32>
    %340 = arith.cmpi sgt, %0, %339 : vector<8x1xi32>
    %341 = vector.shape_cast %340 : vector<8x1xi1> to vector<8x1xi1>
    %342 = vector.broadcast %341 : vector<8x1xi1> to vector<8x32xi1>
    %c32 = arith.constant 32 : index
    %c0_93 = arith.constant 0 : index
    %343 = vector.load %arg9[%c32, %c0_93] : memref<64x128xf32, #tpu.memory_space<vmem>>, vector<8x128xf32>
    %cst_94 = arith.constant dense<0.000000e+00> : vector<8x128xf32>
    %344 = tpu.matmul %285, %16, %cst_94 {dimension_numbers = #tpu.dot_dimension_numbers<[1], [0], [0], [1], [0, 0, 1, 1], [], []>} : vector<8x32xf32>, vector<32x128xf32>, vector<8x128xf32> -> vector<8x128xf32>
    %345 = arith.addf %343, %344 : vector<8x128xf32>
    %346 = arith.negf %345 : vector<8x128xf32>
    %347 = math.exp %346 : vector<8x128xf32>
    %cst_95 = arith.constant 1.000000e+00 : f32
    %348 = vector.broadcast %cst_95 : f32 to vector<8x128xf32>
    %349 = arith.addf %348, %347 : vector<8x128xf32>
    %350 = arith.divf %348, %349 : vector<8x128xf32>
    %351 = math.tanh %345 : vector<8x128xf32>
    %352 = vector.extract_strided_slice %350 {offsets = [0, 0], sizes = [8, 32], strides = [1, 1]} : vector<8x128xf32> to vector<8x32xf32>
    %353 = vector.extract_strided_slice %350 {offsets = [0, 32], sizes = [8, 32], strides = [1, 1]} : vector<8x128xf32> to vector<8x32xf32>
    %354 = vector.extract_strided_slice %351 {offsets = [0, 64], sizes = [8, 32], strides = [1, 1]} : vector<8x128xf32> to vector<8x32xf32>
    %355 = vector.extract_strided_slice %350 {offsets = [0, 96], sizes = [8, 32], strides = [1, 1]} : vector<8x128xf32> to vector<8x32xf32>
    %356 = arith.mulf %353, %286 : vector<8x32xf32>
    %357 = arith.mulf %352, %354 : vector<8x32xf32>
    %358 = arith.addf %356, %357 : vector<8x32xf32>
    %359 = math.tanh %358 : vector<8x32xf32>
    %360 = arith.mulf %355, %359 : vector<8x32xf32>
    %361 = arith.select %342, %360, %285 : vector<8x32xi1>, vector<8x32xf32>
    %362 = arith.select %342, %358, %286 : vector<8x32xi1>, vector<8x32xf32>
    %cst_96 = arith.constant dense<0.000000e+00> : vector<8x128xf32>
    %363 = tpu.matmul %361, %22, %cst_96 {dimension_numbers = #tpu.dot_dimension_numbers<[1], [0], [0], [1], [0, 0, 1, 1], [], []>} : vector<8x32xf32>, vector<32x128xf32>, vector<8x128xf32> -> vector<8x128xf32>
    %cst_97 = arith.constant dense<0.000000e+00> : vector<8x128xf32>
    %364 = tpu.matmul %307, %18, %cst_97 {dimension_numbers = #tpu.dot_dimension_numbers<[1], [0], [0], [1], [0, 0, 1, 1], [], []>} : vector<8x32xf32>, vector<32x128xf32>, vector<8x128xf32> -> vector<8x128xf32>
    %365 = arith.addf %363, %364 : vector<8x128xf32>
    %366 = vector.broadcast %26 : vector<1x128xf32> to vector<8x128xf32>
    %367 = arith.addf %365, %366 : vector<8x128xf32>
    %368 = arith.negf %367 : vector<8x128xf32>
    %369 = math.exp %368 : vector<8x128xf32>
    %cst_98 = arith.constant 1.000000e+00 : f32
    %370 = vector.broadcast %cst_98 : f32 to vector<8x128xf32>
    %371 = arith.addf %370, %369 : vector<8x128xf32>
    %372 = arith.divf %370, %371 : vector<8x128xf32>
    %373 = math.tanh %367 : vector<8x128xf32>
    %374 = vector.extract_strided_slice %372 {offsets = [0, 0], sizes = [8, 32], strides = [1, 1]} : vector<8x128xf32> to vector<8x32xf32>
    %375 = vector.extract_strided_slice %372 {offsets = [0, 32], sizes = [8, 32], strides = [1, 1]} : vector<8x128xf32> to vector<8x32xf32>
    %376 = vector.extract_strided_slice %373 {offsets = [0, 64], sizes = [8, 32], strides = [1, 1]} : vector<8x128xf32> to vector<8x32xf32>
    %377 = vector.extract_strided_slice %372 {offsets = [0, 96], sizes = [8, 32], strides = [1, 1]} : vector<8x128xf32> to vector<8x32xf32>
    %378 = arith.mulf %375, %308 : vector<8x32xf32>
    %379 = arith.mulf %374, %376 : vector<8x32xf32>
    %380 = arith.addf %378, %379 : vector<8x32xf32>
    %381 = math.tanh %380 : vector<8x32xf32>
    %382 = arith.mulf %377, %381 : vector<8x32xf32>
    %383 = arith.select %342, %382, %307 : vector<8x32xi1>, vector<8x32xf32>
    %384 = arith.select %342, %380, %308 : vector<8x32xi1>, vector<8x32xf32>
    %cst_99 = arith.constant dense<0.000000e+00> : vector<8x128xf32>
    %385 = tpu.matmul %383, %24, %cst_99 {dimension_numbers = #tpu.dot_dimension_numbers<[1], [0], [0], [1], [0, 0, 1, 1], [], []>} : vector<8x32xf32>, vector<32x128xf32>, vector<8x128xf32> -> vector<8x128xf32>
    %cst_100 = arith.constant dense<0.000000e+00> : vector<8x128xf32>
    %386 = tpu.matmul %329, %20, %cst_100 {dimension_numbers = #tpu.dot_dimension_numbers<[1], [0], [0], [1], [0, 0, 1, 1], [], []>} : vector<8x32xf32>, vector<32x128xf32>, vector<8x128xf32> -> vector<8x128xf32>
    %387 = arith.addf %385, %386 : vector<8x128xf32>
    %388 = vector.broadcast %28 : vector<1x128xf32> to vector<8x128xf32>
    %389 = arith.addf %387, %388 : vector<8x128xf32>
    %390 = arith.negf %389 : vector<8x128xf32>
    %391 = math.exp %390 : vector<8x128xf32>
    %cst_101 = arith.constant 1.000000e+00 : f32
    %392 = vector.broadcast %cst_101 : f32 to vector<8x128xf32>
    %393 = arith.addf %392, %391 : vector<8x128xf32>
    %394 = arith.divf %392, %393 : vector<8x128xf32>
    %395 = math.tanh %389 : vector<8x128xf32>
    %396 = vector.extract_strided_slice %394 {offsets = [0, 0], sizes = [8, 32], strides = [1, 1]} : vector<8x128xf32> to vector<8x32xf32>
    %397 = vector.extract_strided_slice %394 {offsets = [0, 32], sizes = [8, 32], strides = [1, 1]} : vector<8x128xf32> to vector<8x32xf32>
    %398 = vector.extract_strided_slice %395 {offsets = [0, 64], sizes = [8, 32], strides = [1, 1]} : vector<8x128xf32> to vector<8x32xf32>
    %399 = vector.extract_strided_slice %394 {offsets = [0, 96], sizes = [8, 32], strides = [1, 1]} : vector<8x128xf32> to vector<8x32xf32>
    %400 = arith.mulf %397, %330 : vector<8x32xf32>
    %401 = arith.mulf %396, %398 : vector<8x32xf32>
    %402 = arith.addf %400, %401 : vector<8x32xf32>
    %403 = math.tanh %402 : vector<8x32xf32>
    %404 = arith.mulf %399, %403 : vector<8x32xf32>
    %405 = arith.select %342, %404, %329 : vector<8x32xi1>, vector<8x32xf32>
    %406 = arith.select %342, %402, %330 : vector<8x32xi1>, vector<8x32xf32>
    %407 = arith.mulf %405, %3 : vector<8x32xf32>
    %cst_102 = arith.constant dense<0.000000e+00> : vector<8xf32>
    %408 = vector.multi_reduction <add>, %407, %cst_102 [1] : vector<8x32xf32> to vector<8xf32>
    %409 = vector.shape_cast %408 : vector<8xf32> to vector<8x1xf32>
    %cst_103 = arith.constant 0.000000e+00 : f32
    %410 = vector.broadcast %cst_103 : f32 to vector<8x1xf32>
    %411 = arith.select %340, %409, %410 : vector<8x1xi1>, vector<8x1xf32>
    %412 = vector.broadcast %4 : vector<1x1xf32> to vector<8x1xf32>
    %413 = arith.addf %411, %412 : vector<8x1xf32>
    %c0_104 = arith.constant 0 : index
    %c4 = arith.constant 4 : index
    %414 = vector.load %arg8[%c0_104, %c4] : memref<8x8xf32, #tpu.memory_space<vmem>>, vector<8x1xf32>
    tpu.vector_store %arg8[%c0_104, %c4], %413 {strides = array<i32>} : memref<8x8xf32, #tpu.memory_space<vmem>>, vector<8x1xf32>,
    %c5_i32 = arith.constant 5 : i32
    %415 = vector.broadcast %c5_i32 : i32 to vector<8x1xi32>
    %416 = arith.cmpi sgt, %0, %415 : vector<8x1xi32>
    %417 = vector.shape_cast %416 : vector<8x1xi1> to vector<8x1xi1>
    %418 = vector.broadcast %417 : vector<8x1xi1> to vector<8x32xi1>
    %c40 = arith.constant 40 : index
    %c0_105 = arith.constant 0 : index
    %419 = vector.load %arg9[%c40, %c0_105] : memref<64x128xf32, #tpu.memory_space<vmem>>, vector<8x128xf32>
    %cst_106 = arith.constant dense<0.000000e+00> : vector<8x128xf32>
    %420 = tpu.matmul %361, %16, %cst_106 {dimension_numbers = #tpu.dot_dimension_numbers<[1], [0], [0], [1], [0, 0, 1, 1], [], []>} : vector<8x32xf32>, vector<32x128xf32>, vector<8x128xf32> -> vector<8x128xf32>
    %421 = arith.addf %419, %420 : vector<8x128xf32>
    %422 = arith.negf %421 : vector<8x128xf32>
    %423 = math.exp %422 : vector<8x128xf32>
    %cst_107 = arith.constant 1.000000e+00 : f32
    %424 = vector.broadcast %cst_107 : f32 to vector<8x128xf32>
    %425 = arith.addf %424, %423 : vector<8x128xf32>
    %426 = arith.divf %424, %425 : vector<8x128xf32>
    %427 = math.tanh %421 : vector<8x128xf32>
    %428 = vector.extract_strided_slice %426 {offsets = [0, 0], sizes = [8, 32], strides = [1, 1]} : vector<8x128xf32> to vector<8x32xf32>
    %429 = vector.extract_strided_slice %426 {offsets = [0, 32], sizes = [8, 32], strides = [1, 1]} : vector<8x128xf32> to vector<8x32xf32>
    %430 = vector.extract_strided_slice %427 {offsets = [0, 64], sizes = [8, 32], strides = [1, 1]} : vector<8x128xf32> to vector<8x32xf32>
    %431 = vector.extract_strided_slice %426 {offsets = [0, 96], sizes = [8, 32], strides = [1, 1]} : vector<8x128xf32> to vector<8x32xf32>
    %432 = arith.mulf %429, %362 : vector<8x32xf32>
    %433 = arith.mulf %428, %430 : vector<8x32xf32>
    %434 = arith.addf %432, %433 : vector<8x32xf32>
    %435 = math.tanh %434 : vector<8x32xf32>
    %436 = arith.mulf %431, %435 : vector<8x32xf32>
    %437 = arith.select %418, %436, %361 : vector<8x32xi1>, vector<8x32xf32>
    %438 = arith.select %418, %434, %362 : vector<8x32xi1>, vector<8x32xf32>
    %cst_108 = arith.constant dense<0.000000e+00> : vector<8x128xf32>
    %439 = tpu.matmul %437, %22, %cst_108 {dimension_numbers = #tpu.dot_dimension_numbers<[1], [0], [0], [1], [0, 0, 1, 1], [], []>} : vector<8x32xf32>, vector<32x128xf32>, vector<8x128xf32> -> vector<8x128xf32>
    %cst_109 = arith.constant dense<0.000000e+00> : vector<8x128xf32>
    %440 = tpu.matmul %383, %18, %cst_109 {dimension_numbers = #tpu.dot_dimension_numbers<[1], [0], [0], [1], [0, 0, 1, 1], [], []>} : vector<8x32xf32>, vector<32x128xf32>, vector<8x128xf32> -> vector<8x128xf32>
    %441 = arith.addf %439, %440 : vector<8x128xf32>
    %442 = vector.broadcast %26 : vector<1x128xf32> to vector<8x128xf32>
    %443 = arith.addf %441, %442 : vector<8x128xf32>
    %444 = arith.negf %443 : vector<8x128xf32>
    %445 = math.exp %444 : vector<8x128xf32>
    %cst_110 = arith.constant 1.000000e+00 : f32
    %446 = vector.broadcast %cst_110 : f32 to vector<8x128xf32>
    %447 = arith.addf %446, %445 : vector<8x128xf32>
    %448 = arith.divf %446, %447 : vector<8x128xf32>
    %449 = math.tanh %443 : vector<8x128xf32>
    %450 = vector.extract_strided_slice %448 {offsets = [0, 0], sizes = [8, 32], strides = [1, 1]} : vector<8x128xf32> to vector<8x32xf32>
    %451 = vector.extract_strided_slice %448 {offsets = [0, 32], sizes = [8, 32], strides = [1, 1]} : vector<8x128xf32> to vector<8x32xf32>
    %452 = vector.extract_strided_slice %449 {offsets = [0, 64], sizes = [8, 32], strides = [1, 1]} : vector<8x128xf32> to vector<8x32xf32>
    %453 = vector.extract_strided_slice %448 {offsets = [0, 96], sizes = [8, 32], strides = [1, 1]} : vector<8x128xf32> to vector<8x32xf32>
    %454 = arith.mulf %451, %384 : vector<8x32xf32>
    %455 = arith.mulf %450, %452 : vector<8x32xf32>
    %456 = arith.addf %454, %455 : vector<8x32xf32>
    %457 = math.tanh %456 : vector<8x32xf32>
    %458 = arith.mulf %453, %457 : vector<8x32xf32>
    %459 = arith.select %418, %458, %383 : vector<8x32xi1>, vector<8x32xf32>
    %460 = arith.select %418, %456, %384 : vector<8x32xi1>, vector<8x32xf32>
    %cst_111 = arith.constant dense<0.000000e+00> : vector<8x128xf32>
    %461 = tpu.matmul %459, %24, %cst_111 {dimension_numbers = #tpu.dot_dimension_numbers<[1], [0], [0], [1], [0, 0, 1, 1], [], []>} : vector<8x32xf32>, vector<32x128xf32>, vector<8x128xf32> -> vector<8x128xf32>
    %cst_112 = arith.constant dense<0.000000e+00> : vector<8x128xf32>
    %462 = tpu.matmul %405, %20, %cst_112 {dimension_numbers = #tpu.dot_dimension_numbers<[1], [0], [0], [1], [0, 0, 1, 1], [], []>} : vector<8x32xf32>, vector<32x128xf32>, vector<8x128xf32> -> vector<8x128xf32>
    %463 = arith.addf %461, %462 : vector<8x128xf32>
    %464 = vector.broadcast %28 : vector<1x128xf32> to vector<8x128xf32>
    %465 = arith.addf %463, %464 : vector<8x128xf32>
    %466 = arith.negf %465 : vector<8x128xf32>
    %467 = math.exp %466 : vector<8x128xf32>
    %cst_113 = arith.constant 1.000000e+00 : f32
    %468 = vector.broadcast %cst_113 : f32 to vector<8x128xf32>
    %469 = arith.addf %468, %467 : vector<8x128xf32>
    %470 = arith.divf %468, %469 : vector<8x128xf32>
    %471 = math.tanh %465 : vector<8x128xf32>
    %472 = vector.extract_strided_slice %470 {offsets = [0, 0], sizes = [8, 32], strides = [1, 1]} : vector<8x128xf32> to vector<8x32xf32>
    %473 = vector.extract_strided_slice %470 {offsets = [0, 32], sizes = [8, 32], strides = [1, 1]} : vector<8x128xf32> to vector<8x32xf32>
    %474 = vector.extract_strided_slice %471 {offsets = [0, 64], sizes = [8, 32], strides = [1, 1]} : vector<8x128xf32> to vector<8x32xf32>
    %475 = vector.extract_strided_slice %470 {offsets = [0, 96], sizes = [8, 32], strides = [1, 1]} : vector<8x128xf32> to vector<8x32xf32>
    %476 = arith.mulf %473, %406 : vector<8x32xf32>
    %477 = arith.mulf %472, %474 : vector<8x32xf32>
    %478 = arith.addf %476, %477 : vector<8x32xf32>
    %479 = math.tanh %478 : vector<8x32xf32>
    %480 = arith.mulf %475, %479 : vector<8x32xf32>
    %481 = arith.select %418, %480, %405 : vector<8x32xi1>, vector<8x32xf32>
    %482 = arith.select %418, %478, %406 : vector<8x32xi1>, vector<8x32xf32>
    %483 = arith.mulf %481, %3 : vector<8x32xf32>
    %cst_114 = arith.constant dense<0.000000e+00> : vector<8xf32>
    %484 = vector.multi_reduction <add>, %483, %cst_114 [1] : vector<8x32xf32> to vector<8xf32>
    %485 = vector.shape_cast %484 : vector<8xf32> to vector<8x1xf32>
    %cst_115 = arith.constant 0.000000e+00 : f32
    %486 = vector.broadcast %cst_115 : f32 to vector<8x1xf32>
    %487 = arith.select %416, %485, %486 : vector<8x1xi1>, vector<8x1xf32>
    %488 = vector.broadcast %4 : vector<1x1xf32> to vector<8x1xf32>
    %489 = arith.addf %487, %488 : vector<8x1xf32>
    %c0_116 = arith.constant 0 : index
    %c5 = arith.constant 5 : index
    %490 = vector.load %arg8[%c0_116, %c5] : memref<8x8xf32, #tpu.memory_space<vmem>>, vector<8x1xf32>
    tpu.vector_store %arg8[%c0_116, %c5], %489 {strides = array<i32>} : memref<8x8xf32, #tpu.memory_space<vmem>>, vector<8x1xf32>,
    %c6_i32 = arith.constant 6 : i32
    %491 = vector.broadcast %c6_i32 : i32 to vector<8x1xi32>
    %492 = arith.cmpi sgt, %0, %491 : vector<8x1xi32>
    %493 = vector.shape_cast %492 : vector<8x1xi1> to vector<8x1xi1>
    %494 = vector.broadcast %493 : vector<8x1xi1> to vector<8x32xi1>
    %c48 = arith.constant 48 : index
    %c0_117 = arith.constant 0 : index
    %495 = vector.load %arg9[%c48, %c0_117] : memref<64x128xf32, #tpu.memory_space<vmem>>, vector<8x128xf32>
    %cst_118 = arith.constant dense<0.000000e+00> : vector<8x128xf32>
    %496 = tpu.matmul %437, %16, %cst_118 {dimension_numbers = #tpu.dot_dimension_numbers<[1], [0], [0], [1], [0, 0, 1, 1], [], []>} : vector<8x32xf32>, vector<32x128xf32>, vector<8x128xf32> -> vector<8x128xf32>
    %497 = arith.addf %495, %496 : vector<8x128xf32>
    %498 = arith.negf %497 : vector<8x128xf32>
    %499 = math.exp %498 : vector<8x128xf32>
    %cst_119 = arith.constant 1.000000e+00 : f32
    %500 = vector.broadcast %cst_119 : f32 to vector<8x128xf32>
    %501 = arith.addf %500, %499 : vector<8x128xf32>
    %502 = arith.divf %500, %501 : vector<8x128xf32>
    %503 = math.tanh %497 : vector<8x128xf32>
    %504 = vector.extract_strided_slice %502 {offsets = [0, 0], sizes = [8, 32], strides = [1, 1]} : vector<8x128xf32> to vector<8x32xf32>
    %505 = vector.extract_strided_slice %502 {offsets = [0, 32], sizes = [8, 32], strides = [1, 1]} : vector<8x128xf32> to vector<8x32xf32>
    %506 = vector.extract_strided_slice %503 {offsets = [0, 64], sizes = [8, 32], strides = [1, 1]} : vector<8x128xf32> to vector<8x32xf32>
    %507 = vector.extract_strided_slice %502 {offsets = [0, 96], sizes = [8, 32], strides = [1, 1]} : vector<8x128xf32> to vector<8x32xf32>
    %508 = arith.mulf %505, %438 : vector<8x32xf32>
    %509 = arith.mulf %504, %506 : vector<8x32xf32>
    %510 = arith.addf %508, %509 : vector<8x32xf32>
    %511 = math.tanh %510 : vector<8x32xf32>
    %512 = arith.mulf %507, %511 : vector<8x32xf32>
    %513 = arith.select %494, %512, %437 : vector<8x32xi1>, vector<8x32xf32>
    %514 = arith.select %494, %510, %438 : vector<8x32xi1>, vector<8x32xf32>
    %cst_120 = arith.constant dense<0.000000e+00> : vector<8x128xf32>
    %515 = tpu.matmul %513, %22, %cst_120 {dimension_numbers = #tpu.dot_dimension_numbers<[1], [0], [0], [1], [0, 0, 1, 1], [], []>} : vector<8x32xf32>, vector<32x128xf32>, vector<8x128xf32> -> vector<8x128xf32>
    %cst_121 = arith.constant dense<0.000000e+00> : vector<8x128xf32>
    %516 = tpu.matmul %459, %18, %cst_121 {dimension_numbers = #tpu.dot_dimension_numbers<[1], [0], [0], [1], [0, 0, 1, 1], [], []>} : vector<8x32xf32>, vector<32x128xf32>, vector<8x128xf32> -> vector<8x128xf32>
    %517 = arith.addf %515, %516 : vector<8x128xf32>
    %518 = vector.broadcast %26 : vector<1x128xf32> to vector<8x128xf32>
    %519 = arith.addf %517, %518 : vector<8x128xf32>
    %520 = arith.negf %519 : vector<8x128xf32>
    %521 = math.exp %520 : vector<8x128xf32>
    %cst_122 = arith.constant 1.000000e+00 : f32
    %522 = vector.broadcast %cst_122 : f32 to vector<8x128xf32>
    %523 = arith.addf %522, %521 : vector<8x128xf32>
    %524 = arith.divf %522, %523 : vector<8x128xf32>
    %525 = math.tanh %519 : vector<8x128xf32>
    %526 = vector.extract_strided_slice %524 {offsets = [0, 0], sizes = [8, 32], strides = [1, 1]} : vector<8x128xf32> to vector<8x32xf32>
    %527 = vector.extract_strided_slice %524 {offsets = [0, 32], sizes = [8, 32], strides = [1, 1]} : vector<8x128xf32> to vector<8x32xf32>
    %528 = vector.extract_strided_slice %525 {offsets = [0, 64], sizes = [8, 32], strides = [1, 1]} : vector<8x128xf32> to vector<8x32xf32>
    %529 = vector.extract_strided_slice %524 {offsets = [0, 96], sizes = [8, 32], strides = [1, 1]} : vector<8x128xf32> to vector<8x32xf32>
    %530 = arith.mulf %527, %460 : vector<8x32xf32>
    %531 = arith.mulf %526, %528 : vector<8x32xf32>
    %532 = arith.addf %530, %531 : vector<8x32xf32>
    %533 = math.tanh %532 : vector<8x32xf32>
    %534 = arith.mulf %529, %533 : vector<8x32xf32>
    %535 = arith.select %494, %534, %459 : vector<8x32xi1>, vector<8x32xf32>
    %536 = arith.select %494, %532, %460 : vector<8x32xi1>, vector<8x32xf32>
    %cst_123 = arith.constant dense<0.000000e+00> : vector<8x128xf32>
    %537 = tpu.matmul %535, %24, %cst_123 {dimension_numbers = #tpu.dot_dimension_numbers<[1], [0], [0], [1], [0, 0, 1, 1], [], []>} : vector<8x32xf32>, vector<32x128xf32>, vector<8x128xf32> -> vector<8x128xf32>
    %cst_124 = arith.constant dense<0.000000e+00> : vector<8x128xf32>
    %538 = tpu.matmul %481, %20, %cst_124 {dimension_numbers = #tpu.dot_dimension_numbers<[1], [0], [0], [1], [0, 0, 1, 1], [], []>} : vector<8x32xf32>, vector<32x128xf32>, vector<8x128xf32> -> vector<8x128xf32>
    %539 = arith.addf %537, %538 : vector<8x128xf32>
    %540 = vector.broadcast %28 : vector<1x128xf32> to vector<8x128xf32>
    %541 = arith.addf %539, %540 : vector<8x128xf32>
    %542 = arith.negf %541 : vector<8x128xf32>
    %543 = math.exp %542 : vector<8x128xf32>
    %cst_125 = arith.constant 1.000000e+00 : f32
    %544 = vector.broadcast %cst_125 : f32 to vector<8x128xf32>
    %545 = arith.addf %544, %543 : vector<8x128xf32>
    %546 = arith.divf %544, %545 : vector<8x128xf32>
    %547 = math.tanh %541 : vector<8x128xf32>
    %548 = vector.extract_strided_slice %546 {offsets = [0, 0], sizes = [8, 32], strides = [1, 1]} : vector<8x128xf32> to vector<8x32xf32>
    %549 = vector.extract_strided_slice %546 {offsets = [0, 32], sizes = [8, 32], strides = [1, 1]} : vector<8x128xf32> to vector<8x32xf32>
    %550 = vector.extract_strided_slice %547 {offsets = [0, 64], sizes = [8, 32], strides = [1, 1]} : vector<8x128xf32> to vector<8x32xf32>
    %551 = vector.extract_strided_slice %546 {offsets = [0, 96], sizes = [8, 32], strides = [1, 1]} : vector<8x128xf32> to vector<8x32xf32>
    %552 = arith.mulf %549, %482 : vector<8x32xf32>
    %553 = arith.mulf %548, %550 : vector<8x32xf32>
    %554 = arith.addf %552, %553 : vector<8x32xf32>
    %555 = math.tanh %554 : vector<8x32xf32>
    %556 = arith.mulf %551, %555 : vector<8x32xf32>
    %557 = arith.select %494, %556, %481 : vector<8x32xi1>, vector<8x32xf32>
    %558 = arith.select %494, %554, %482 : vector<8x32xi1>, vector<8x32xf32>
    %559 = arith.mulf %557, %3 : vector<8x32xf32>
    %cst_126 = arith.constant dense<0.000000e+00> : vector<8xf32>
    %560 = vector.multi_reduction <add>, %559, %cst_126 [1] : vector<8x32xf32> to vector<8xf32>
    %561 = vector.shape_cast %560 : vector<8xf32> to vector<8x1xf32>
    %cst_127 = arith.constant 0.000000e+00 : f32
    %562 = vector.broadcast %cst_127 : f32 to vector<8x1xf32>
    %563 = arith.select %492, %561, %562 : vector<8x1xi1>, vector<8x1xf32>
    %564 = vector.broadcast %4 : vector<1x1xf32> to vector<8x1xf32>
    %565 = arith.addf %563, %564 : vector<8x1xf32>
    %c0_128 = arith.constant 0 : index
    %c6 = arith.constant 6 : index
    %566 = vector.load %arg8[%c0_128, %c6] : memref<8x8xf32, #tpu.memory_space<vmem>>, vector<8x1xf32>
    tpu.vector_store %arg8[%c0_128, %c6], %565 {strides = array<i32>} : memref<8x8xf32, #tpu.memory_space<vmem>>, vector<8x1xf32>,
    %c7_i32 = arith.constant 7 : i32
    %567 = vector.broadcast %c7_i32 : i32 to vector<8x1xi32>
    %568 = arith.cmpi sgt, %0, %567 : vector<8x1xi32>
    %569 = vector.shape_cast %568 : vector<8x1xi1> to vector<8x1xi1>
    %570 = vector.broadcast %569 : vector<8x1xi1> to vector<8x32xi1>
    %c56 = arith.constant 56 : index
    %c0_129 = arith.constant 0 : index
    %571 = vector.load %arg9[%c56, %c0_129] : memref<64x128xf32, #tpu.memory_space<vmem>>, vector<8x128xf32>
    %cst_130 = arith.constant dense<0.000000e+00> : vector<8x128xf32>
    %572 = tpu.matmul %513, %16, %cst_130 {dimension_numbers = #tpu.dot_dimension_numbers<[1], [0], [0], [1], [0, 0, 1, 1], [], []>} : vector<8x32xf32>, vector<32x128xf32>, vector<8x128xf32> -> vector<8x128xf32>
    %573 = arith.addf %571, %572 : vector<8x128xf32>
    %574 = arith.negf %573 : vector<8x128xf32>
    %575 = math.exp %574 : vector<8x128xf32>
    %cst_131 = arith.constant 1.000000e+00 : f32
    %576 = vector.broadcast %cst_131 : f32 to vector<8x128xf32>
    %577 = arith.addf %576, %575 : vector<8x128xf32>
    %578 = arith.divf %576, %577 : vector<8x128xf32>
    %579 = math.tanh %573 : vector<8x128xf32>
    %580 = vector.extract_strided_slice %578 {offsets = [0, 0], sizes = [8, 32], strides = [1, 1]} : vector<8x128xf32> to vector<8x32xf32>
    %581 = vector.extract_strided_slice %578 {offsets = [0, 32], sizes = [8, 32], strides = [1, 1]} : vector<8x128xf32> to vector<8x32xf32>
    %582 = vector.extract_strided_slice %579 {offsets = [0, 64], sizes = [8, 32], strides = [1, 1]} : vector<8x128xf32> to vector<8x32xf32>
    %583 = vector.extract_strided_slice %578 {offsets = [0, 96], sizes = [8, 32], strides = [1, 1]} : vector<8x128xf32> to vector<8x32xf32>
    %584 = arith.mulf %581, %514 : vector<8x32xf32>
    %585 = arith.mulf %580, %582 : vector<8x32xf32>
    %586 = arith.addf %584, %585 : vector<8x32xf32>
    %587 = math.tanh %586 : vector<8x32xf32>
    %588 = arith.mulf %583, %587 : vector<8x32xf32>
    %589 = arith.select %570, %588, %513 : vector<8x32xi1>, vector<8x32xf32>
    %cst_132 = arith.constant dense<0.000000e+00> : vector<8x128xf32>
    %590 = tpu.matmul %589, %22, %cst_132 {dimension_numbers = #tpu.dot_dimension_numbers<[1], [0], [0], [1], [0, 0, 1, 1], [], []>} : vector<8x32xf32>, vector<32x128xf32>, vector<8x128xf32> -> vector<8x128xf32>
    %cst_133 = arith.constant dense<0.000000e+00> : vector<8x128xf32>
    %591 = tpu.matmul %535, %18, %cst_133 {dimension_numbers = #tpu.dot_dimension_numbers<[1], [0], [0], [1], [0, 0, 1, 1], [], []>} : vector<8x32xf32>, vector<32x128xf32>, vector<8x128xf32> -> vector<8x128xf32>
    %592 = arith.addf %590, %591 : vector<8x128xf32>
    %593 = vector.broadcast %26 : vector<1x128xf32> to vector<8x128xf32>
    %594 = arith.addf %592, %593 : vector<8x128xf32>
    %595 = arith.negf %594 : vector<8x128xf32>
    %596 = math.exp %595 : vector<8x128xf32>
    %cst_134 = arith.constant 1.000000e+00 : f32
    %597 = vector.broadcast %cst_134 : f32 to vector<8x128xf32>
    %598 = arith.addf %597, %596 : vector<8x128xf32>
    %599 = arith.divf %597, %598 : vector<8x128xf32>
    %600 = math.tanh %594 : vector<8x128xf32>
    %601 = vector.extract_strided_slice %599 {offsets = [0, 0], sizes = [8, 32], strides = [1, 1]} : vector<8x128xf32> to vector<8x32xf32>
    %602 = vector.extract_strided_slice %599 {offsets = [0, 32], sizes = [8, 32], strides = [1, 1]} : vector<8x128xf32> to vector<8x32xf32>
    %603 = vector.extract_strided_slice %600 {offsets = [0, 64], sizes = [8, 32], strides = [1, 1]} : vector<8x128xf32> to vector<8x32xf32>
    %604 = vector.extract_strided_slice %599 {offsets = [0, 96], sizes = [8, 32], strides = [1, 1]} : vector<8x128xf32> to vector<8x32xf32>
    %605 = arith.mulf %602, %536 : vector<8x32xf32>
    %606 = arith.mulf %601, %603 : vector<8x32xf32>
    %607 = arith.addf %605, %606 : vector<8x32xf32>
    %608 = math.tanh %607 : vector<8x32xf32>
    %609 = arith.mulf %604, %608 : vector<8x32xf32>
    %610 = arith.select %570, %609, %535 : vector<8x32xi1>, vector<8x32xf32>
    %cst_135 = arith.constant dense<0.000000e+00> : vector<8x128xf32>
    %611 = tpu.matmul %610, %24, %cst_135 {dimension_numbers = #tpu.dot_dimension_numbers<[1], [0], [0], [1], [0, 0, 1, 1], [], []>} : vector<8x32xf32>, vector<32x128xf32>, vector<8x128xf32> -> vector<8x128xf32>
    %cst_136 = arith.constant dense<0.000000e+00> : vector<8x128xf32>
    %612 = tpu.matmul %557, %20, %cst_136 {dimension_numbers = #tpu.dot_dimension_numbers<[1], [0], [0], [1], [0, 0, 1, 1], [], []>} : vector<8x32xf32>, vector<32x128xf32>, vector<8x128xf32> -> vector<8x128xf32>
    %613 = arith.addf %611, %612 : vector<8x128xf32>
    %614 = vector.broadcast %28 : vector<1x128xf32> to vector<8x128xf32>
    %615 = arith.addf %613, %614 : vector<8x128xf32>
    %616 = arith.negf %615 : vector<8x128xf32>
    %617 = math.exp %616 : vector<8x128xf32>
    %cst_137 = arith.constant 1.000000e+00 : f32
    %618 = vector.broadcast %cst_137 : f32 to vector<8x128xf32>
    %619 = arith.addf %618, %617 : vector<8x128xf32>
    %620 = arith.divf %618, %619 : vector<8x128xf32>
    %621 = math.tanh %615 : vector<8x128xf32>
    %622 = vector.extract_strided_slice %620 {offsets = [0, 0], sizes = [8, 32], strides = [1, 1]} : vector<8x128xf32> to vector<8x32xf32>
    %623 = vector.extract_strided_slice %620 {offsets = [0, 32], sizes = [8, 32], strides = [1, 1]} : vector<8x128xf32> to vector<8x32xf32>
    %624 = vector.extract_strided_slice %621 {offsets = [0, 64], sizes = [8, 32], strides = [1, 1]} : vector<8x128xf32> to vector<8x32xf32>
    %625 = vector.extract_strided_slice %620 {offsets = [0, 96], sizes = [8, 32], strides = [1, 1]} : vector<8x128xf32> to vector<8x32xf32>
    %626 = arith.mulf %623, %558 : vector<8x32xf32>
    %627 = arith.mulf %622, %624 : vector<8x32xf32>
    %628 = arith.addf %626, %627 : vector<8x32xf32>
    %629 = math.tanh %628 : vector<8x32xf32>
    %630 = arith.mulf %625, %629 : vector<8x32xf32>
    %631 = arith.select %570, %630, %557 : vector<8x32xi1>, vector<8x32xf32>
    %632 = arith.mulf %631, %3 : vector<8x32xf32>
    %cst_138 = arith.constant dense<0.000000e+00> : vector<8xf32>
    %633 = vector.multi_reduction <add>, %632, %cst_138 [1] : vector<8x32xf32> to vector<8xf32>
    %634 = vector.shape_cast %633 : vector<8xf32> to vector<8x1xf32>
    %cst_139 = arith.constant 0.000000e+00 : f32
    %635 = vector.broadcast %cst_139 : f32 to vector<8x1xf32>
    %636 = arith.select %568, %634, %635 : vector<8x1xi1>, vector<8x1xf32>
    %637 = vector.broadcast %4 : vector<1x1xf32> to vector<8x1xf32>
    %638 = arith.addf %636, %637 : vector<8x1xf32>
    %c0_140 = arith.constant 0 : index
    %c7 = arith.constant 7 : index
    %639 = vector.load %arg8[%c0_140, %c7] : memref<8x8xf32, #tpu.memory_space<vmem>>, vector<8x1xf32>
    tpu.vector_store %arg8[%c0_140, %c7], %638 {strides = array<i32>} : memref<8x8xf32, #tpu.memory_space<vmem>>, vector<8x1xf32>,
    return
  }
  func.func @transform_0(%arg0: i32) -> (i32, i32, i32) {
    %c0_i32 = arith.constant 0 : i32
    %c0_i32_0 = arith.constant 0 : i32
    %c0_i32_1 = arith.constant 0 : i32
    return %c0_i32, %arg0, %c0_i32_0 : i32, i32, i32
  }
  func.func @transform_1(%arg0: i32) -> (i32, i32) {
    %c0_i32 = arith.constant 0 : i32
    %c0_i32_0 = arith.constant 0 : i32
    return %arg0, %c0_i32 : i32, i32
  }
  func.func @transform_2(%arg0: i32) -> (i32, i32, i32) {
    %c0_i32 = arith.constant 0 : i32
    %c0_i32_0 = arith.constant 0 : i32
    %c0_i32_1 = arith.constant 0 : i32
    %c0_i32_2 = arith.constant 0 : i32
    return %c0_i32, %c0_i32_0, %c0_i32_1 : i32, i32, i32
  }
  func.func @transform_3(%arg0: i32) -> (i32, i32, i32) {
    %c0_i32 = arith.constant 0 : i32
    %c0_i32_0 = arith.constant 0 : i32
    %c0_i32_1 = arith.constant 0 : i32
    %c0_i32_2 = arith.constant 0 : i32
    return %c0_i32, %c0_i32_0, %c0_i32_1 : i32, i32, i32
  }
  func.func @transform_4(%arg0: i32) -> (i32, i32, i32) {
    %c0_i32 = arith.constant 0 : i32
    %c0_i32_0 = arith.constant 0 : i32
    %c0_i32_1 = arith.constant 0 : i32
    %c0_i32_2 = arith.constant 0 : i32
    return %c0_i32, %c0_i32_0, %c0_i32_1 : i32, i32, i32
  }
  func.func @transform_5(%arg0: i32) -> (i32, i32) {
    %c0_i32 = arith.constant 0 : i32
    %c0_i32_0 = arith.constant 0 : i32
    %c0_i32_1 = arith.constant 0 : i32
    return %c0_i32, %c0_i32_0 : i32, i32
  }
  func.func @transform_6(%arg0: i32) -> (i32, i32) {
    %c0_i32 = arith.constant 0 : i32
    %c0_i32_0 = arith.constant 0 : i32
    %c0_i32_1 = arith.constant 0 : i32
    return %c0_i32, %c0_i32_0 : i32, i32
  }
  func.func @transform_7(%arg0: i32) -> (i32, i32) {
    %c0_i32 = arith.constant 0 : i32
    %c0_i32_0 = arith.constant 0 : i32
    return %arg0, %c0_i32 : i32, i32
  }
}

</mosaic_0001>

<bundles_post_ra>
// kernel: tpu_custom_call.1
= control target key start
LH: loop header
LB: loop body
LE: loop exit
PB: predicated region body
PF: predicated region fallthrough
CT: control target
= control target key end

     0   :  { %s6351_s0 = inlined_call_operand.hbm [shape: f32[8,8,32], index: 0, kind: input, shape index: {}]   ;;  %s6352_s1 = inlined_call_operand.vmem [shape: s32[8,1], index: 1, kind: input, shape index: {}]   ;;  %s6353_s2 = inlined_call_operand.hbm [shape: f32[3,32,128], index: 2, kind: input, shape index: {}]   ;;  %s6354_s3 = inlined_call_operand.hbm [shape: f32[3,32,128], index: 3, kind: input, shape index: {}]   ;;  %s6355_s4 = inlined_call_operand.vmem [shape: f32[3,1,128], index: 4, kind: input, shape index: {}]   ;;  %s6356_s5 = inlined_call_operand.vmem [shape: f32[1,32], index: 5, kind: input, shape index: {}]   ;;  %s6357_s6 = inlined_call_operand.<no memory space> [shape: f32[1,1], index: 6, kind: input, shape index: {}]   ;;  %s6358_s7 = inlined_call_operand.hbm [shape: f32[8,8], index: 7, kind: output, shape index: {}]  }
   0x1   :  { %v12_v0 = vstv %s6357_s6 }
   0x2   :  { %13 = vst [vmem:[#allocation3] sm:$0x1] %v12_v0 }
   0x3   :  { %14 = vsyncpa [#allocation5], 0 }
   0x4   :  { %15 = vsyncpa [#allocation8], 0 }
   0x5   :  { %16 = vsyncpa [#allocation6], 0  ;;  %s5114_s26 = smov [#allocation7]   ;;  %s5115_s28 = smov [#allocation4]  }
   0x6   :  { %s36_s27 = sshll.u32 %s5114_s26, 4  ;;  %s22_s29 = sshll.u32 %s5115_s28, 4  ;;  %s37_s27 = int_to_ptr.vmem [resolvable:$true] %s36_s27  ;;  %s23_s29 = int_to_ptr.vmem [resolvable:$true] %s22_s29 }
   0x7   :  { %s5036_s30 = scalar_lea.vmem %s37_s27, 1536  ;;  %p5041_p1 = scmp.lt.s32.totalorder %s37_s27, %s37_s27 }
   0x8   :  { %p5037_p0 = scmp.ne.s32.totalorder %s37_s27, %s5036_s30  ;;  %p5042_p2 = scmp.lt.s32.totalorder %s5036_s30, %s5036_s30 }
   0xa   :  { %p5043_p3 = por %p5042_p2, %p5041_p1 }
   0xc   :  { %p5044_p4 = pnand %p5043_p3, %p5037_p0 }
   0xe   :  { %5047 = shalt.err (!%p5044_p4)
}
   0xf   :  { %s5116_s8 = smov 128   ;;  %s5117_s9 = smov 8  }
  0x10   :  { %42 = dma.hbm_to_vmem [thread:$0]  %s6353_s2, 1536, %s37_s27, [#allocation8], %s5116_s8, %s5116_s8, %s5117_s9  }
  0x11   :  { %s5056_s11 = scalar_lea.vmem %s23_s29, 1024  ;;  %p5061_p6 = scmp.lt.s32.totalorder %s23_s29, %s23_s29 }
  0x12   :  { %p5057_p5 = scmp.ne.s32.totalorder %s23_s29, %s5056_s11  ;;  %p5062_p7 = scmp.lt.s32.totalorder %s5056_s11, %s5056_s11 }
  0x14   :  { %p5063_p8 = por %p5062_p7, %p5061_p6 }
  0x16   :  { %p5064_p9 = pnand %p5063_p8, %p5057_p5 }
  0x18   :  { %5067 = shalt.err (!%p5064_p9)
}
  0x19   :  { %28 = dma.hbm_to_vmem [thread:$0]  %s6351_s0, 1024, %s23_s29, [#allocation5], %s5116_s8, %s5116_s8, %s5117_s9  }
  0x1a   :  { %s5118_s14 = smov [#allocation9]  }
  0x1b   :  { %s48_s15 = sshll.u32 %s5118_s14, 4  ;;  %s49_s15 = int_to_ptr.vmem [resolvable:$true] %s48_s15 }
  0x1c   :  { %s5076_s16 = scalar_lea.vmem %s49_s15, 1536  ;;  %p5081_p11 = scmp.lt.s32.totalorder %s49_s15, %s49_s15 }
  0x1d   :  { %p5077_p10 = scmp.ne.s32.totalorder %s49_s15, %s5076_s16  ;;  %p5082_p12 = scmp.lt.s32.totalorder %s5076_s16, %s5076_s16 }
  0x1f   :  { %p5083_p13 = por %p5082_p12, %p5081_p11 }
  0x21   :  { %p5084_p0 = pnand %p5083_p13, %p5077_p10 }
  0x23   :  { %5087 = shalt.err (!%p5084_p0)
}
  0x24   :  { %54 = dma.hbm_to_vmem [thread:$0]  %s6354_s3, 1536, %s49_s15, [#allocation8], %s5116_s8, %s5116_s8, %s5117_s9  }
  0x25   :  { %5108 = dma.done.wait [#allocation5], 1024  }
  0x26   :  { %5109 = vsyncadd [#allocation5], 4294966272 }
  0x27   :  { %5110 = dma.done.wait [#allocation8], 3072  }
  0x28   :  { %5111 = vsyncadd [#allocation8], 4294964224  ;;  %v5119_v1 = vmov 0.0   ;;  %vm5120_vm0 = vmmov 0   ;;  %v89_v2 = vld [vmem:[#allocation7 + $0x18] sm:$0xff]  ;;  %v88_v3 = vld [vmem:[#allocation7 + $0x10] sm:$0xff] }
  0x29   :  { %4351 = vmatprep.subr.mxu1 %v5119_v1  ;;  %4359 = vmatprep.mubr.msk.f32.mxu1 %vm5120_vm0, %v5119_v1  ;;  %v5188_v4 = vld [vmem:[#allocation9 + $0x18] sm:$0xff]  ;;  %v5191_v5 = vld [vmem:[#allocation9 + $0x10] sm:$0xff]  ;;  %v87_v6 = vld [vmem:[#allocation7 + $0x8] sm:$0xff]  ;;  %vm97_vm1 = vcmask 261120   ;;  %v5121_v13 = vmov 0   ;;  %s5122_s20 = smov 64  }
  0x2a   :  { %4331 = vmatprep.subr.mxu0 %v89_v2  ;;  %4352 = vmatpush3.msra.mxu1 %v5188_v4  ;;  %v78_v7 = vld [vmem:[#allocation4] sm:$0xff]  ;;  %v5195_v8 = vld [vmem:[#allocation9 + $0x8] sm:$0xff]  ;;  %v5226_v17 = vld [vmem:[%s6355_s4] ss:$0 sm:$0xff]  ;;  %s5123_s21 = smov 32   ;;  %s5124_s10 = smov 96  }
  0x2b   :  { %4332 = vmatpush3.msra.mxu0 %v89_v2  ;;  %4353 = vmatprep.subr.mxu1 %v5119_v1  ;;  %v86_v9 = vld [vmem:[#allocation7] sm:$0xff]  ;;  %v79_v11 = vld [vmem:[#allocation4 + $0x8] sm:$0xff]  ;;  %v5238_v32 = vld [vmem:[#allocation9 + $0x38] sm:$0xff]  ;;  %s5126_s11 = smov 2   ;;  %s5127_s12 = smov 4  }
  0x2c   :  { %4333 = vmatprep.subr.mxu0 %v88_v3  ;;  %4354 = vmatpush3.msra.mxu1 %v5191_v5  ;;  %v5199_v10 = vld [vmem:[#allocation9] sm:$0xff]  ;;  %v5240_v33 = vld [vmem:[#allocation9 + $0x30] sm:$0xff]  ;;  %v5243_v34 = vld [vmem:[#allocation7 + $0x38] sm:$0xff]  ;;  %s5128_s13 = smov 5   ;;  %s5129_s14 = smov 3  }
  0x2d   :  { %4334 = vmatpush3.msra.mxu0 %v88_v3  ;;  %4355 = vmatprep.subr.mxu1 %v5119_v1  ;;  %v5213_v12 = vld [vmem:[%s6352_s1] sm:$0xff]  ;;  %v80_v35 = vld [vmem:[#allocation4 + $0x10] sm:$0xff]  ;;  %v5246_v36 = vld [vmem:[#allocation9 + $0x28] sm:$0xff]  ;;  %s5130_s15 = smov 7   ;;  %s5131_s16 = smov 6  }
  0x2e   :  { %4335 = vmatprep.subr.mxu0 %v87_v6  ;;  %4339 = vmatprep.mubr.msk.f32.mxu0 %vm97_vm1, %v78_v7  ;;  %vm263_vm2 = vcmp.gt.s32.totalorder %v5213_v12, 0  ;;  %v81_v37 = vld [vmem:[#allocation4 + $0x18] sm:$0xff]  ;;  %v5251_v38 = vld [vmem:[#allocation7 + $0x30] sm:$0xff]  ;;  %v5254_v39 = vld [vmem:[#allocation9 + $0x20] sm:$0xff]  ;;  %vm747_vm4 = vcmp.gt.s32.totalorder %v5213_v12, 1  ;;  %vm1216_vm6 = vcmp.gt.s32.totalorder %v5213_v12, 2 }
  0x2f   :  { %4336 = vmatpush3.msra.mxu0 %v87_v6  ;;  %4356 = vmatpush3.msra.mxu1 %v5195_v8  ;;  %v264_v14 = vsel %vm263_vm2, 1, %v5121_v13  ;;  %v82_v40 = vld [vmem:[#allocation4 + $0x20] sm:$0xff]  ;;  %v5260_v41 = vld [vmem:[#allocation9 + $0x58] sm:$0xff]  ;;  %v83_v42 = vld [vmem:[#allocation4 + $0x28] sm:$0xff]  ;;  %vm1685_vm8 = vcmp.gt.s32.totalorder %v5213_v12, 3  ;;  %s5132_s2 = smov [#allocation10]  }
  0x30   :  { %4337 = vmatprep.subr.mxu0 %v86_v9  ;;  %4357 = vmatprep.subr.mxu1 %v5119_v1  ;;  %v5267_v43 = vld [vmem:[#allocation9 + $0x50] sm:$0xff]  ;;  %v5271_v45 = vld [vmem:[#allocation7 + $0x28] sm:$0xff]  ;;  %v5280_v48 = vld [vmem:[#allocation9 + $0x40] sm:$0xff]  ;;  %s4033_s17 = sshll.u32 %s5132_s2, 4  ;;  %s4034_s17 = int_to_ptr.vmem [resolvable:$true] %s4033_s17 }
  0x31   :  { %4338 = vmatpush3.msra.mxu0 %v86_v9  ;;  %4358 = vmatpush3.msra.mxu1 %v5199_v10  ;;  %v5275_v46 = vld [vmem:[#allocation9 + $0x48] sm:$0xff]  ;;  %v84_v47 = vld [vmem:[#allocation4 + $0x30] sm:$0xff]  ;;  %v85_v49 = vld [vmem:[#allocation4 + $0x38] sm:$0xff]  ;;  %s5088_s0 = scalar_lea.vmem %s4034_s17, 128  ;;  %p5093_p2 = scmp.lt.s32.totalorder %s4034_s17, %s4034_s17 }
  0x32   :  { %4340 = vmatmul.mubr.msk.f32.vlgmr.msra.gmra.mxu0 %vm97_vm1, %v79_v11  ;;  %4360 = vmatmul.mubr.f32.vlgmr.msra.gmra.mxu1 %v5119_v1  ;;  %v5290_v50 = vld [vmem:[#allocation7 + $0x20] sm:$0xff]  ;;  %p5089_p1 = scmp.ne.s32.totalorder %s4034_s17, %s5088_s0  ;;  %p5094_p3 = scmp.lt.s32.totalorder %s5088_s0, %s5088_s0 }
  0x33   :  { %4362 = vmatprep.subr.mxu1 %v5119_v1  ;;  %4373 = vmatprep.subr.mxu0 %v5119_v1  ;;  %v5352_v6 = vld [vmem:[%s6355_s4 + $0x1] ss:$0 sm:$0xff] }
  0x34   :  { %4370 = vmatprep.mubr.msk.f32.mxu1 %vm5120_vm0, %v5119_v1  ;;  %4810 = vset.pattern.permute.xlu1 %v5121_v13  ;;  %p5095_p4 = por %p5094_p3, %p5093_p2 }
  0x35   :  { %4811 = vset.pattern.permute.xlu0 %v5121_v13  ;;  %266 = vperm.xlu1 %4810, %v264_v14  }
  0x36   :  { %4363 = vmatpush3.msra.mxu1 %v5238_v32  ;;  %4374 = vmatpush3.msra.mxu0 %v5243_v34  ;;  %p5096_p5 = pnand %p5095_p4, %p5089_p1 }
  0x37   :  { %4364 = vmatprep.subr.mxu1 %v5119_v1  ;;  %4342 = vmatprep.mubr.msk.f32.mxu0 %vm97_vm1, %v80_v35 }
  0x38   :  { %4365 = vmatpush3.msra.mxu1 %v5240_v33  ;;  %4343 = vmatmul.mubr.msk.f32.gmra.mxu0 %vm97_vm1, %v81_v37 }
  0x39   :  { %4366 = vmatprep.subr.mxu1 %v5119_v1  ;;  %4375 = vmatprep.subr.mxu0 %v5119_v1 }
  0x3a   :  { %4367 = vmatpush3.msra.mxu1 %v5246_v36  ;;  %4376 = vmatpush3.msra.mxu0 %v5251_v38 }
  0x3b   :  { %4368 = vmatprep.subr.mxu1 %v5119_v1  ;;  %4345 = vmatprep.mubr.msk.f32.mxu0 %vm97_vm1, %v82_v40  ;;  %v748_v40 = vsel %vm747_vm4, 1, %v5121_v13 }
  0x3c   :  { %4369 = vmatpush3.msra.mxu1 %v5254_v39  ;;  %4346 = vmatmul.mubr.msk.f32.gmra.mxu0 %vm97_vm1, %v83_v42 }
  0x3d   :  { %4384 = vmatprep.subr.mxu1 %v5119_v1  ;;  %4371 = vmatmul.mubr.f32.vlgmr.msra.gmra.mxu1 %v5119_v1 }
  0x3e   :  { %4385 = vmatpush3.msra.mxu1 %v5260_v41  ;;  %4377 = vmatprep.subr.mxu0 %v5119_v1 }
  0x3f   :  { %4386 = vmatprep.subr.mxu1 %v5119_v1  ;;  %4378 = vmatpush3.msra.mxu0 %v5271_v45 }
  0x40   :  { %4387 = vmatpush3.msra.mxu1 %v5267_v43  ;;  %4392 = vmatprep.mubr.msk.f32.mxu1 %vm5120_vm0, %v5119_v1 }
  0x41   :  { %4388 = vmatprep.subr.mxu1 %v5119_v1  ;;  %4348 = vmatprep.mubr.msk.f32.mxu0 %vm97_vm1, %v84_v47 }
  0x42   :  { %4389 = vmatpush3.msra.mxu1 %v5275_v46  ;;  %4349 = vmatmul.mubr.msk.f32.gmra.mxu0 %vm97_vm1, %v85_v49 }
  0x43   :  { %4390 = vmatprep.subr.mxu1 %v5119_v1  ;;  %4379 = vmatprep.subr.mxu0 %v5119_v1 }
  0x44   :  { %4391 = vmatpush3.msra.mxu1 %v5280_v48  ;;  %4380 = vmatpush3.msra.mxu0 %v5290_v50 }
  0x45   :  { %4406 = vmatprep.subr.mxu1 %v5119_v1  ;;  %4393 = vmatmul.mubr.f32.vlgmr.msra.gmra.mxu1 %v5119_v1 }
  0x46   :  { %4407 = vmatpush3.msra.mxu1 %v5188_v4  ;;  %4381 = vmatprep.mubr.msk.f32.mxu0 %vm5120_vm0, %v5119_v1 }
  0x47   :  { %4408 = vmatprep.subr.mxu1 %v5119_v1  ;;  %4414 = vmatprep.mubr.msk.f32.mxu1 %vm5120_vm0, %v5119_v1 }
  0x48   :  { %4409 = vmatpush3.msra.mxu1 %v5191_v5  ;;  %4395 = vmatprep.subr.mxu0 %v5119_v1 }
  0x49   :  { %4410 = vmatprep.subr.mxu1 %v5119_v1 }
  0x4a   :  { %4411 = vmatpush3.msra.mxu1 %v5195_v8 }
  0x4b   :  { %4412 = vmatprep.subr.mxu1 %v5119_v1 }
  0x4c   :  { %4413 = vmatpush3.msra.mxu1 %v5199_v10 }
  0x4d   :  { %4428 = vmatprep.subr.mxu1 %v5119_v1 }
  0xb0   :  { %v5309_v51 = vpop.permute.xlu1 %266 }
  0xb1   :  { %vm268_vm3 = vcmp.eq.s32.totalorder %v5309_v51, 1 }
  0xf2   :  { %v5221_v15 = vpop.f32.mrf.mxu0  ;;  %v339_v16 = vpop.f32.mrf.mxu1 }
  0xf3   :  { %v194_v3 = vadd.f32 %v5221_v15, %v5226_v17 }
  0xf4   :  { %v188_v18 = vpop.f32.mrf.mxu0  ;;  %v4361_v19 = vpop.f32.mrf.mxu1 }
  0xf5   :  { %v189_v20 = vadd.f32 %v5226_v17, %v188_v18 }
  0xf7   :  { %v343_v21 = vadd.f32 %v339_v16, %v189_v20 }
  0xf8   :  { %v5335_v60 = vpop.f32.mrf.mxu0 }
  0xf9   :  { %4812 = vtanh.f32 %v343_v21  ;;  %v4055_v23 = vmul.f32 -1.442695, %v343_v21 }
  0xfa   :  { %v5337_v61 = vpop.f32.mrf.mxu0 }
  0xfb   :  { %4814 = vpow2.f32 %v4055_v23 }
  0xfc   :  { %v5339_v62 = vpop.f32.mrf.mxu0 }
  0xfd   :  { %v436_v55 = vpop.f32.mrf.mxu1 }
  0xfe   :  { %v5341_v63 = vpop.f32.mrf.mxu0 }
  0xff   :  { %v4372_v56 = vpop.f32.mrf.mxu1 }
 0x100   :  { %v5375_v56 = vld [vmem:[#allocation7 + $0x58] sm:$0xff] }
 0x102   :  { %v5343_v0 = vpop.f32.mrf.mxu0 }
 0x104   :  { %v5345_v2 = vpop.f32.mrf.mxu0 }
 0x105   :  { %v5319_v57 = vpop.f32.mrf.mxu1 }
 0x106   :  { %v4813_v22 = vpop.eup %4812 }
 0x107   :  { %353 = vrot.lane.b32.xlu0 %v4813_v22, %s5122_s20  ;;  %v4394_v58 = vpop.f32.mrf.mxu1 }
 0x108   :  { %v4815_v24 = vpop.eup %4814  ;;  %v5377_v58 = vld [vmem:[#allocation7 + $0x50] sm:$0xff] }
 0x109   :  { %v347_v25 = vadd.f32 1.0, %v4815_v24 }
 0x10b   :  { %4816 = vrcp.f32 %v347_v25 }
 0x118   :  { %v5230_v26 = vpop.eup %4816 }
 0x119   :  { %v351_v29 = vmul.f32 0.0, %v5230_v26 }
 0x179   :  { %v354_v27 = vpop.permute.xlu0 %353 }
 0x17a   :  { %v356_v28 = vmul.f32 %v5230_v26, %v354_v27 }
 0x17c   :  { %358 = vrot.lane.b32.xlu0 %v356_v28, %s5123_s21 }
 0x1ee   :  { %v359_v30 = vpop.permute.xlu0 %358 }
 0x1ef   :  { %v5235_v31 = vadd.f32 %v359_v30, %v351_v29 }
 0x1f1   :  { %4818 = vtanh.f32 %v5235_v31 }
 0x1fe   :  { %v4819_v44 = vpop.eup %4818 }
 0x1ff   :  { %364 = vrot.lane.b32.xlu1 %v4819_v44, %s5122_s20  ;;  %v5366_v44 = vsel %vm268_vm3, %v5235_v31, 0.0  ;;  %v5381_v31 = vld [vmem:[#allocation7 + $0x48] sm:$0xff] }
 0x271   :  { %v365_v52 = vpop.permute.xlu1 %364 }
 0x272   :  { %v367_v53 = vmul.f32 %v5230_v26, %v365_v52 }
 0x274   :  { %v5315_v54 = vsel %vm268_vm3, %v367_v53, 0.0 }
 0x275   :  { %441 = vrot.lane.b32.xlu0 %v5315_v54, %s5123_s21 }
 0x2e7   :  { %v442_v59 = vpop.permute.xlu0 %441 }
 0x2e8   :  { %4382 = vmatmul.mubr.msk.f32.vlgmr.msra.gmra.mxu0 %vm97_vm1, %v442_v59  ;;  %4415 = vmatmul.mubr.msk.f32.vlgmr.msra.gmra.mxu1 %vm97_vm1, %v442_v59  ;;  %v5385_v59 = vld [vmem:[#allocation7 + $0x40] sm:$0xff] }
 0x2e9   :  { %4429 = vmatpush3.msra.mxu1 %v5243_v34  ;;  %4403 = vmatprep.mubr.msk.f32.mxu0 %vm5120_vm0, %v5119_v1 }
 0x2ea   :  { %4430 = vmatprep.subr.mxu1 %v5119_v1  ;;  %4436 = vmatprep.mubr.msk.f32.mxu1 %vm5120_vm0, %v5119_v1 }
 0x2eb   :  { %4431 = vmatpush3.msra.mxu1 %v5251_v38  ;;  %4396 = vmatpush3.msra.mxu0 %v5375_v56 }
 0x2ec   :  { %4432 = vmatprep.subr.mxu1 %v5119_v1  ;;  %4397 = vmatprep.subr.mxu0 %v5119_v1 }
 0x2ed   :  { %4433 = vmatpush3.msra.mxu1 %v5271_v45  ;;  %4398 = vmatpush3.msra.mxu0 %v5377_v58 }
 0x2ee   :  { %4434 = vmatprep.subr.mxu1 %v5119_v1  ;;  %4399 = vmatprep.subr.mxu0 %v5119_v1 }
 0x2ef   :  { %4435 = vmatpush3.msra.mxu1 %v5290_v50  ;;  %4400 = vmatpush3.msra.mxu0 %v5381_v31 }
 0x2f0   :  { %4450 = vmatprep.subr.mxu1 %v5119_v1  ;;  %4401 = vmatprep.subr.mxu0 %v5119_v1 }
 0x2f1   :  { %4402 = vmatpush3.msra.mxu0 %v5385_v59 }
 0x2f2   :  { %4417 = vmatprep.subr.mxu0 %v5119_v1 }
 0x3a8   :  { %v511_v7 = vpop.f32.mrf.mxu0  ;;  %v820_v9 = vpop.f32.mrf.mxu1 }
 0x3a9   :  { %v512_v11 = vadd.f32 %v511_v7, %v436_v55  ;;  %v824_v14 = vadd.f32 %v820_v9, %v194_v3 }
 0x3aa   :  { %v4383_v16 = vpop.f32.mrf.mxu0  ;;  %v4416_v18 = vpop.f32.mrf.mxu1 }
 0x3ab   :  { %v521_v19 = vadd.f32 %v5352_v6, %v512_v11  ;;  %4820 = vtanh.f32 %v824_v14  ;;  %v4064_v15 = vmul.f32 -1.442695, %v824_v14 }
 0x3ad   :  { %4822 = vtanh.f32 %v521_v19  ;;  %v4058_v22 = vmul.f32 -1.442695, %v521_v19 }
 0x3ae   :  { %4824 = vpow2.f32 %v4064_v15 }
 0x3af   :  { %4826 = vpow2.f32 %v4058_v22 }
 0x3b8   :  { %v4821_v20 = vpop.eup %4820 }
 0x3b9   :  { %834 = vrot.lane.b32.xlu0 %v4821_v20, %s5122_s20 }
 0x3ba   :  { %v4823_v21 = vpop.eup %4822 }
 0x3bb   :  { %531 = vrot.lane.b32.xlu1 %v4823_v21, %s5122_s20  ;;  %v4825_v23 = vpop.eup %4824 }
 0x3bc   :  { %v4827_v24 = vpop.eup %4826  ;;  %v828_v25 = vadd.f32 1.0, %v4825_v23 }
 0x3bd   :  { %v525_v26 = vadd.f32 1.0, %v4827_v24 }
 0x3be   :  { %4828 = vrcp.f32 %v828_v25 }
 0x3bf   :  { %4830 = vrcp.f32 %v525_v26 }
 0x3cb   :  { %v4829_v27 = vpop.eup %4828 }
 0x3cc   :  { %v4831_v30 = vpop.eup %4830  ;;  %v832_v52 = vmul.f32 %v4829_v27, %v5366_v44 }
 0x3cd   :  { %v529_v42 = vmul.f32 0.0, %v4831_v30 }
 0x42b   :  { %v835_v28 = vpop.permute.xlu0 %834 }
 0x42c   :  { %v837_v29 = vmul.f32 %v4829_v27, %v835_v28 }
 0x42d   :  { %v532_v35 = vpop.permute.xlu1 %531 }
 0x42e   :  { %v534_v37 = vmul.f32 %v4831_v30, %v532_v35  ;;  %839 = vrot.lane.b32.xlu0 %v837_v29, %s5123_s21 }
 0x430   :  { %536 = vrot.lane.b32.xlu1 %v534_v37, %s5123_s21 }
 0x432   :  { %750 = vperm.xlu0 %4811, %v748_v40  }
 0x4a0   :  { %v840_v47 = vpop.permute.xlu0 %839 }
 0x4a1   :  { %v5371_v55 = vadd.f32 %v840_v47, %v832_v52 }
 0x4a2   :  { %v537_v49 = vpop.permute.xlu1 %536 }
 0x4a3   :  { %v5369_v53 = vadd.f32 %v537_v49, %v529_v42 }
 0x4a5   :  { %4832 = vtanh.f32 %v5369_v53 }
 0x4a6   :  { %4834 = vtanh.f32 %v5371_v55 }
 0x4ad   :  { %v5393_v14 = vpop.permute.xlu0 %750 }
 0x4ae   :  { %vm752_vm5 = vcmp.eq.s32.totalorder %v5393_v14, 1 }
 0x4b2   :  { %v4833_v3 = vpop.eup %4832 }
 0x4b3   :  { %542 = vrot.lane.b32.xlu1 %v4833_v3, %s5122_s20  ;;  %v4835_v7 = vpop.eup %4834 }
 0x4b7   :  { %845 = vrot.lane.b32.xlu1 %v4835_v7, %s5122_s20 }
 0x525   :  { %v543_v9 = vpop.permute.xlu1 %542 }
 0x526   :  { %v545_v11 = vmul.f32 %v4831_v30, %v543_v9 }
 0x528   :  { %v5397_v16 = vsel %vm268_vm3, %v545_v11, 0.0 }
 0x529   :  { %619 = vrot.lane.b32.xlu1 %v5397_v16, %s5123_s21  ;;  %v846_v18 = vpop.permute.xlu1 %845 }
 0x52a   :  { %v848_v19 = vmul.f32 %v4829_v27, %v846_v18 }
 0x52c   :  { %v5405_v20 = vsel %vm752_vm5, %v848_v19, %v5315_v54  ;;  %v5448_v54 = vld [vmem:[%s6355_s4 + $0x2] ss:$0 sm:$0xff] }
 0x52d   :  { %922 = vrot.lane.b32.xlu0 %v5405_v20, %s5123_s21 }
 0x59b   :  { %v620_v21 = vpop.permute.xlu1 %619 }
 0x59c   :  { %4404 = vmatmul.mubr.msk.f32.vlgmr.msra.gmra.mxu0 %vm97_vm1, %v620_v21 }
 0x59d   :  { %4418 = vmatpush3.msra.mxu0 %v5238_v32  ;;  %4425 = vmatprep.mubr.msk.f32.mxu0 %vm5120_vm0, %v5119_v1 }
 0x59e   :  { %4419 = vmatprep.subr.mxu0 %v5119_v1 }
 0x59f   :  { %4420 = vmatpush3.msra.mxu0 %v5240_v33  ;;  %v5415_v15 = vpop.permute.xlu0 %922 }
 0x5a0   :  { %4421 = vmatprep.subr.mxu0 %v5119_v1  ;;  %4437 = vmatmul.mubr.msk.f32.vlgmr.msra.gmra.mxu1 %vm97_vm1, %v5415_v15 }
 0x5a1   :  { %4422 = vmatpush3.msra.mxu0 %v5246_v36  ;;  %4451 = vmatpush3.msra.mxu1 %v5375_v56 }
 0x5a2   :  { %4423 = vmatprep.subr.mxu0 %v5119_v1  ;;  %4452 = vmatprep.subr.mxu1 %v5119_v1 }
 0x5a3   :  { %4424 = vmatpush3.msra.mxu0 %v5254_v39  ;;  %4453 = vmatpush3.msra.mxu1 %v5377_v58 }
 0x5a4   :  { %4426 = vmatmul.mubr.msk.f32.vlgmr.msra.gmra.mxu0 %vm97_vm1, %v620_v21  ;;  %4439 = vmatprep.subr.mxu0 %v5119_v1 }
 0x5a5   :  { %4440 = vmatpush3.msra.mxu0 %v5260_v41  ;;  %4447 = vmatprep.mubr.msk.f32.mxu0 %vm5120_vm0, %v5119_v1 }
 0x5a6   :  { %4441 = vmatprep.subr.mxu0 %v5119_v1  ;;  %4454 = vmatprep.subr.mxu1 %v5119_v1 }
 0x5a7   :  { %4442 = vmatpush3.msra.mxu0 %v5267_v43  ;;  %4455 = vmatpush3.msra.mxu1 %v5381_v31 }
 0x5a8   :  { %4443 = vmatprep.subr.mxu0 %v5119_v1  ;;  %4456 = vmatprep.subr.mxu1 %v5119_v1 }
 0x5a9   :  { %4444 = vmatpush3.msra.mxu0 %v5275_v46  ;;  %4457 = vmatpush3.msra.mxu1 %v5385_v59 }
 0x5aa   :  { %4445 = vmatprep.subr.mxu0 %v5119_v1  ;;  %4458 = vmatprep.mubr.msk.f32.mxu1 %vm5120_vm0, %v5119_v1 }
 0x5ab   :  { %4446 = vmatpush3.msra.mxu0 %v5280_v48  ;;  %4472 = vmatprep.subr.mxu1 %v5119_v1 }
 0x5ac   :  { %4461 = vmatprep.subr.mxu0 %v5119_v1 }
 0x65c   :  { %v689_v22 = vpop.f32.mrf.mxu0 }
 0x65d   :  { %v690_v23 = vadd.f32 %v689_v22, %v5319_v57 }
 0x65e   :  { %v4405_v24 = vpop.f32.mrf.mxu0 }
 0x65f   :  { %v699_v25 = vadd.f32 %v5448_v54, %v690_v23 }
 0x660   :  { %v992_v26 = vpop.f32.mrf.mxu1 }
 0x661   :  { %4836 = vtanh.f32 %v699_v25  ;;  %v4061_v42 = vmul.f32 -1.442695, %v699_v25  ;;  %v5463_v25 = vsel %vm268_vm3, %v5369_v53, 0.0 }
 0x662   :  { %v4438_v27 = vpop.f32.mrf.mxu1 }
 0x664   :  { %v917_v28 = vpop.f32.mrf.mxu0 }
 0x665   :  { %v993_v29 = vadd.f32 %v992_v26, %v917_v28 }
 0x666   :  { %v4427_v30 = vpop.f32.mrf.mxu0 }
 0x667   :  { %v996_v35 = vadd.f32 %v5352_v6, %v993_v29 }
 0x669   :  { %4838 = vtanh.f32 %v996_v35  ;;  %v4067_v57 = vmul.f32 -1.442695, %v996_v35 }
 0x66a   :  { %4840 = vpow2.f32 %v4061_v42 }
 0x66b   :  { %4842 = vpow2.f32 %v4067_v57 }
 0x66e   :  { %v4837_v37 = vpop.eup %4836 }
 0x66f   :  { %709 = vrot.lane.b32.xlu1 %v4837_v37, %s5122_s20 }
 0x676   :  { %v4839_v40 = vpop.eup %4838 }
 0x677   :  { %1006 = vrot.lane.b32.xlu0 %v4839_v40, %s5122_s20  ;;  %v4841_v47 = vpop.eup %4840 }
 0x678   :  { %v703_v49 = vadd.f32 1.0, %v4841_v47  ;;  %v4843_v52 = vpop.eup %4842 }
 0x679   :  { %v1000_v3 = vadd.f32 1.0, %v4843_v52  ;;  %v199_v52 = vadd.f32 %v5226_v17, %v5337_v61 }
 0x67a   :  { %4844 = vrcp.f32 %v703_v49 }
 0x67b   :  { %4846 = vrcp.f32 %v1000_v3 }
 0x687   :  { %v4845_v7 = vpop.eup %4844 }
 0x688   :  { %v4847_v18 = vpop.eup %4846  ;;  %v707_v22 = vmul.f32 0.0, %v4845_v7 }
 0x689   :  { %v1004_v26 = vmul.f32 %v4847_v18, %v5463_v25 }
 0x6e1   :  { %v710_v9 = vpop.permute.xlu1 %709 }
 0x6e2   :  { %v712_v11 = vmul.f32 %v4845_v7, %v710_v9 }
 0x6e4   :  { %714 = vrot.lane.b32.xlu1 %v712_v11, %s5123_s21 }
 0x6e9   :  { %v1007_v19 = vpop.permute.xlu0 %1006 }
 0x6ea   :  { %v1009_v21 = vmul.f32 %v4847_v18, %v1007_v19 }
 0x6ec   :  { %1011 = vrot.lane.b32.xlu0 %v1009_v21, %s5123_s21 }
 0x756   :  { %v715_v23 = vpop.permute.xlu1 %714 }
 0x757   :  { %v5457_v24 = vadd.f32 %v715_v23, %v707_v22 }
 0x759   :  { %4848 = vtanh.f32 %v5457_v24 }
 0x75e   :  { %v1012_v27 = vpop.permute.xlu0 %1011 }
 0x75f   :  { %v5466_v28 = vadd.f32 %v1012_v27, %v1004_v26 }
 0x761   :  { %4850 = vtanh.f32 %v5466_v28 }
 0x766   :  { %v4849_v29 = vpop.eup %4848 }
 0x767   :  { %720 = vrot.lane.b32.xlu1 %v4849_v29, %s5122_s20 }
 0x76e   :  { %v4851_v30 = vpop.eup %4850 }
 0x76f   :  { %1017 = vrot.lane.b32.xlu0 %v4851_v30, %s5122_s20 }
 0x7d9   :  { %v721_v35 = vpop.permute.xlu1 %720 }
 0x7da   :  { %v723_v37 = vmul.f32 %v4845_v7, %v721_v35 }
 0x7dc   :  { %v5473_v40 = vsel %vm268_vm3, %v723_v37, 0.0 }
 0x7dd   :  { %1024 = vrot.lane.b32.xlu1 %v5473_v40, %s5123_s21 }
 0x7e1   :  { %v1018_v53 = vpop.permute.xlu0 %1017 }
 0x7e2   :  { %v1020_v42 = vmul.f32 %v4847_v18, %v1018_v53 }
 0x7e4   :  { %v5480_v57 = vsel %vm752_vm5, %v1020_v42, %v5397_v16 }
 0x7e5   :  { %1099 = vrot.lane.b32.xlu0 %v5480_v57, %s5123_s21 }
 0x84f   :  { %v1025_v47 = vpop.permute.xlu1 %1024 }
 0x850   :  { %4448 = vmatmul.mubr.msk.f32.vlgmr.msra.gmra.mxu0 %vm97_vm1, %v1025_v47 }
 0x851   :  { %4462 = vmatpush3.msra.mxu0 %v5188_v4  ;;  %4469 = vmatprep.mubr.msk.f32.mxu0 %vm5120_vm0, %v5119_v1 }
 0x852   :  { %4463 = vmatprep.subr.mxu0 %v5119_v1 }
 0x853   :  { %4464 = vmatpush3.msra.mxu0 %v5191_v5 }
 0x854   :  { %4465 = vmatprep.subr.mxu0 %v5119_v1 }
 0x855   :  { %4466 = vmatpush3.msra.mxu0 %v5195_v8 }
 0x856   :  { %4467 = vmatprep.subr.mxu0 %v5119_v1 }
 0x857   :  { %4468 = vmatpush3.msra.mxu0 %v5199_v10  ;;  %v1100_v16 = vpop.permute.xlu0 %1099 }
 0x858   :  { %4459 = vmatmul.mubr.msk.f32.vlgmr.msra.gmra.mxu1 %vm97_vm1, %v1100_v16  ;;  %4470 = vmatmul.mubr.msk.f32.vlgmr.msra.gmra.mxu0 %vm97_vm1, %v5415_v15 }
 0x859   :  { %4473 = vmatpush3.msra.mxu1 %v5238_v32  ;;  %4480 = vmatprep.mubr.msk.f32.mxu1 %vm5120_vm0, %v5119_v1 }
 0x85a   :  { %4474 = vmatprep.subr.mxu1 %v5119_v1  ;;  %4483 = vmatprep.subr.mxu0 %v5119_v1 }
 0x85b   :  { %4475 = vmatpush3.msra.mxu1 %v5240_v33  ;;  %4484 = vmatpush3.msra.mxu0 %v5243_v34 }
 0x85c   :  { %4476 = vmatprep.subr.mxu1 %v5119_v1  ;;  %4485 = vmatprep.subr.mxu0 %v5119_v1 }
 0x85d   :  { %4477 = vmatpush3.msra.mxu1 %v5246_v36  ;;  %4486 = vmatpush3.msra.mxu0 %v5251_v38 }
 0x85e   :  { %4478 = vmatprep.subr.mxu1 %v5119_v1  ;;  %4487 = vmatprep.subr.mxu0 %v5119_v1 }
 0x85f   :  { %4479 = vmatpush3.msra.mxu1 %v5254_v39  ;;  %4488 = vmatpush3.msra.mxu0 %v5271_v45 }
 0x860   :  { %4481 = vmatmul.mubr.msk.f32.vlgmr.msra.gmra.mxu1 %vm97_vm1, %v1100_v16  ;;  %4494 = vmatprep.subr.mxu1 %v5119_v1 }
 0x861   :  { %4495 = vmatpush3.msra.mxu1 %v5260_v41  ;;  %4489 = vmatprep.subr.mxu0 %v5119_v1 }
 0x862   :  { %4496 = vmatprep.subr.mxu1 %v5119_v1  ;;  %4490 = vmatpush3.msra.mxu0 %v5290_v50 }
 0x863   :  { %4497 = vmatpush3.msra.mxu1 %v5267_v43  ;;  %4491 = vmatprep.mubr.msk.f32.mxu0 %vm5120_vm0, %v5119_v1 }
 0x864   :  { %4498 = vmatprep.subr.mxu1 %v5119_v1  ;;  %4502 = vmatprep.mubr.msk.f32.mxu1 %vm5120_vm0, %v5119_v1 }
 0x865   :  { %4499 = vmatpush3.msra.mxu1 %v5275_v46  ;;  %4505 = vmatprep.subr.mxu0 %v5119_v1 }
 0x866   :  { %4500 = vmatprep.subr.mxu1 %v5119_v1 }
 0x867   :  { %4501 = vmatpush3.msra.mxu1 %v5280_v48 }
 0x868   :  { %4516 = vmatprep.subr.mxu1 %v5119_v1 }
 0x910   :  { %v1094_v15 = vpop.f32.mrf.mxu0 }
 0x912   :  { %v4449_v49 = vpop.f32.mrf.mxu0 }
 0x918   :  { %v1169_v3 = vpop.f32.mrf.mxu1  ;;  %v1289_v7 = vpop.f32.mrf.mxu0 }
 0x919   :  { %v1170_v9 = vadd.f32 %v1169_v3, %v1094_v15  ;;  %v1293_v11 = vadd.f32 %v1289_v7, %v199_v52  ;;  %v1217_v3 = vsel %vm1216_vm6, 1, %v5121_v13  ;;  %v5546_v7 = vsel %vm752_vm5, %v5371_v55, %v5366_v44 }
 0x91a   :  { %v4460_v18 = vpop.f32.mrf.mxu1  ;;  %v4471_v19 = vpop.f32.mrf.mxu0 }
 0x91b   :  { %v1173_v21 = vadd.f32 %v5448_v54, %v1170_v9  ;;  %4852 = vtanh.f32 %v1293_v11  ;;  %v4072_v61 = vmul.f32 -1.442695, %v1293_v11  ;;  %v5552_v11 = vsel %vm268_vm3, %v5457_v24, 0.0 }
 0x91d   :  { %4854 = vtanh.f32 %v1173_v21  ;;  %v4070_v29 = vmul.f32 -1.442695, %v1173_v21 }
 0x91e   :  { %4856 = vpow2.f32 %v4072_v61 }
 0x91f   :  { %4858 = vpow2.f32 %v4070_v29 }
 0x920   :  { %v5532_v22 = vpop.f32.mrf.mxu1 }
 0x922   :  { %v4482_v23 = vpop.f32.mrf.mxu1 }
 0x928   :  { %v4853_v26 = vpop.eup %4852 }
 0x929   :  { %1303 = vrot.lane.b32.xlu1 %v4853_v26, %s5122_s20 }
 0x92a   :  { %v4855_v27 = vpop.eup %4854 }
 0x92b   :  { %1183 = vrot.lane.b32.xlu0 %v4855_v27, %s5122_s20  ;;  %v4857_v30 = vpop.eup %4856 }
 0x92c   :  { %v4859_v35 = vpop.eup %4858  ;;  %v1297_v37 = vadd.f32 1.0, %v4857_v30 }
 0x92d   :  { %v1177_v53 = vadd.f32 1.0, %v4859_v35 }
 0x92e   :  { %4860 = vrcp.f32 %v1297_v37 }
 0x92f   :  { %4862 = vrcp.f32 %v1177_v53 }
 0x93b   :  { %v4861_v42 = vpop.eup %4860 }
 0x93c   :  { %v4863_v15 = vpop.eup %4862  ;;  %v1301_v9 = vmul.f32 %v4861_v42, %v5546_v7 }
 0x93d   :  { %v1181_v21 = vmul.f32 %v4863_v15, %v5552_v11 }
 0x99b   :  { %v1304_v47 = vpop.permute.xlu1 %1303 }
 0x99c   :  { %v1306_v16 = vmul.f32 %v4861_v42, %v1304_v47 }
 0x99d   :  { %v1184_v49 = vpop.permute.xlu0 %1183 }
 0x99e   :  { %v1186_v52 = vmul.f32 %v4863_v15, %v1184_v49  ;;  %1308 = vrot.lane.b32.xlu1 %v1306_v16, %s5123_s21 }
 0x9a0   :  { %1188 = vrot.lane.b32.xlu0 %v1186_v52, %s5123_s21 }
 0x9a2   :  { %1219 = vperm.xlu1 %4810, %v1217_v3  }
 0xa10   :  { %v1309_v18 = vpop.permute.xlu1 %1308 }
 0xa11   :  { %v5554_v19 = vadd.f32 %v1309_v18, %v1301_v9 }
 0xa12   :  { %v1189_v23 = vpop.permute.xlu0 %1188 }
 0xa13   :  { %4864 = vtanh.f32 %v5554_v19  ;;  %v5558_v26 = vadd.f32 %v1189_v23, %v1181_v21 }
 0xa15   :  { %4866 = vtanh.f32 %v5558_v26 }
 0xa1d   :  { %v5563_v51 = vpop.permute.xlu1 %1219 }
 0xa1e   :  { %vm1221_vm7 = vcmp.eq.s32.totalorder %v5563_v51, 1 }
 0xa20   :  { %v4865_v44 = vpop.eup %4864 }
 0xa21   :  { %1314 = vrot.lane.b32.xlu0 %v4865_v44, %s5122_s20 }
 0xa22   :  { %v4867_v55 = vpop.eup %4866 }
 0xa23   :  { %1194 = vrot.lane.b32.xlu1 %v4867_v55, %s5122_s20  ;;  %v1686_v55 = vsel %vm1685_vm8, 1, %v5121_v13 }
 0xa93   :  { %v1315_v24 = vpop.permute.xlu0 %1314 }
 0xa94   :  { %v1317_v27 = vmul.f32 %v4861_v42, %v1315_v24  ;;  %v5631_v24 = vsel %vm752_vm5, %v5466_v28, %v5463_v25 }
 0xa95   :  { %v1195_v61 = vpop.permute.xlu1 %1194 }
 0xa96   :  { %v1197_v29 = vmul.f32 %v4863_v15, %v1195_v61  ;;  %v5569_v30 = vsel %vm1221_vm7, %v1317_v27, %v5405_v20 }
 0xa97   :  { %1391 = vrot.lane.b32.xlu0 %v5569_v30, %s5123_s21 }
 0xa98   :  { %v5576_v35 = vsel %vm752_vm5, %v1197_v29, %v5473_v40 }
 0xa99   :  { %1493 = vrot.lane.b32.xlu1 %v5576_v35, %s5123_s21 }
 0xb09   :  { %v1392_v37 = vpop.permute.xlu0 %1391 }
 0xb0a   :  { %4492 = vmatmul.mubr.msk.f32.vlgmr.msra.gmra.mxu0 %vm97_vm1, %v1392_v37 }
 0xb0b   :  { %v1494_v53 = vpop.permute.xlu1 %1493  ;;  %4506 = vmatpush3.msra.mxu0 %v5375_v56  ;;  %4513 = vmatprep.mubr.msk.f32.mxu0 %vm5120_vm0, %v5119_v1 }
 0xb0c   :  { %4503 = vmatmul.mubr.msk.f32.vlgmr.msra.gmra.mxu1 %vm97_vm1, %v1494_v53  ;;  %4507 = vmatprep.subr.mxu0 %v5119_v1 }
 0xb0d   :  { %4517 = vmatpush3.msra.mxu1 %v5188_v4  ;;  %4524 = vmatprep.mubr.msk.f32.mxu1 %vm5120_vm0, %v5119_v1 }
 0xb0e   :  { %4518 = vmatprep.subr.mxu1 %v5119_v1  ;;  %4508 = vmatpush3.msra.mxu0 %v5377_v58 }
 0xb0f   :  { %4519 = vmatpush3.msra.mxu1 %v5191_v5  ;;  %4509 = vmatprep.subr.mxu0 %v5119_v1 }
 0xb10   :  { %4520 = vmatprep.subr.mxu1 %v5119_v1  ;;  %4510 = vmatpush3.msra.mxu0 %v5381_v31 }
 0xb11   :  { %4521 = vmatpush3.msra.mxu1 %v5195_v8  ;;  %4511 = vmatprep.subr.mxu0 %v5119_v1 }
 0xb12   :  { %4522 = vmatprep.subr.mxu1 %v5119_v1  ;;  %4512 = vmatpush3.msra.mxu0 %v5385_v59 }
 0xb13   :  { %4523 = vmatpush3.msra.mxu1 %v5199_v10  ;;  %4527 = vmatprep.subr.mxu0 %v5119_v1 }
 0xb14   :  { %4525 = vmatmul.mubr.msk.f32.vlgmr.msra.gmra.mxu1 %vm97_vm1, %v1392_v37  ;;  %4538 = vmatprep.subr.mxu1 %v5119_v1  ;;  %v5641_v37 = vsel %vm1221_vm7, %v5554_v19, %v5546_v7 }
 0xb15   :  { %4539 = vmatpush3.msra.mxu1 %v5243_v34  ;;  %4546 = vmatprep.mubr.msk.f32.mxu1 %vm5120_vm0, %v5119_v1 }
 0xb16   :  { %4540 = vmatprep.subr.mxu1 %v5119_v1 }
 0xb17   :  { %4541 = vmatpush3.msra.mxu1 %v5251_v38  ;;  %v204_v38 = vadd.f32 %v5335_v60, %v5226_v17 }
 0xb18   :  { %4542 = vmatprep.subr.mxu1 %v5119_v1 }
 0xb19   :  { %4543 = vmatpush3.msra.mxu1 %v5271_v45 }
 0xb1a   :  { %4544 = vmatprep.subr.mxu1 %v5119_v1 }
 0xb1b   :  { %4545 = vmatpush3.msra.mxu1 %v5290_v50 }
 0xb1c   :  { %4560 = vmatprep.subr.mxu1 %v5119_v1 }
 0xbca   :  { %v1461_v4 = vpop.f32.mrf.mxu0 }
 0xbcb   :  { %v1462_v5 = vadd.f32 %v1461_v4, %v5532_v22 }
 0xbcc   :  { %v4493_v8 = vpop.f32.mrf.mxu0  ;;  %v5614_v10 = vpop.f32.mrf.mxu1 }
 0xbcd   :  { %v1465_v34 = vadd.f32 %v5352_v6, %v1462_v5 }
 0xbce   :  { %v4504_v20 = vpop.f32.mrf.mxu1 }
 0xbcf   :  { %4868 = vtanh.f32 %v1465_v34  ;;  %v4075_v22 = vmul.f32 -1.442695, %v1465_v34 }
 0xbd4   :  { %v1758_v45 = vpop.f32.mrf.mxu1 }
 0xbd5   :  { %v1762_v42 = vadd.f32 %v1758_v45, %v204_v38 }
 0xbd6   :  { %v4526_v47 = vpop.f32.mrf.mxu1 }
 0xbd7   :  { %4870 = vtanh.f32 %v1762_v42  ;;  %v4080_v15 = vmul.f32 -1.442695, %v1762_v42 }
 0xbd8   :  { %4872 = vpow2.f32 %v4075_v22 }
 0xbd9   :  { %4874 = vpow2.f32 %v4080_v15 }
 0xbdc   :  { %v4869_v50 = vpop.eup %4868 }
 0xbdd   :  { %1475 = vrot.lane.b32.xlu0 %v4869_v50, %s5122_s20 }
 0xbe4   :  { %v4871_v16 = vpop.eup %4870 }
 0xbe5   :  { %1772 = vrot.lane.b32.xlu1 %v4871_v16, %s5122_s20  ;;  %v4873_v49 = vpop.eup %4872 }
 0xbe6   :  { %v1469_v52 = vadd.f32 1.0, %v4873_v49  ;;  %v4875_v3 = vpop.eup %4874 }
 0xbe7   :  { %v1766_v9 = vadd.f32 1.0, %v4875_v3 }
 0xbe8   :  { %4876 = vrcp.f32 %v1469_v52 }
 0xbe9   :  { %4878 = vrcp.f32 %v1766_v9 }
 0xbf5   :  { %v4877_v17 = vpop.eup %4876 }
 0xbf6   :  { %v4879_v21 = vpop.eup %4878  ;;  %v1473_v27 = vmul.f32 %v4877_v17, %v5631_v24 }
 0xbf7   :  { %v1770_v53 = vmul.f32 %v4879_v21, %v5641_v37 }
 0xc4f   :  { %v1476_v60 = vpop.permute.xlu0 %1475 }
 0xc50   :  { %v1478_v18 = vmul.f32 %v4877_v17, %v1476_v60  ;;  %v5713_v60 = vsel %vm752_vm5, %v5558_v26, %v5552_v11 }
 0xc52   :  { %1480 = vrot.lane.b32.xlu0 %v1478_v18, %s5123_s21 }
 0xc57   :  { %v1773_v23 = vpop.permute.xlu1 %1772 }
 0xc58   :  { %v1775_v44 = vmul.f32 %v4879_v21, %v1773_v23 }
 0xc5a   :  { %1777 = vrot.lane.b32.xlu1 %v1775_v44, %s5123_s21 }
 0xc5e   :  { %1688 = vperm.xlu1 %4810, %v1686_v55  }
 0xcc4   :  { %v1481_v61 = vpop.permute.xlu0 %1480 }
 0xcc5   :  { %v5634_v29 = vadd.f32 %v1481_v61, %v1473_v27 }
 0xcc7   :  { %4880 = vtanh.f32 %v5634_v29  ;;  %v5723_v44 = vsel %vm1221_vm7, %v5634_v29, %v5631_v24 }
 0xccc   :  { %v1778_v4 = vpop.permute.xlu1 %1777 }
 0xccd   :  { %v5644_v5 = vadd.f32 %v1778_v4, %v1770_v53 }
 0xccf   :  { %4882 = vtanh.f32 %v5644_v5 }
 0xcd4   :  { %v4881_v25 = vpop.eup %4880 }
 0xcd5   :  { %1486 = vrot.lane.b32.xlu0 %v4881_v25, %s5122_s20 }
 0xcd9   :  { %v5656_v19 = vpop.permute.xlu1 %1688 }
 0xcda   :  { %vm1690_vm9 = vcmp.eq.s32.totalorder %v5656_v19, 1 }
 0xcdc   :  { %v4883_v28 = vpop.eup %4882 }
 0xcdd   :  { %1783 = vrot.lane.b32.xlu0 %v4883_v28, %s5122_s20 }
 0xd47   :  { %v1487_v8 = vpop.permute.xlu0 %1486 }
 0xd48   :  { %v1489_v34 = vmul.f32 %v4877_v17, %v1487_v8  ;;  %v5746_v8 = vld [vmem:[#allocation9 + $0x18] sm:$0xff] }
 0xd4a   :  { %v5652_v7 = vsel %vm1221_vm7, %v1489_v34, %v5480_v57  ;;  %v5752_v34 = vld [vmem:[#allocation9 + $0x10] sm:$0xff] }
 0xd4b   :  { %1568 = vrot.lane.b32.xlu1 %v5652_v7, %s5123_s21 }
 0xd4f   :  { %v1784_v20 = vpop.permute.xlu0 %1783 }
 0xd50   :  { %v1786_v38 = vmul.f32 %v4879_v21, %v1784_v20  ;;  %v5760_v20 = vld [vmem:[#allocation9] sm:$0xff] }
 0xd52   :  { %v5662_v45 = vsel %vm1690_vm9, %v1786_v38, %v5569_v30 }
 0xd53   :  { %1860 = vrot.lane.b32.xlu0 %v5662_v45, %s5123_s21 }
 0xdbd   :  { %v1569_v42 = vpop.permute.xlu1 %1568 }
 0xdbe   :  { %4514 = vmatmul.mubr.msk.f32.vlgmr.msra.gmra.mxu0 %vm97_vm1, %v1569_v42 }
 0xdbf   :  { %4528 = vmatpush3.msra.mxu0 %v5238_v32  ;;  %4535 = vmatprep.mubr.msk.f32.mxu0 %vm5120_vm0, %v5119_v1 }
 0xdc0   :  { %4529 = vmatprep.subr.mxu0 %v5119_v1 }
 0xdc1   :  { %4530 = vmatpush3.msra.mxu0 %v5240_v33 }
 0xdc2   :  { %4531 = vmatprep.subr.mxu0 %v5119_v1 }
 0xdc3   :  { %4532 = vmatpush3.msra.mxu0 %v5246_v36 }
 0xdc4   :  { %4533 = vmatprep.subr.mxu0 %v5119_v1 }
 0xdc5   :  { %4534 = vmatpush3.msra.mxu0 %v5254_v39  ;;  %v5676_v57 = vpop.permute.xlu0 %1860 }
 0xdc6   :  { %4536 = vmatmul.mubr.msk.f32.vlgmr.msra.gmra.mxu0 %vm97_vm1, %v1569_v42  ;;  %4547 = vmatmul.mubr.msk.f32.vlgmr.msra.gmra.mxu1 %vm97_vm1, %v5676_v57  ;;  %v5766_v42 = vld [vmem:[#allocation9 + $0x38] sm:$0xff] }
 0xdc7   :  { %4549 = vmatprep.subr.mxu0 %v5119_v1  ;;  %4557 = vmatprep.mubr.msk.f32.mxu0 %vm5120_vm0, %v5119_v1 }
 0xdc8   :  { %4550 = vmatpush3.msra.mxu0 %v5260_v41  ;;  %4561 = vmatpush3.msra.mxu1 %v5375_v56 }
 0xdc9   :  { %4551 = vmatprep.subr.mxu0 %v5119_v1  ;;  %4562 = vmatprep.subr.mxu1 %v5119_v1 }
 0xdca   :  { %4552 = vmatpush3.msra.mxu0 %v5267_v43  ;;  %4563 = vmatpush3.msra.mxu1 %v5377_v58 }
 0xdcb   :  { %4553 = vmatprep.subr.mxu0 %v5119_v1  ;;  %4564 = vmatprep.subr.mxu1 %v5119_v1 }
 0xdcc   :  { %4554 = vmatpush3.msra.mxu0 %v5275_v46  ;;  %4565 = vmatpush3.msra.mxu1 %v5381_v31 }
 0xdcd   :  { %4555 = vmatprep.subr.mxu0 %v5119_v1  ;;  %4566 = vmatprep.subr.mxu1 %v5119_v1 }
 0xdce   :  { %4556 = vmatpush3.msra.mxu0 %v5280_v48  ;;  %4567 = vmatpush3.msra.mxu1 %v5385_v59 }
 0xdcf   :  { %4571 = vmatprep.subr.mxu0 %v5119_v1  ;;  %4568 = vmatprep.mubr.msk.f32.mxu1 %vm5120_vm0, %v5119_v1 }
 0xdd0   :  { %4582 = vmatprep.subr.mxu1 %v5119_v1 }
 0xe7e   :  { %v1638_v32 = vpop.f32.mrf.mxu0 }
 0xe7f   :  { %v1639_v33 = vadd.f32 %v1638_v32, %v5614_v10  ;;  %v5773_v32 = vld [vmem:[#allocation9 + $0x30] sm:$0xff] }
 0xe80   :  { %v4515_v36 = vpop.f32.mrf.mxu0 }
 0xe81   :  { %v1642_v39 = vadd.f32 %v5448_v54, %v1639_v33  ;;  %v5776_v33 = vld [vmem:[#allocation7 + $0x38] sm:$0xff]  ;;  %v5784_v36 = vld [vmem:[#allocation7 + $0x30] sm:$0xff] }
 0xe83   :  { %4884 = vtanh.f32 %v1642_v39  ;;  %v4078_v47 = vmul.f32 -1.442695, %v1642_v39  ;;  %v5789_v39 = vld [vmem:[#allocation9 + $0x20] sm:$0xff] }
 0xe86   :  { %v1855_v41 = vpop.f32.mrf.mxu0  ;;  %v1930_v43 = vpop.f32.mrf.mxu1 }
 0xe87   :  { %v1931_v46 = vadd.f32 %v1930_v43, %v1855_v41  ;;  %v5792_v41 = vld [vmem:[#allocation7 + $0x28] sm:$0xff]  ;;  %v5797_v43 = vld [vmem:[#allocation9 + $0x58] sm:$0xff] }
 0xe88   :  { %v4537_v48 = vpop.f32.mrf.mxu0  ;;  %v4548_v58 = vpop.f32.mrf.mxu1 }
 0xe89   :  { %v1934_v31 = vadd.f32 %v5352_v6, %v1931_v46  ;;  %v5802_v46 = vld [vmem:[#allocation7 + $0x20] sm:$0xff]  ;;  %v5805_v48 = vld [vmem:[#allocation9 + $0x50] sm:$0xff]  ;;  %v5813_v58 = vld [vmem:[#allocation9 + $0x48] sm:$0xff] }
 0xe8b   :  { %4886 = vtanh.f32 %v1934_v31  ;;  %v4083_v10 = vmul.f32 -1.442695, %v1934_v31  ;;  %v5818_v31 = vld [vmem:[#allocation9 + $0x40] sm:$0xff] }
 0xe8c   :  { %4888 = vpow2.f32 %v4078_v47  ;;  %v5825_v47 = vld [vmem:[%s6355_s4] ss:$0 sm:$0xff] }
 0xe8d   :  { %4890 = vpow2.f32 %v4083_v10  ;;  %v209_v10 = vadd.f32 %v5825_v47, %v5341_v63 }
 0xe90   :  { %v4885_v59 = vpop.eup %4884 }
 0xe91   :  { %1652 = vrot.lane.b32.xlu1 %v4885_v59, %s5122_s20 }
 0xe98   :  { %v4887_v30 = vpop.eup %4886 }
 0xe99   :  { %1944 = vrot.lane.b32.xlu0 %v4887_v30, %s5122_s20  ;;  %v4889_v50 = vpop.eup %4888 }
 0xe9a   :  { %v1646_v16 = vadd.f32 1.0, %v4889_v50  ;;  %v4891_v22 = vpop.eup %4890 }
 0xe9b   :  { %v1938_v15 = vadd.f32 1.0, %v4891_v22 }
 0xe9c   :  { %4892 = vrcp.f32 %v1646_v16 }
 0xe9d   :  { %4894 = vrcp.f32 %v1938_v15 }
 0xea9   :  { %v4893_v49 = vpop.eup %4892 }
 0xeaa   :  { %v4895_v3 = vpop.eup %4894  ;;  %v1650_v18 = vmul.f32 %v4893_v49, %v5713_v60 }
 0xeab   :  { %v1942_v55 = vmul.f32 %v4895_v3, %v5723_v44 }
 0xf03   :  { %v1653_v52 = vpop.permute.xlu1 %1652 }
 0xf04   :  { %v1655_v6 = vmul.f32 %v4893_v49, %v1653_v52 }
 0xf06   :  { %1657 = vrot.lane.b32.xlu1 %v1655_v6, %s5123_s21 }
 0xf0b   :  { %v1945_v9 = vpop.permute.xlu0 %1944 }
 0xf0c   :  { %v1947_v17 = vmul.f32 %v4895_v3, %v1945_v9 }
 0xf0e   :  { %1949 = vrot.lane.b32.xlu0 %v1947_v17, %s5123_s21 }
 0xf78   :  { %v1658_v21 = vpop.permute.xlu1 %1657 }
 0xf79   :  { %v5716_v23 = vadd.f32 %v1658_v21, %v1650_v18 }
 0xf7b   :  { %4896 = vtanh.f32 %v5716_v23 }
 0xf80   :  { %v1950_v27 = vpop.permute.xlu0 %1949 }
 0xf81   :  { %v5726_v61 = vadd.f32 %v1950_v27, %v1942_v55 }
 0xf83   :  { %4898 = vtanh.f32 %v5726_v61 }
 0xf88   :  { %v4897_v14 = vpop.eup %4896 }
 0xf89   :  { %1663 = vrot.lane.b32.xlu1 %v4897_v14, %s5122_s20 }
 0xf90   :  { %v4899_v11 = vpop.eup %4898 }
 0xf91   :  { %1955 = vrot.lane.b32.xlu0 %v4899_v11, %s5122_s20 }
 0xffb   :  { %v1664_v26 = vpop.permute.xlu1 %1663 }
 0xffc   :  { %v1666_v53 = vmul.f32 %v4893_v49, %v1664_v26 }
 0xffe   :  { %v5734_v24 = vsel %vm1221_vm7, %v1666_v53, %v5576_v35 }
 0xfff   :  { %1962 = vrot.lane.b32.xlu1 %v5734_v24, %s5123_s21 }
0x1003   :  { %v1956_v29 = vpop.permute.xlu0 %1955 }
0x1004   :  { %v1958_v4 = vmul.f32 %v4895_v3, %v1956_v29  ;;  %v5837_v29 = vld [vmem:[%s6352_s1] sm:$0xff] }
0x1005   :  { %vm2154_vm10 = vcmp.gt.s32.totalorder %v5837_v29, 4  ;;  %vm2623_vm12 = vcmp.gt.s32.totalorder %v5837_v29, 5  ;;  %vm3092_vm14 = vcmp.gt.s32.totalorder %v5837_v29, 6  ;;  %vm3561_vm3 = vcmp.gt.s32.totalorder %v5837_v29, 7 }
0x1006   :  { %v5741_v25 = vsel %vm1690_vm9, %v1958_v4, %v5652_v7  ;;  %v5756_v7 = vld [vmem:[#allocation9 + $0x8] sm:$0xff] }
0x1007   :  { %2037 = vrot.lane.b32.xlu0 %v5741_v25, %s5123_s21 }
0x1071   :  { %v1963_v28 = vpop.permute.xlu1 %1962 }
0x1072   :  { %4558 = vmatmul.mubr.msk.f32.vlgmr.msra.gmra.mxu0 %vm97_vm1, %v1963_v28 }
0x1073   :  { %4572 = vmatpush3.msra.mxu0 %v5746_v8  ;;  %4579 = vmatprep.mubr.msk.f32.mxu0 %vm5120_vm0, %v5119_v1 }
0x1074   :  { %4573 = vmatprep.subr.mxu0 %v5119_v1 }
0x1075   :  { %4574 = vmatpush3.msra.mxu0 %v5752_v34 }
0x1076   :  { %4575 = vmatprep.subr.mxu0 %v5119_v1 }
0x1077   :  { %4576 = vmatpush3.msra.mxu0 %v5756_v7 }
0x1078   :  { %4577 = vmatprep.subr.mxu0 %v5119_v1 }
0x1079   :  { %4578 = vmatpush3.msra.mxu0 %v5760_v20  ;;  %v2038_v38 = vpop.permute.xlu0 %2037 }
0x107a   :  { %4569 = vmatmul.mubr.msk.f32.vlgmr.msra.gmra.mxu1 %vm97_vm1, %v2038_v38  ;;  %4580 = vmatmul.mubr.msk.f32.vlgmr.msra.gmra.mxu0 %vm97_vm1, %v5676_v57  ;;  %v5781_v57 = vld [vmem:[#allocation9 + $0x28] sm:$0xff] }
0x107b   :  { %4583 = vmatpush3.msra.mxu1 %v5766_v42  ;;  %4590 = vmatprep.mubr.msk.f32.mxu1 %vm5120_vm0, %v5119_v1 }
0x107c   :  { %4584 = vmatprep.subr.mxu1 %v5119_v1  ;;  %4593 = vmatprep.subr.mxu0 %v5119_v1 }
0x107d   :  { %4585 = vmatpush3.msra.mxu1 %v5773_v32  ;;  %4594 = vmatpush3.msra.mxu0 %v5776_v33 }
0x107e   :  { %4586 = vmatprep.subr.mxu1 %v5119_v1  ;;  %4595 = vmatprep.subr.mxu0 %v5119_v1 }
0x107f   :  { %4587 = vmatpush3.msra.mxu1 %v5781_v57  ;;  %4596 = vmatpush3.msra.mxu0 %v5784_v36 }
0x1080   :  { %4588 = vmatprep.subr.mxu1 %v5119_v1  ;;  %4597 = vmatprep.subr.mxu0 %v5119_v1 }
0x1081   :  { %4589 = vmatpush3.msra.mxu1 %v5789_v39  ;;  %4598 = vmatpush3.msra.mxu0 %v5792_v41 }
0x1082   :  { %4591 = vmatmul.mubr.msk.f32.vlgmr.msra.gmra.mxu1 %vm97_vm1, %v2038_v38  ;;  %4604 = vmatprep.subr.mxu1 %v5119_v1 }
0x1083   :  { %4605 = vmatpush3.msra.mxu1 %v5797_v43  ;;  %4599 = vmatprep.subr.mxu0 %v5119_v1 }
0x1084   :  { %4606 = vmatprep.subr.mxu1 %v5119_v1  ;;  %4600 = vmatpush3.msra.mxu0 %v5802_v46 }
0x1085   :  { %4607 = vmatpush3.msra.mxu1 %v5805_v48  ;;  %4601 = vmatprep.mubr.msk.f32.mxu0 %vm5120_vm0, %v5119_v1 }
0x1086   :  { %4608 = vmatprep.subr.mxu1 %v5119_v1  ;;  %4612 = vmatprep.mubr.msk.f32.mxu1 %vm5120_vm0, %v5119_v1 }
0x1087   :  { %4609 = vmatpush3.msra.mxu1 %v5813_v58  ;;  %4615 = vmatprep.subr.mxu0 %v5119_v1 }
0x1088   :  { %4610 = vmatprep.subr.mxu1 %v5119_v1 }
0x1089   :  { %4611 = vmatpush3.msra.mxu1 %v5818_v31 }
0x108a   :  { %4626 = vmatprep.subr.mxu1 %v5119_v1 }
0x1132   :  { %v2032_v59 = vpop.f32.mrf.mxu0 }
0x1134   :  { %v4559_v30 = vpop.f32.mrf.mxu0 }
0x1135   :  { %v5849_v30 = vsel %vm1690_vm9, %v5644_v5, %v5641_v37 }
0x113a   :  { %v2107_v50 = vpop.f32.mrf.mxu1  ;;  %v2227_v16 = vpop.f32.mrf.mxu0 }
0x113b   :  { %v2108_v22 = vadd.f32 %v2107_v50, %v2032_v59  ;;  %v2231_v15 = vadd.f32 %v2227_v16, %v209_v10  ;;  %v2155_v59 = vsel %vm2154_vm10, 1, %v5121_v13  ;;  %v5856_v16 = vsel %vm1221_vm7, %v5716_v23, %v5713_v60 }
0x113c   :  { %v4570_v49 = vpop.f32.mrf.mxu1  ;;  %v4581_v52 = vpop.f32.mrf.mxu0  ;;  %vm3090_vm7 = vcmask 48168  }
0x113d   :  { %v2111_v6 = vadd.f32 %v5448_v54, %v2108_v22  ;;  %4900 = vtanh.f32 %v2231_v15  ;;  %v4088_v63 = vmul.f32 -1.442695, %v2231_v15 }
0x113f   :  { %4902 = vtanh.f32 %v2111_v6  ;;  %v4086_v21 = vmul.f32 -1.442695, %v2111_v6 }
0x1140   :  { %4904 = vpow2.f32 %v4088_v63 }
0x1141   :  { %4906 = vpow2.f32 %v4086_v21 }
0x1142   :  { %v5830_v3 = vpop.f32.mrf.mxu1 }
0x1144   :  { %v4592_v9 = vpop.f32.mrf.mxu1 }
0x114a   :  { %v4901_v17 = vpop.eup %4900 }
0x114b   :  { %2241 = vrot.lane.b32.xlu1 %v4901_v17, %s5122_s20 }
0x114c   :  { %v4903_v18 = vpop.eup %4902 }
0x114d   :  { %2121 = vrot.lane.b32.xlu0 %v4903_v18, %s5122_s20  ;;  %v4905_v55 = vpop.eup %4904 }
0x114e   :  { %v4907_v27 = vpop.eup %4906  ;;  %v2235_v14 = vadd.f32 1.0, %v4905_v55  ;;  %v5906_v55 = vld [vmem:[#allocation7 + $0x40] sm:$0xff] }
0x114f   :  { %v2115_v11 = vadd.f32 1.0, %v4907_v27 }
0x1150   :  { %4908 = vrcp.f32 %v2235_v14 }
0x1151   :  { %4910 = vrcp.f32 %v2115_v11 }
0x115d   :  { %v4909_v54 = vpop.eup %4908 }
0x115e   :  { %v4911_v4 = vpop.eup %4910  ;;  %v2239_v10 = vmul.f32 %v4909_v54, %v5849_v30 }
0x115f   :  { %v2119_v15 = vmul.f32 %v4911_v4, %v5856_v16 }
0x11bd   :  { %v2242_v26 = vpop.permute.xlu1 %2241 }
0x11be   :  { %v2244_v53 = vmul.f32 %v4909_v54, %v2242_v26  ;;  %v5929_v26 = vld [vmem:[%s6355_s4 + $0x1] ss:$0 sm:$0xff] }
0x11bf   :  { %v2122_v28 = vpop.permute.xlu0 %2121 }
0x11c0   :  { %v2124_v38 = vmul.f32 %v4911_v4, %v2122_v28  ;;  %2246 = vrot.lane.b32.xlu1 %v2244_v53, %s5123_s21  ;;  %v214_v28 = vadd.f32 %v5825_v47, %v5339_v62 }
0x11c2   :  { %2126 = vrot.lane.b32.xlu0 %v2124_v38, %s5123_s21 }
0x11c4   :  { %2157 = vperm.xlu1 %4810, %v2155_v59  }
0x1232   :  { %v2247_v50 = vpop.permute.xlu1 %2246 }
0x1233   :  { %v5858_v22 = vadd.f32 %v2247_v50, %v2239_v10 }
0x1234   :  { %v2127_v49 = vpop.permute.xlu0 %2126 }
0x1235   :  { %4912 = vtanh.f32 %v5858_v22  ;;  %v5862_v52 = vadd.f32 %v2127_v49, %v2119_v15 }
0x1237   :  { %4914 = vtanh.f32 %v5862_v52 }
0x123f   :  { %v5867_v51 = vpop.permute.xlu1 %2157 }
0x1240   :  { %vm2159_vm11 = vcmp.eq.s32.totalorder %v5867_v51, 1 }
0x1242   :  { %v4913_v37 = vpop.eup %4912 }
0x1243   :  { %2252 = vrot.lane.b32.xlu0 %v4913_v37, %s5122_s20 }
0x1244   :  { %v4915_v5 = vpop.eup %4914 }
0x1245   :  { %2132 = vrot.lane.b32.xlu1 %v4915_v5, %s5122_s20 }
0x12b5   :  { %v2253_v60 = vpop.permute.xlu0 %2252 }
0x12b6   :  { %v2255_v23 = vmul.f32 %v4909_v54, %v2253_v60 }
0x12b7   :  { %v2133_v6 = vpop.permute.xlu1 %2132 }
0x12b8   :  { %v2135_v9 = vmul.f32 %v4911_v4, %v2133_v6  ;;  %v5873_v17 = vsel %vm2159_vm11, %v2255_v23, %v5662_v45  ;;  %v5894_v45 = vld [vmem:[#allocation7 + $0x50] sm:$0xff] }
0x12b9   :  { %2329 = vrot.lane.b32.xlu0 %v5873_v17, %s5123_s21 }
0x12ba   :  { %v5880_v18 = vsel %vm1690_vm9, %v2135_v9, %v5734_v24 }
0x12bb   :  { %2431 = vrot.lane.b32.xlu1 %v5880_v18, %s5123_s21 }
0x132b   :  { %v2330_v63 = vpop.permute.xlu0 %2329 }
0x132c   :  { %4602 = vmatmul.mubr.msk.f32.vlgmr.msra.gmra.mxu0 %vm97_vm1, %v2330_v63 }
0x132d   :  { %v2432_v21 = vpop.permute.xlu1 %2431  ;;  %4616 = vmatpush3.msra.mxu0 %v5375_v56  ;;  %4623 = vmatprep.mubr.msk.f32.mxu0 %vm5120_vm0, %v5119_v1  ;;  %v5900_v56 = vld [vmem:[#allocation7 + $0x48] sm:$0xff] }
0x132e   :  { %4613 = vmatmul.mubr.msk.f32.vlgmr.msra.gmra.mxu1 %vm97_vm1, %v2432_v21  ;;  %4617 = vmatprep.subr.mxu0 %v5119_v1 }
0x132f   :  { %4627 = vmatpush3.msra.mxu1 %v5746_v8  ;;  %4634 = vmatprep.mubr.msk.f32.mxu1 %vm5120_vm0, %v5119_v1 }
0x1330   :  { %4628 = vmatprep.subr.mxu1 %v5119_v1  ;;  %4618 = vmatpush3.msra.mxu0 %v5894_v45 }
0x1331   :  { %4629 = vmatpush3.msra.mxu1 %v5752_v34  ;;  %4619 = vmatprep.subr.mxu0 %v5119_v1 }
0x1332   :  { %4630 = vmatprep.subr.mxu1 %v5119_v1  ;;  %4620 = vmatpush3.msra.mxu0 %v5900_v56 }
0x1333   :  { %4631 = vmatpush3.msra.mxu1 %v5756_v7  ;;  %4621 = vmatprep.subr.mxu0 %v5119_v1 }
0x1334   :  { %4632 = vmatprep.subr.mxu1 %v5119_v1  ;;  %4622 = vmatpush3.msra.mxu0 %v5906_v55 }
0x1335   :  { %4633 = vmatpush3.msra.mxu1 %v5760_v20  ;;  %4637 = vmatprep.subr.mxu0 %v5119_v1 }
0x1336   :  { %4635 = vmatmul.mubr.msk.f32.vlgmr.msra.gmra.mxu1 %vm97_vm1, %v2330_v63  ;;  %4648 = vmatprep.subr.mxu1 %v5119_v1 }
0x1337   :  { %4649 = vmatpush3.msra.mxu1 %v5776_v33  ;;  %4656 = vmatprep.mubr.msk.f32.mxu1 %vm5120_vm0, %v5119_v1 }
0x1338   :  { %4650 = vmatprep.subr.mxu1 %v5119_v1 }
0x1339   :  { %4651 = vmatpush3.msra.mxu1 %v5784_v36 }
0x133a   :  { %4652 = vmatprep.subr.mxu1 %v5119_v1 }
0x133b   :  { %4653 = vmatpush3.msra.mxu1 %v5792_v41 }
0x133c   :  { %4654 = vmatprep.subr.mxu1 %v5119_v1 }
0x133d   :  { %4655 = vmatpush3.msra.mxu1 %v5802_v46 }
0x133e   :  { %4670 = vmatprep.subr.mxu1 %v5119_v1 }
0x13ec   :  { %v2399_v27 = vpop.f32.mrf.mxu0 }
0x13ed   :  { %v2400_v14 = vadd.f32 %v2399_v27, %v5830_v3 }
0x13ee   :  { %v4603_v11 = vpop.f32.mrf.mxu0  ;;  %v5924_v54 = vpop.f32.mrf.mxu1 }
0x13ef   :  { %v2403_v53 = vadd.f32 %v5929_v26, %v2400_v14  ;;  %v2624_v14 = vsel %vm2623_vm12, 1, %v5121_v13  ;;  %v5946_v11 = vsel %vm1690_vm9, %v5726_v61, %v5723_v44 }
0x13f0   :  { %v4614_v4 = vpop.f32.mrf.mxu1 }
0x13f1   :  { %4916 = vtanh.f32 %v2403_v53  ;;  %v4091_v15 = vmul.f32 -1.442695, %v2403_v53 }
0x13f6   :  { %v2696_v38 = vpop.f32.mrf.mxu1 }
0x13f7   :  { %v2700_v59 = vadd.f32 %v2696_v38, %v214_v28  ;;  %v5956_v38 = vsel %vm2159_vm11, %v5858_v22, %v5849_v30 }
0x13f8   :  { %v4636_v10 = vpop.f32.mrf.mxu1 }
0x13f9   :  { %4918 = vtanh.f32 %v2700_v59  ;;  %v4096_v49 = vmul.f32 -1.442695, %v2700_v59 }
0x13fa   :  { %4920 = vpow2.f32 %v4091_v15 }
0x13fb   :  { %4922 = vpow2.f32 %v4096_v49 }
0x13fe   :  { %v4917_v3 = vpop.eup %4916 }
0x13ff   :  { %2413 = vrot.lane.b32.xlu0 %v4917_v3, %s5122_s20 }
0x1406   :  { %v4919_v50 = vpop.eup %4918 }
0x1407   :  { %2710 = vrot.lane.b32.xlu1 %v4919_v50, %s5122_s20  ;;  %v4921_v37 = vpop.eup %4920 }
0x1408   :  { %v2407_v5 = vadd.f32 1.0, %v4921_v37  ;;  %v4923_v60 = vpop.eup %4922 }
0x1409   :  { %v2704_v23 = vadd.f32 1.0, %v4923_v60 }
0x140a   :  { %4924 = vrcp.f32 %v2407_v5 }
0x140b   :  { %4926 = vrcp.f32 %v2704_v23 }
0x1417   :  { %v4925_v62 = vpop.eup %4924 }
0x1418   :  { %v4927_v63 = vpop.eup %4926  ;;  %v2411_v53 = vmul.f32 %v4925_v62, %v5946_v11 }
0x1419   :  { %v2708_v59 = vmul.f32 %v4927_v63, %v5956_v38 }
0x1471   :  { %v2414_v6 = vpop.permute.xlu0 %2413 }
0x1472   :  { %v2416_v9 = vmul.f32 %v4925_v62, %v2414_v6 }
0x1474   :  { %2418 = vrot.lane.b32.xlu0 %v2416_v9, %s5123_s21  ;;  %v6023_v9 = vld [vmem:[%s6355_s4 + $0x2] ss:$0 sm:$0xff] }
0x1479   :  { %v2711_v21 = vpop.permute.xlu1 %2710 }
0x147a   :  { %v2713_v27 = vmul.f32 %v4927_v63, %v2711_v21 }
0x147c   :  { %2715 = vrot.lane.b32.xlu1 %v2713_v27, %s5123_s21 }
0x1480   :  { %2626 = vperm.xlu1 %4810, %v2624_v14  }
0x14e6   :  { %v2419_v4 = vpop.permute.xlu0 %2418 }
0x14e7   :  { %v5949_v28 = vadd.f32 %v2419_v4, %v2411_v53 }
0x14e9   :  { %4928 = vtanh.f32 %v5949_v28 }
0x14ee   :  { %v2716_v10 = vpop.permute.xlu1 %2715 }
0x14ef   :  { %v5959_v3 = vadd.f32 %v2716_v10, %v2708_v59 }
0x14f1   :  { %4930 = vtanh.f32 %v5959_v3 }
0x14f6   :  { %v4929_v44 = vpop.eup %4928 }
0x14f7   :  { %2424 = vrot.lane.b32.xlu0 %v4929_v44, %s5122_s20 }
0x14fb   :  { %v5971_v22 = vpop.permute.xlu1 %2626 }
0x14fc   :  { %vm2628_vm13 = vcmp.eq.s32.totalorder %v5971_v22, 1 }
0x14fe   :  { %v4931_v61 = vpop.eup %4930 }
0x14ff   :  { %2721 = vrot.lane.b32.xlu0 %v4931_v61, %s5122_s20 }
0x1569   :  { %v2425_v50 = vpop.permute.xlu0 %2424 }
0x156a   :  { %v2427_v15 = vmul.f32 %v4925_v62, %v2425_v50 }
0x156c   :  { %v5967_v30 = vsel %vm2159_vm11, %v2427_v15, %v5741_v25 }
0x156d   :  { %2506 = vrot.lane.b32.xlu1 %v5967_v30, %s5123_s21 }
0x1571   :  { %v2722_v49 = vpop.permute.xlu0 %2721 }
0x1572   :  { %v2724_v37 = vmul.f32 %v4927_v63, %v2722_v49 }
0x1574   :  { %v5977_v5 = vsel %vm2628_vm13, %v2724_v37, %v5873_v17  ;;  %v6000_v17 = vld [vmem:[#allocation7 + $0x58] sm:$0xff] }
0x1575   :  { %2798 = vrot.lane.b32.xlu0 %v5977_v5, %s5123_s21 }
0x15df   :  { %v2507_v60 = vpop.permute.xlu1 %2506 }
0x15e0   :  { %4624 = vmatmul.mubr.msk.f32.vlgmr.msra.gmra.mxu0 %vm97_vm1, %v2507_v60 }
0x15e1   :  { %4638 = vmatpush3.msra.mxu0 %v5766_v42  ;;  %4645 = vmatprep.mubr.msk.f32.mxu0 %vm5120_vm0, %v5119_v1 }
0x15e2   :  { %4639 = vmatprep.subr.mxu0 %v5119_v1 }
0x15e3   :  { %4640 = vmatpush3.msra.mxu0 %v5773_v32 }
0x15e4   :  { %4641 = vmatprep.subr.mxu0 %v5119_v1 }
0x15e5   :  { %4642 = vmatpush3.msra.mxu0 %v5781_v57 }
0x15e6   :  { %4643 = vmatprep.subr.mxu0 %v5119_v1 }
0x15e7   :  { %4644 = vmatpush3.msra.mxu0 %v5789_v39  ;;  %v5991_v25 = vpop.permute.xlu0 %2798 }
0x15e8   :  { %4646 = vmatmul.mubr.msk.f32.vlgmr.msra.gmra.mxu0 %vm97_vm1, %v2507_v60  ;;  %4657 = vmatmul.mubr.msk.f32.vlgmr.msra.gmra.mxu1 %vm97_vm1, %v5991_v25 }
0x15e9   :  { %4659 = vmatprep.subr.mxu0 %v5119_v1  ;;  %4667 = vmatprep.mubr.msk.f32.mxu0 %vm5120_vm0, %v5119_v1 }
0x15ea   :  { %4660 = vmatpush3.msra.mxu0 %v5797_v43  ;;  %4671 = vmatpush3.msra.mxu1 %v6000_v17 }
0x15eb   :  { %4661 = vmatprep.subr.mxu0 %v5119_v1  ;;  %4672 = vmatprep.subr.mxu1 %v5119_v1 }
0x15ec   :  { %4662 = vmatpush3.msra.mxu0 %v5805_v48  ;;  %4673 = vmatpush3.msra.mxu1 %v5894_v45 }
0x15ed   :  { %4663 = vmatprep.subr.mxu0 %v5119_v1  ;;  %4674 = vmatprep.subr.mxu1 %v5119_v1 }
0x15ee   :  { %4664 = vmatpush3.msra.mxu0 %v5813_v58  ;;  %4675 = vmatpush3.msra.mxu1 %v5900_v56 }
0x15ef   :  { %4665 = vmatprep.subr.mxu0 %v5119_v1  ;;  %4676 = vmatprep.subr.mxu1 %v5119_v1 }
0x15f0   :  { %4666 = vmatpush3.msra.mxu0 %v5818_v31  ;;  %4677 = vmatpush3.msra.mxu1 %v5906_v55 }
0x15f1   :  { %4681 = vmatprep.subr.mxu0 %v5119_v1  ;;  %4678 = vmatprep.mubr.msk.f32.mxu1 %vm5120_vm0, %v5119_v1 }
0x15f2   :  { %4692 = vmatprep.subr.mxu1 %v5119_v1 }
0x16a0   :  { %v2576_v23 = vpop.f32.mrf.mxu0 }
0x16a1   :  { %v2577_v62 = vadd.f32 %v2576_v23, %v5924_v54 }
0x16a2   :  { %v4625_v6 = vpop.f32.mrf.mxu0 }
0x16a3   :  { %v2580_v63 = vadd.f32 %v6023_v9, %v2577_v62 }
0x16a5   :  { %4932 = vtanh.f32 %v2580_v63  ;;  %v4094_v44 = vmul.f32 -1.442695, %v2580_v63  ;;  %v6035_v63 = vsel %vm1690_vm9, %v5862_v52, %v5856_v16  ;;  %vm4025_vm9 = vcmask 64568  }
0x16a8   :  { %v2793_v21 = vpop.f32.mrf.mxu0  ;;  %v2868_v27 = vpop.f32.mrf.mxu1 }
0x16a9   :  { %v2869_v14 = vadd.f32 %v2868_v27, %v2793_v21 }
0x16aa   :  { %v4647_v53 = vpop.f32.mrf.mxu0  ;;  %v4658_v4 = vpop.f32.mrf.mxu1 }
0x16ab   :  { %v2872_v59 = vadd.f32 %v5929_v26, %v2869_v14 }
0x16ad   :  { %4934 = vtanh.f32 %v2872_v59  ;;  %v4099_v61 = vmul.f32 -1.442695, %v2872_v59  ;;  %v6045_v59 = vsel %vm2159_vm11, %v5949_v28, %v5946_v11 }
0x16ae   :  { %4936 = vpow2.f32 %v4094_v44 }
0x16af   :  { %4938 = vpow2.f32 %v4099_v61 }
0x16b2   :  { %v4933_v10 = vpop.eup %4932 }
0x16b3   :  { %2590 = vrot.lane.b32.xlu1 %v4933_v10, %s5122_s20 }
0x16ba   :  { %v4935_v54 = vpop.eup %4934 }
0x16bb   :  { %2882 = vrot.lane.b32.xlu0 %v4935_v54, %s5122_s20  ;;  %v4937_v50 = vpop.eup %4936 }
0x16bc   :  { %v2584_v15 = vadd.f32 1.0, %v4937_v50  ;;  %v4939_v49 = vpop.eup %4938 }
0x16bd   :  { %v2876_v37 = vadd.f32 1.0, %v4939_v49 }
0x16be   :  { %4940 = vrcp.f32 %v2584_v15 }
0x16bf   :  { %4942 = vrcp.f32 %v2876_v37 }
0x16cb   :  { %v4941_v60 = vpop.eup %4940 }
0x16cc   :  { %v4943_v6 = vpop.eup %4942  ;;  %v2588_v14 = vmul.f32 %v4941_v60, %v6035_v63 }
0x16cd   :  { %v2880_v10 = vmul.f32 %v4943_v6, %v6045_v59 }
0x1725   :  { %v2591_v23 = vpop.permute.xlu1 %2590 }
0x1726   :  { %v2593_v62 = vmul.f32 %v4941_v60, %v2591_v23 }
0x1728   :  { %2595 = vrot.lane.b32.xlu1 %v2593_v62, %s5123_s21 }
0x172d   :  { %v2883_v21 = vpop.permute.xlu0 %2882 }
0x172e   :  { %v2885_v27 = vmul.f32 %v4943_v6, %v2883_v21 }
0x1730   :  { %2887 = vrot.lane.b32.xlu0 %v2885_v27, %s5123_s21 }
0x179a   :  { %v2596_v53 = vpop.permute.xlu1 %2595 }
0x179b   :  { %v6038_v4 = vadd.f32 %v2596_v53, %v2588_v14 }
0x179d   :  { %4944 = vtanh.f32 %v6038_v4 }
0x17a2   :  { %v2888_v54 = vpop.permute.xlu0 %2887 }
0x17a3   :  { %v6048_v44 = vadd.f32 %v2888_v54, %v2880_v10 }
0x17a5   :  { %4946 = vtanh.f32 %v6048_v44 }
0x17aa   :  { %v4945_v19 = vpop.eup %4944 }
0x17ab   :  { %2601 = vrot.lane.b32.xlu1 %v4945_v19, %s5122_s20 }
0x17b2   :  { %v4947_v16 = vpop.eup %4946 }
0x17b3   :  { %2893 = vrot.lane.b32.xlu0 %v4947_v16, %s5122_s20 }
0x181d   :  { %v2602_v52 = vpop.permute.xlu1 %2601 }
0x181e   :  { %v2604_v61 = vmul.f32 %v4941_v60, %v2602_v52  ;;  %v219_v60 = vadd.f32 %v5825_v47, %v5345_v2 }
0x1820   :  { %v6056_v11 = vsel %vm2159_vm11, %v2604_v61, %v5880_v18 }
0x1821   :  { %2900 = vrot.lane.b32.xlu1 %v6056_v11, %s5123_s21 }
0x1825   :  { %v2894_v28 = vpop.permute.xlu0 %2893 }
0x1826   :  { %v2896_v50 = vmul.f32 %v4943_v6, %v2894_v28 }
0x1828   :  { %v6063_v15 = vsel %vm2628_vm13, %v2896_v50, %v5967_v30 }
0x1829   :  { %2975 = vrot.lane.b32.xlu0 %v6063_v15, %s5123_s21 }
0x1893   :  { %v2901_v49 = vpop.permute.xlu1 %2900 }
0x1894   :  { %4668 = vmatmul.mubr.msk.f32.vlgmr.msra.gmra.mxu0 %vm97_vm1, %v2901_v49 }
0x1895   :  { %4682 = vmatpush3.msra.mxu0 %v5746_v8  ;;  %4689 = vmatprep.mubr.msk.f32.mxu0 %vm5120_vm0, %v5119_v1 }
0x1896   :  { %4683 = vmatprep.subr.mxu0 %v5119_v1 }
0x1897   :  { %4684 = vmatpush3.msra.mxu0 %v5752_v34 }
0x1898   :  { %4685 = vmatprep.subr.mxu0 %v5119_v1 }
0x1899   :  { %4686 = vmatpush3.msra.mxu0 %v5756_v7 }
0x189a   :  { %4687 = vmatprep.subr.mxu0 %v5119_v1 }
0x189b   :  { %4688 = vmatpush3.msra.mxu0 %v5760_v20  ;;  %v2976_v30 = vpop.permute.xlu0 %2975 }
0x189c   :  { %4679 = vmatmul.mubr.msk.f32.vlgmr.msra.gmra.mxu1 %vm97_vm1, %v2976_v30  ;;  %4690 = vmatmul.mubr.msk.f32.vlgmr.msra.gmra.mxu0 %vm97_vm1, %v5991_v25 }
0x189d   :  { %4693 = vmatpush3.msra.mxu1 %v5766_v42  ;;  %4700 = vmatprep.mubr.msk.f32.mxu1 %vm5120_vm0, %v5119_v1 }
0x189e   :  { %4694 = vmatprep.subr.mxu1 %v5119_v1  ;;  %4703 = vmatprep.subr.mxu0 %v5119_v1 }
0x189f   :  { %4695 = vmatpush3.msra.mxu1 %v5773_v32  ;;  %4704 = vmatpush3.msra.mxu0 %v5776_v33 }
0x18a0   :  { %4696 = vmatprep.subr.mxu1 %v5119_v1  ;;  %4705 = vmatprep.subr.mxu0 %v5119_v1 }
0x18a1   :  { %4697 = vmatpush3.msra.mxu1 %v5781_v57  ;;  %4706 = vmatpush3.msra.mxu0 %v5784_v36 }
0x18a2   :  { %4698 = vmatprep.subr.mxu1 %v5119_v1  ;;  %4707 = vmatprep.subr.mxu0 %v5119_v1 }
0x18a3   :  { %4699 = vmatpush3.msra.mxu1 %v5789_v39  ;;  %4708 = vmatpush3.msra.mxu0 %v5792_v41 }
0x18a4   :  { %4701 = vmatmul.mubr.msk.f32.vlgmr.msra.gmra.mxu1 %vm97_vm1, %v2976_v30  ;;  %4714 = vmatprep.subr.mxu1 %v5119_v1 }
0x18a5   :  { %4715 = vmatpush3.msra.mxu1 %v5797_v43  ;;  %4709 = vmatprep.subr.mxu0 %v5119_v1 }
0x18a6   :  { %4716 = vmatprep.subr.mxu1 %v5119_v1  ;;  %4710 = vmatpush3.msra.mxu0 %v5802_v46 }
0x18a7   :  { %4717 = vmatpush3.msra.mxu1 %v5805_v48  ;;  %4711 = vmatprep.mubr.msk.f32.mxu0 %vm5120_vm0, %v5119_v1 }
0x18a8   :  { %4718 = vmatprep.subr.mxu1 %v5119_v1  ;;  %4722 = vmatprep.mubr.msk.f32.mxu1 %vm5120_vm0, %v5119_v1 }
0x18a9   :  { %4719 = vmatpush3.msra.mxu1 %v5813_v58  ;;  %4725 = vmatprep.subr.mxu0 %v5119_v1 }
0x18aa   :  { %4720 = vmatprep.subr.mxu1 %v5119_v1 }
0x18ab   :  { %4721 = vmatpush3.msra.mxu1 %v5818_v31 }
0x18ac   :  { %4736 = vmatprep.subr.mxu1 %v5119_v1 }
0x1954   :  { %v2970_v25 = vpop.f32.mrf.mxu0 }
0x1956   :  { %v4669_v37 = vpop.f32.mrf.mxu0 }
0x195c   :  { %v3045_v23 = vpop.f32.mrf.mxu1  ;;  %v3165_v62 = vpop.f32.mrf.mxu0 }
0x195d   :  { %v3046_v6 = vadd.f32 %v3045_v23, %v2970_v25  ;;  %v3169_v21 = vadd.f32 %v3165_v62, %v219_v60 }
0x195e   :  { %v4680_v27 = vpop.f32.mrf.mxu1  ;;  %v4691_v14 = vpop.f32.mrf.mxu0 }
0x195f   :  { %v3049_v53 = vadd.f32 %v6023_v9, %v3046_v6  ;;  %4948 = vtanh.f32 %v3169_v21  ;;  %v4104_v2 = vmul.f32 -1.442695, %v3169_v21  ;;  %v3093_v6 = vsel %vm3092_vm14, 1, %v5121_v13 }
0x1960   :  { %v6129_v21 = vsel %vm2628_vm13, %v5959_v3, %v5956_v38 }
0x1961   :  { %4950 = vtanh.f32 %v3049_v53  ;;  %v4102_v52 = vmul.f32 -1.442695, %v3049_v53  ;;  %v6136_v53 = vsel %vm2159_vm11, %v6038_v4, %v6035_v63 }
0x1962   :  { %4952 = vpow2.f32 %v4104_v2 }
0x1963   :  { %4954 = vpow2.f32 %v4102_v52 }
0x1964   :  { %v6115_v10 = vpop.f32.mrf.mxu1 }
0x1966   :  { %v4702_v54 = vpop.f32.mrf.mxu1 }
0x196c   :  { %v4949_v19 = vpop.eup %4948 }
0x196d   :  { %3179 = vrot.lane.b32.xlu1 %v4949_v19, %s5122_s20 }
0x196e   :  { %v4951_v16 = vpop.eup %4950 }
0x196f   :  { %3059 = vrot.lane.b32.xlu0 %v4951_v16, %s5122_s20  ;;  %v4953_v61 = vpop.eup %4952 }
0x1970   :  { %v4955_v28 = vpop.eup %4954  ;;  %v3173_v50 = vadd.f32 1.0, %v4953_v61 }
0x1971   :  { %v3053_v49 = vadd.f32 1.0, %v4955_v28 }
0x1972   :  { %4956 = vrcp.f32 %v3173_v50 }
0x1973   :  { %4958 = vrcp.f32 %v3053_v49 }
0x197f   :  { %v4957_v30 = vpop.eup %4956 }
0x1980   :  { %v4959_v60 = vpop.eup %4958  ;;  %v3177_v27 = vmul.f32 %v4957_v30, %v6129_v21 }
0x1981   :  { %v3057_v19 = vmul.f32 %v4959_v60, %v6136_v53 }
0x19df   :  { %v3180_v25 = vpop.permute.xlu1 %3179 }
0x19e0   :  { %v3182_v37 = vmul.f32 %v4957_v30, %v3180_v25 }
0x19e1   :  { %v3060_v23 = vpop.permute.xlu0 %3059 }
0x19e2   :  { %v3062_v62 = vmul.f32 %v4959_v60, %v3060_v23  ;;  %3184 = vrot.lane.b32.xlu1 %v3182_v37, %s5123_s21 }
0x19e4   :  { %3064 = vrot.lane.b32.xlu0 %v3062_v62, %s5123_s21 }
0x19e6   :  { %3095 = vperm.xlu1 %4810, %v3093_v6  }
0x1a54   :  { %v3185_v14 = vpop.permute.xlu1 %3184 }
0x1a55   :  { %v6138_v54 = vadd.f32 %v3185_v14, %v3177_v27 }
0x1a56   :  { %v3065_v16 = vpop.permute.xlu0 %3064 }
0x1a57   :  { %4960 = vtanh.f32 %v6138_v54  ;;  %v6142_v2 = vadd.f32 %v3065_v16, %v3057_v19 }
0x1a59   :  { %4962 = vtanh.f32 %v6142_v2 }
0x1a61   :  { %v6147_v51 = vpop.permute.xlu1 %3095 }
0x1a62   :  { %vm3097_vm15 = vcmp.eq.s32.totalorder %v6147_v51, 1 }
0x1a64   :  { %v4961_v38 = vpop.eup %4960 }
0x1a65   :  { %3190 = vrot.lane.b32.xlu0 %v4961_v38, %s5122_s20 }
0x1a66   :  { %v4963_v3 = vpop.eup %4962 }
0x1a67   :  { %3070 = vrot.lane.b32.xlu1 %v4963_v3, %s5122_s20 }
0x1ad7   :  { %v3191_v63 = vpop.permute.xlu0 %3190 }
0x1ad8   :  { %v3193_v4 = vmul.f32 %v4957_v30, %v3191_v63  ;;  %v3562_v63 = vsel %vm3561_vm3, 1, %v5121_v13 }
0x1ad9   :  { %v3071_v52 = vpop.permute.xlu1 %3070 }
0x1ada   :  { %v3073_v61 = vmul.f32 %v4959_v60, %v3071_v52  ;;  %v6153_v28 = vsel %vm3097_vm15, %v3193_v4, %v5977_v5  ;;  %v6215_v4 = vsel %vm2628_vm13, %v6048_v44, %v6045_v59 }
0x1adb   :  { %3267 = vrot.lane.b32.xlu0 %v6153_v28, %s5123_s21 }
0x1adc   :  { %v6160_v50 = vsel %vm2628_vm13, %v3073_v61, %v6056_v11 }
0x1add   :  { %3369 = vrot.lane.b32.xlu1 %v6160_v50, %s5123_s21 }
0x1b4d   :  { %v3268_v49 = vpop.permute.xlu0 %3267 }
0x1b4e   :  { %4712 = vmatmul.mubr.msk.f32.vlgmr.msra.gmra.mxu0 %vm97_vm1, %v3268_v49 }
0x1b4f   :  { %v3370_v30 = vpop.permute.xlu1 %3369  ;;  %4726 = vmatpush3.msra.mxu0 %v6000_v17  ;;  %4733 = vmatprep.mubr.msk.f32.mxu0 %vm5120_vm0, %v5119_v1 }
0x1b50   :  { %4723 = vmatmul.mubr.msk.f32.vlgmr.msra.gmra.mxu1 %vm97_vm1, %v3370_v30  ;;  %4727 = vmatprep.subr.mxu0 %v5119_v1  ;;  %v3195_v30 = vsel %vm3097_vm15, %v6138_v54, %v6129_v21 }
0x1b51   :  { %4737 = vmatpush3.msra.mxu1 %v5746_v8  ;;  %4744 = vmatprep.mubr.msk.f32.mxu1 %vm5120_vm0, %v5119_v1 }
0x1b52   :  { %4738 = vmatprep.subr.mxu1 %v5119_v1  ;;  %4728 = vmatpush3.msra.mxu0 %v5894_v45 }
0x1b53   :  { %4739 = vmatpush3.msra.mxu1 %v5752_v34  ;;  %4729 = vmatprep.subr.mxu0 %v5119_v1 }
0x1b54   :  { %4740 = vmatprep.subr.mxu1 %v5119_v1  ;;  %4730 = vmatpush3.msra.mxu0 %v5900_v56 }
0x1b55   :  { %4741 = vmatpush3.msra.mxu1 %v5756_v7  ;;  %4731 = vmatprep.subr.mxu0 %v5119_v1 }
0x1b56   :  { %4742 = vmatprep.subr.mxu1 %v5119_v1  ;;  %4732 = vmatpush3.msra.mxu0 %v5906_v55 }
0x1b57   :  { %4743 = vmatpush3.msra.mxu1 %v5760_v20  ;;  %4747 = vmatprep.subr.mxu0 %v5119_v1 }
0x1b58   :  { %4745 = vmatmul.mubr.msk.f32.vlgmr.msra.gmra.mxu1 %vm97_vm1, %v3268_v49  ;;  %4758 = vmatprep.subr.mxu1 %v5119_v1 }
0x1b59   :  { %4759 = vmatpush3.msra.mxu1 %v5776_v33  ;;  %4766 = vmatprep.mubr.msk.f32.mxu1 %vm5120_vm0, %v5119_v1 }
0x1b5a   :  { %4760 = vmatprep.subr.mxu1 %v5119_v1 }
0x1b5b   :  { %4761 = vmatpush3.msra.mxu1 %v5784_v36  ;;  %v224_v36 = vadd.f32 %v5825_v47, %v5343_v0 }
0x1b5c   :  { %4762 = vmatprep.subr.mxu1 %v5119_v1 }
0x1b5d   :  { %4763 = vmatpush3.msra.mxu1 %v5792_v41 }
0x1b5e   :  { %4764 = vmatprep.subr.mxu1 %v5119_v1 }
0x1b5f   :  { %4765 = vmatpush3.msra.mxu1 %v5802_v46 }
0x1b60   :  { %4780 = vmatprep.subr.mxu1 %v5119_v1 }
0x1c0e   :  { %v3337_v8 = vpop.f32.mrf.mxu0 }
0x1c0f   :  { %v3338_v34 = vadd.f32 %v3337_v8, %v6115_v10 }
0x1c10   :  { %v4713_v7 = vpop.f32.mrf.mxu0  ;;  %v6198_v20 = vpop.f32.mrf.mxu1 }
0x1c11   :  { %v3341_v33 = vadd.f32 %v5929_v26, %v3338_v34 }
0x1c12   :  { %v4724_v5 = vpop.f32.mrf.mxu1 }
0x1c13   :  { %4964 = vtanh.f32 %v3341_v33  ;;  %v4107_v10 = vmul.f32 -1.442695, %v3341_v33 }
0x1c18   :  { %v3634_v41 = vpop.f32.mrf.mxu1 }
0x1c19   :  { %v3638_v25 = vadd.f32 %v3634_v41, %v224_v36 }
0x1c1a   :  { %v4746_v37 = vpop.f32.mrf.mxu1 }
0x1c1b   :  { %4966 = vtanh.f32 %v3638_v25  ;;  %v4112_v23 = vmul.f32 -1.442695, %v3638_v25 }
0x1c1c   :  { %4968 = vpow2.f32 %v4107_v10 }
0x1c1d   :  { %4970 = vpow2.f32 %v4112_v23 }
0x1c20   :  { %v4965_v46 = vpop.eup %4964 }
0x1c21   :  { %3351 = vrot.lane.b32.xlu0 %v4965_v46, %s5122_s20 }
0x1c28   :  { %v4967_v60 = vpop.eup %4966 }
0x1c29   :  { %3648 = vrot.lane.b32.xlu1 %v4967_v60, %s5122_s20  ;;  %v4969_v62 = vpop.eup %4968 }
0x1c2a   :  { %v3345_v6 = vadd.f32 1.0, %v4969_v62  ;;  %v4971_v27 = vpop.eup %4970 }
0x1c2b   :  { %v3642_v14 = vadd.f32 1.0, %v4971_v27 }
0x1c2c   :  { %4972 = vrcp.f32 %v3345_v6 }
0x1c2d   :  { %4974 = vrcp.f32 %v3642_v14  ;;  %v3075_v14 = vsel %vm2628_vm13, %v6142_v2, %v6136_v53 }
0x1c39   :  { %v4973_v0 = vpop.eup %4972 }
0x1c3a   :  { %v4975_v16 = vpop.eup %4974  ;;  %v3349_v52 = vmul.f32 %v4973_v0, %v6215_v4 }
0x1c3b   :  { %v3646_v13 = vmul.f32 %v4975_v16, %v3195_v30 }
0x1c93   :  { %v3352_v47 = vpop.permute.xlu0 %3351 }
0x1c94   :  { %v3354_v19 = vmul.f32 %v4973_v0, %v3352_v47 }
0x1c96   :  { %3356 = vrot.lane.b32.xlu0 %v3354_v19, %s5123_s21 }
0x1c9b   :  { %v3649_v38 = vpop.permute.xlu1 %3648 }
0x1c9c   :  { %v3651_v3 = vmul.f32 %v4975_v16, %v3649_v38 }
0x1c9e   :  { %3653 = vrot.lane.b32.xlu1 %v3651_v3, %s5123_s21 }
0x1ca2   :  { %3564 = vperm.xlu1 %4810, %v3562_v63  }
0x1d08   :  { %v3357_v61 = vpop.permute.xlu0 %3356 }
0x1d09   :  { %v6218_v49 = vadd.f32 %v3357_v61, %v3349_v52 }
0x1d0b   :  { %4976 = vtanh.f32 %v6218_v49 }
0x1d10   :  { %v3654_v8 = vpop.permute.xlu1 %3653 }
0x1d11   :  { %v3656_v34 = vadd.f32 %v3654_v8, %v3646_v13 }
0x1d13   :  { %4978 = vtanh.f32 %v3656_v34 }
0x1d18   :  { %v4977_v7 = vpop.eup %4976 }
0x1d19   :  { %3362 = vrot.lane.b32.xlu0 %v4977_v7, %s5122_s20 }
0x1d1d   :  { %v6234_v21 = vpop.permute.xlu1 %3564 }
0x1d1e   :  { %vm3566_vm5 = vcmp.eq.s32.totalorder %v6234_v21, 1 }
0x1d20   :  { %v4979_v59 = vpop.eup %4978 }
0x1d21   :  { %3659 = vrot.lane.b32.xlu0 %v4979_v59, %s5122_s20 }
0x1d8b   :  { %v3363_v44 = vpop.permute.xlu0 %3362 }
0x1d8c   :  { %v3365_v33 = vmul.f32 %v4973_v0, %v3363_v44 }
0x1d8e   :  { %v6230_v5 = vsel %vm3097_vm15, %v3365_v33, %v6063_v15 }
0x1d8f   :  { %3444 = vrot.lane.b32.xlu1 %v6230_v5, %s5123_s21 }
0x1d93   :  { %v3660_v54 = vpop.permute.xlu0 %3659 }
0x1d94   :  { %v3662_v36 = vmul.f32 %v4975_v16, %v3660_v54  ;;  %v3367_v16 = vsel %vm3097_vm15, %v6218_v49, %v6215_v4 }
0x1d96   :  { %v3663_v41 = vsel %vm3566_vm5, %v3662_v36, %v6153_v28 }
0x1d97   :  { %3735 = vrot.lane.b32.xlu0 %v3663_v41, %s5123_s21 }
0x1e01   :  { %v3445_v25 = vpop.permute.xlu1 %3444 }
0x1e02   :  { %4734 = vmatmul.mubr.msk.f32.vlgmr.msra.gmra.mxu0 %vm97_vm1, %v3445_v25 }
0x1e03   :  { %4748 = vmatpush3.msra.mxu0 %v5766_v42  ;;  %4755 = vmatprep.mubr.msk.f32.mxu0 %vm5120_vm0, %v5119_v1 }
0x1e04   :  { %4749 = vmatprep.subr.mxu0 %v5119_v1 }
0x1e05   :  { %4750 = vmatpush3.msra.mxu0 %v5773_v32 }
0x1e06   :  { %4751 = vmatprep.subr.mxu0 %v5119_v1 }
0x1e07   :  { %4752 = vmatpush3.msra.mxu0 %v5781_v57 }
0x1e08   :  { %4753 = vmatprep.subr.mxu0 %v5119_v1 }
0x1e09   :  { %4754 = vmatpush3.msra.mxu0 %v5789_v39  ;;  %v3736_v15 = vpop.permute.xlu0 %3735 }
0x1e0a   :  { %4756 = vmatmul.mubr.msk.f32.vlgmr.msra.gmra.mxu0 %vm97_vm1, %v3445_v25  ;;  %4767 = vmatmul.mubr.msk.f32.vlgmr.msra.gmra.mxu1 %vm97_vm1, %v3736_v15 }
0x1e0b   :  { %4769 = vmatprep.subr.mxu0 %v5119_v1  ;;  %4777 = vmatprep.mubr.msk.f32.mxu0 %vm5120_vm0, %v5119_v1 }
0x1e0c   :  { %4770 = vmatpush3.msra.mxu0 %v5797_v43  ;;  %4781 = vmatpush3.msra.mxu1 %v6000_v17 }
0x1e0d   :  { %4771 = vmatprep.subr.mxu0 %v5119_v1  ;;  %4782 = vmatprep.subr.mxu1 %v5119_v1 }
0x1e0e   :  { %4772 = vmatpush3.msra.mxu0 %v5805_v48  ;;  %4783 = vmatpush3.msra.mxu1 %v5894_v45 }
0x1e0f   :  { %4773 = vmatprep.subr.mxu0 %v5119_v1  ;;  %4784 = vmatprep.subr.mxu1 %v5119_v1 }
0x1e10   :  { %4774 = vmatpush3.msra.mxu0 %v5813_v58  ;;  %4785 = vmatpush3.msra.mxu1 %v5900_v56 }
0x1e11   :  { %4775 = vmatprep.subr.mxu0 %v5119_v1  ;;  %4786 = vmatprep.subr.mxu1 %v5119_v1 }
0x1e12   :  { %4776 = vmatpush3.msra.mxu0 %v5818_v31  ;;  %4787 = vmatpush3.msra.mxu1 %v5906_v55 }
0x1e13   :  { %4788 = vmatprep.mubr.msk.f32.mxu1 %vm5120_vm0, %v5119_v1  ;;  %vm745_vm0 = vcmask 7168  }
0x1ec2   :  { %v3514_v42 = vpop.f32.mrf.mxu0 }
0x1ec3   :  { %v3515_v32 = vadd.f32 %v3514_v42, %v6198_v20 }
0x1ec4   :  { %v4735_v57 = vpop.f32.mrf.mxu0 }
0x1ec5   :  { %v3518_v39 = vadd.f32 %v6023_v9, %v3515_v32 }
0x1ec7   :  { %4980 = vtanh.f32 %v3518_v39  ;;  %v4110_v1 = vmul.f32 -1.442695, %v3518_v39 }
0x1eca   :  { %v3730_v43 = vpop.f32.mrf.mxu0  ;;  %v3805_v48 = vpop.f32.mrf.mxu1 }
0x1ecb   :  { %v3806_v58 = vadd.f32 %v3805_v48, %v3730_v43 }
0x1ecc   :  { %v4757_v45 = vpop.f32.mrf.mxu0  ;;  %v4768_v56 = vpop.f32.mrf.mxu1 }
0x1ecd   :  { %v3809_v17 = vadd.f32 %v5929_v26, %v3806_v58 }
0x1ecf   :  { %4982 = vtanh.f32 %v3809_v17  ;;  %v4115_v28 = vmul.f32 -1.442695, %v3809_v17 }
0x1ed0   :  { %4984 = vpow2.f32 %v4110_v1 }
0x1ed1   :  { %4986 = vpow2.f32 %v4115_v28 }
0x1ed4   :  { %v4981_v31 = vpop.eup %4980 }
0x1ed5   :  { %3528 = vrot.lane.b32.xlu1 %v4981_v31, %s5122_s20 }
0x1edc   :  { %v4983_v55 = vpop.eup %4982 }
0x1edd   :  { %3819 = vrot.lane.b32.xlu0 %v4983_v55, %s5122_s20  ;;  %v4985_v20 = vpop.eup %4984 }
0x1ede   :  { %v3522_v37 = vadd.f32 1.0, %v4985_v20  ;;  %v4987_v46 = vpop.eup %4986 }
0x1edf   :  { %v3813_v60 = vadd.f32 1.0, %v4987_v46 }
0x1ee0   :  { %4988 = vrcp.f32 %v3522_v37 }
0x1ee1   :  { %4990 = vrcp.f32 %v3813_v60 }
0x1eed   :  { %v4989_v10 = vpop.eup %4988 }
0x1eee   :  { %v4991_v62 = vpop.eup %4990  ;;  %v3526_v0 = vmul.f32 %v4989_v10, %v3075_v14 }
0x1eef   :  { %v3817_v38 = vmul.f32 %v4991_v62, %v3367_v16 }
0x1f47   :  { %v3529_v23 = vpop.permute.xlu1 %3528 }
0x1f48   :  { %v3531_v26 = vmul.f32 %v4989_v10, %v3529_v23  ;;  %v4062_v23 = vld [vmem:[#allocation3] ss:$0 sm:$0xff] }
0x1f4a   :  { %3533 = vrot.lane.b32.xlu1 %v3531_v26, %s5123_s21 }
0x1f4f   :  { %v3820_v6 = vpop.permute.xlu0 %3819 }
0x1f50   :  { %v3822_v27 = vmul.f32 %v4991_v62, %v3820_v6 }
0x1f52   :  { %3824 = vrot.lane.b32.xlu0 %v3822_v27, %s5123_s21 }
0x1fbc   :  { %v3534_v47 = vpop.permute.xlu1 %3533 }
0x1fbd   :  { %v3536_v19 = vadd.f32 %v3534_v47, %v3526_v0 }
0x1fbf   :  { %4992 = vtanh.f32 %v3536_v19  ;;  %v3544_v48 = vsel %vm3097_vm15, %v3536_v19, %v3075_v14 }
0x1fc4   :  { %v3825_v3 = vpop.permute.xlu0 %3824 }
0x1fc5   :  { %v3827_v63 = vadd.f32 %v3825_v3, %v3817_v38 }
0x1fc7   :  { %4994 = vtanh.f32 %v3827_v63 }
0x1fcc   :  { %v4993_v52 = vpop.eup %4992 }
0x1fcd   :  { %3539 = vrot.lane.b32.xlu1 %v4993_v52, %s5122_s20 }
0x1fd4   :  { %v4995_v61 = vpop.eup %4994 }
0x1fd5   :  { %3830 = vrot.lane.b32.xlu0 %v4995_v61, %s5122_s20 }
0x203f   :  { %v3540_v22 = vpop.permute.xlu1 %3539 }
0x2040   :  { %v3542_v53 = vmul.f32 %v4989_v10, %v3540_v22 }
0x2042   :  { %v3543_v2 = vsel %vm3097_vm15, %v3542_v53, %v6160_v50 }
0x2043   :  { %3836 = vrot.lane.b32.xlu1 %v3543_v2, %s5123_s21 }
0x2047   :  { %v3831_v30 = vpop.permute.xlu0 %3830 }
0x2048   :  { %v3833_v4 = vmul.f32 %v4991_v62, %v3831_v30 }
0x204a   :  { %v3834_v49 = vsel %vm3566_vm5, %v3833_v4, %v6230_v5  ;;  %v4043_v5 = vld [vmem:[%s6356_s5] ss:$0 sm:$0xff]  ;;  %s5125_s5 = smov 1  }
0x204b   :  { %3911 = vrot.lane.b32.xlu0 %v3834_v49, %s5123_s21 }
0x20b5   :  { %v3837_v13 = vpop.permute.xlu1 %3836 }
0x20b6   :  { %4778 = vmatmul.mubr.msk.f32.vlgmr.msra.gmra.mxu0 %vm97_vm1, %v3837_v13 }
0x20bd   :  { %v3912_v8 = vpop.permute.xlu0 %3911 }
0x20be   :  { %4789 = vmatmul.mubr.msk.f32.vlgmr.msra.gmra.mxu1 %vm97_vm1, %v3912_v8 }
0x2176   :  { %v3906_v34 = vpop.f32.mrf.mxu0 }
0x2178   :  { %v4779_v7 = vpop.f32.mrf.mxu0 }
0x217e   :  { %v3981_v59 = vpop.f32.mrf.mxu1 }
0x217f   :  { %v3982_v44 = vadd.f32 %v3981_v59, %v3906_v34 }
0x2180   :  { %v4790_v33 = vpop.f32.mrf.mxu1 }
0x2181   :  { %v3985_v54 = vadd.f32 %v6023_v9, %v3982_v44 }
0x2183   :  { %4996 = vtanh.f32 %v3985_v54  ;;  %v4118_v41 = vmul.f32 -1.442695, %v3985_v54 }
0x2185   :  { %4998 = vpow2.f32 %v4118_v41 }
0x2190   :  { %v4997_v36 = vpop.eup %4996 }
0x2191   :  { %3995 = vrot.lane.b32.xlu1 %v4997_v36, %s5122_s20 }
0x2192   :  { %v4999_v25 = vpop.eup %4998 }
0x2193   :  { %v3989_v15 = vadd.f32 1.0, %v4999_v25 }
0x2195   :  { %726 = vrot.lane.b32.xlu1 %v4043_v5, %s5124_s10  ;;  %5000 = vrcp.f32 %v3989_v15 }
0x21a2   :  { %v5001_v42 = vpop.eup %5000 }
0x21a3   :  { %v3993_v58 = vmul.f32 %v5001_v42, %v3544_v48 }
0x2203   :  { %v3996_v32 = vpop.permute.xlu1 %3995 }
0x2204   :  { %v3998_v57 = vmul.f32 %v5001_v42, %v3996_v32 }
0x2206   :  { %4000 = vrot.lane.b32.xlu0 %v3998_v57, %s5123_s21 }
0x2207   :  { %v727_v9 = vpop.permute.xlu1 %726 }
0x2208   :  { %v729_v39 = vmul.f32 %v727_v9, %v5473_v40  ;;  %v1200_v43 = vmul.f32 %v5576_v35, %v727_v9  ;;  %v2138_v40 = vmul.f32 %v5880_v18, %v727_v9  ;;  %v3545_v35 = vmul.f32 %v3543_v2, %v727_v9 }
0x2209   :  { %v1669_v28 = vmul.f32 %v5734_v24, %v727_v9  ;;  %v2607_v20 = vmul.f32 %v6056_v11, %v727_v9  ;;  %v3076_v37 = vmul.f32 %v6160_v50, %v727_v9 }
0x220a   :  { %731 = vrot.lane.b32.xlu1 %v729_v39, %s5123_s21 }
0x220e   :  { %1202 = vrot.lane.b32.xlu1 %v1200_v43, %s5123_s21 }
0x2278   :  { %v4001_v45 = vpop.permute.xlu0 %4000 }
0x2279   :  { %v4003_v56 = vadd.f32 %v4001_v45, %v3993_v58 }
0x227b   :  { %5002 = vtanh.f32 %v4003_v56 }
0x227c   :  { %v732_v17 = vpop.permute.xlu1 %731 }
0x227d   :  { %v734_v51 = vsel %vm97_vm1, %v732_v17, 0.0 }
0x2280   :  { %v1203_v31 = vpop.permute.xlu1 %1202 }
0x2281   :  { %v1205_v55 = vsel %vm97_vm1, %v1203_v31, 0.0 }
0x2282   :  { %1206 = vadd.xlane.f32.xlu1 %v1205_v55 }
0x2288   :  { %v5003_v1 = vpop.eup %5002 }
0x2289   :  { %4006 = vrot.lane.b32.xlu0 %v5003_v1, %s5122_s20 }
0x2293   :  { %2140 = vrot.lane.b32.xlu1 %v2138_v40, %s5123_s21 }
0x2297   :  { %3547 = vrot.lane.b32.xlu1 %v3545_v35, %s5123_s21 }
0x22a8   :  { %735 = vadd.xlane.f32.xlu0 %v734_v51 }
0x22be   :  { %1671 = vrot.lane.b32.xlu0 %v1669_v28, %s5123_s21 }
0x22c2   :  { %2609 = vrot.lane.b32.xlu0 %v2607_v20, %s5123_s21 }
0x22c6   :  { %3078 = vrot.lane.b32.xlu0 %v3076_v37, %s5123_s21 }
0x22fb   :  { %v4007_v18 = vpop.permute.xlu0 %4006 }
0x22fc   :  { %v4009_v46 = vmul.f32 %v5001_v42, %v4007_v18 }
0x22fe   :  { %v4010_v60 = vsel %vm3566_vm5, %v4009_v46, %v3543_v2 }
0x22ff   :  { %v4011_v10 = vmul.f32 %v4010_v60, %v727_v9 }
0x2301   :  { %4013 = vrot.lane.b32.xlu0 %v4011_v10, %s5123_s21 }
0x230b   :  { %v1207_v24 = vpop.xlane.xlu1 %1206 }
0x230c   :  { %v1208_v26 = vsel %vm747_vm4, %v1207_v24, 0.0  ;;  %vm1683_vm4 = vcmask 23568  }
0x230d   :  { %v1209_v11 = vadd.f32 %v4062_v23, %v1208_v26 }
0x230f   :  { %1211 = vrot.lane.b32.xlu1 %v1209_v11, %s5125_s5  ;;  %v2141_v14 = vpop.permute.xlu1 %2140 }
0x2310   :  { %v2143_v2 = vsel %vm97_vm1, %v2141_v14, 0.0 }
0x2313   :  { %v3548_v38 = vpop.permute.xlu1 %3547 }
0x2314   :  { %v3550_v3 = vsel %vm97_vm1, %v3548_v38, 0.0 }
0x2331   :  { %v736_v62 = vpop.xlane.xlu0 %735 }
0x2332   :  { %v737_v50 = vsel %vm263_vm2, %v736_v62, 0.0  ;;  %vm1214_vm2 = vcmask 15368  }
0x2333   :  { %v744_v6 = vadd.f32 %v4062_v23, %v737_v50 }
0x2335   :  { %746 = vst.msk [vmem:[#allocation10] sm:$0xff] %vm745_vm0, %v744_v6  ;;  %v1672_v21 = vpop.permute.xlu0 %1671 }
0x2336   :  { %v1674_v27 = vsel %vm97_vm1, %v1672_v21, 0.0 }
0x2337   :  { %1675 = vadd.xlane.f32.xlu0 %v1674_v27 }
0x2339   :  { %v2610_v0 = vpop.permute.xlu0 %2609 }
0x233a   :  { %v2612_v47 = vsel %vm97_vm1, %v2610_v0, 0.0 }
0x233b   :  { %2613 = vadd.xlane.f32.xlu0 %v2612_v47 }
0x233d   :  { %v3079_v19 = vpop.permute.xlu0 %3078 }
0x233e   :  { %v3081_v16 = vsel %vm97_vm1, %v3079_v19, 0.0 }
0x233f   :  { %3082 = vadd.xlane.f32.xlu0 %v3081_v16 }
0x2343   :  { %3551 = vadd.xlane.f32.xlu0 %v3550_v3 }
0x2373   :  { %v4014_v52 = vpop.permute.xlu0 %4013 }
0x2374   :  { %v4016_v30 = vsel %vm97_vm1, %v4014_v52, 0.0  ;;  %vm2152_vm1 = vcmask 31768  }
0x2381   :  { %v1212_v63 = vpop.permute.xlu1 %1211 }
0x2382   :  { %1215 = vst.msk [vmem:[#allocation10] sm:$0xff] %vm1214_vm2, %v1212_v63 }
0x23c0   :  { %v1676_v61 = vpop.xlane.xlu0 %1675 }
0x23c1   :  { %v1677_v22 = vsel %vm1216_vm6, %v1676_v61, 0.0  ;;  %vm2621_vm6 = vcmask 39968  }
0x23c2   :  { %v1678_v53 = vadd.f32 %v4062_v23, %v1677_v22 }
0x23c4   :  { %1680 = vrot.lane.b32.xlu1 %v1678_v53, %s5126_s11  ;;  %v2614_v4 = vpop.xlane.xlu0 %2613 }
0x23c5   :  { %v2615_v49 = vsel %vm2154_vm10, %v2614_v4, 0.0 }
0x23c6   :  { %v2616_v8 = vadd.f32 %v4062_v23, %v2615_v49 }
0x23c8   :  { %v3083_v13 = vpop.xlane.xlu0 %3082 }
0x23c9   :  { %v3084_v34 = vsel %vm2623_vm12, %v3083_v13, 0.0 }
0x23ca   :  { %v3085_v7 = vadd.f32 %v4062_v23, %v3084_v34 }
0x23cc   :  { %v3552_v44 = vpop.xlane.xlu0 %3551 }
0x23cd   :  { %v3553_v5 = vsel %vm3092_vm14, %v3552_v44, 0.0 }
0x23ce   :  { %v3554_v15 = vadd.f32 %v4062_v23, %v3553_v5 }
0x23e8   :  { %2144 = vadd.xlane.f32.xlu1 %v2143_v2 }
0x23ec   :  { %4017 = vadd.xlane.f32.xlu1 %v4016_v30 }
0x23fd   :  { %2618 = vrot.lane.b32.xlu1 %v2616_v8, %s5127_s12 }
0x2401   :  { %3087 = vrot.lane.b32.xlu1 %v3085_v7, %s5128_s13 }
0x2436   :  { %v1681_v59 = vpop.permute.xlu1 %1680 }
0x2437   :  { %1684 = vst.msk [vmem:[#allocation10] sm:$0xff] %vm1683_vm4, %v1681_v59 }
0x2471   :  { %v2145_v33 = vpop.xlane.xlu1 %2144 }
0x2472   :  { %v2146_v54 = vsel %vm1685_vm8, %v2145_v33, 0.0  ;;  %vm3559_vm8 = vcmask 56368  }
0x2473   :  { %v2147_v36 = vadd.f32 %v4062_v23, %v2146_v54 }
0x2475   :  { %2149 = vrot.lane.b32.xlu0 %v2147_v36, %s5129_s14  ;;  %v4018_v41 = vpop.xlane.xlu1 %4017 }
0x2476   :  { %v4019_v25 = vsel %vm3561_vm3, %v4018_v41, 0.0 }
0x2477   :  { %v4020_v42 = vadd.f32 %v4062_v23, %v4019_v25 }
0x2479   :  { %4022 = vrot.lane.b32.xlu1 %v4020_v42, %s5130_s15  ;;  %3556 = vrot.lane.b32.xlu0 %v3554_v15, %s5131_s16  ;;  %v2619_v32 = vpop.permute.xlu1 %2618 }
0x247d   :  { %v3088_v12 = vpop.permute.xlu1 %3087 }
0x24e7   :  { %v2150_v57 = vpop.permute.xlu0 %2149 }
0x24e8   :  { %2153 = vst.msk [vmem:[#allocation10] sm:$0xff] %vm2152_vm1, %v2150_v57 }
0x24e9   :  { %2622 = vst.msk [vmem:[#allocation10] sm:$0xff] %vm2621_vm6, %v2619_v32 }
0x24ea   :  { %3091 = vst.msk [vmem:[#allocation10] sm:$0xff] %vm3090_vm7, %v3088_v12 }
0x24eb   :  { %v4023_v29 = vpop.permute.xlu1 %4022  ;;  %v3557_v9 = vpop.permute.xlu0 %3556 }
0x24ec   :  { %3560 = vst.msk [vmem:[#allocation10] sm:$0xff] %vm3559_vm8, %v3557_v9 }
0x24ed   :  { %4026 = vst.msk [vmem:[#allocation10] sm:$0xff] %vm4025_vm9, %v4023_v29 }
0x24ee   :  { %5099 = shalt.err (!%p5096_p5)
}
0x24ef   :  { %4036 = dma.vmem_to_hbm [thread:$0]  %s4034_s17, 128, %s6358_s7, [#allocation6]  }
0x24f0   :  { %5112 = dma.done.wait [#allocation6], 128  }
0x24f1   :  { %5113 = vsyncadd [#allocation6], 4294967168 }
0x24f2   :  { %4040 = vsyncpa [#allocation5], 1 }
0x24f3   :  { %4041 = vsyncpa [#allocation8], 1 }
0x24f4   :  { %4042 = vsyncpa [#allocation6], 1 }

</bundles_post_ra>
